<compile_context>
chip_gen: v7x
topology: tpu7x:2x2x1
jax: 0.10.0
libtpu: 0.0.40
codegen_flags: <defaults>
</compile_context>

<pallas_src>
import functools

import jax
import jax.numpy as jnp
from jax.experimental import pallas as pl
from jax.experimental.pallas import tpu as pltpu


# ---------------------------------------------------------------------------
# Fused residual-block kernel (one batch element per grid step)
# ---------------------------------------------------------------------------
def _resblock_kernel(x_ref, w1_ref, b1_ref, w2_ref, b2_ref, o_ref, h_scr,
                     *, H, W, Cp):
    """x_ref : (1, H+2, W+2, Cp) f32  spatially pre-padded, channel-padded input
       w*_ref: (9, Cp, Cp)       bf16 tap-major weights, w[t] = W[kh,kw] (Cin,Cout)
       b*_ref: (1, Cp)           f32
       o_ref : (1, H, W, Cp)     f32
       h_scr : (1, H+2, W+2, Cp) f32  VMEM scratch for the padded intermediate
    """
    M = H * W

    def conv3x3(src_ref, w_ref):
        acc = jnp.zeros((M, Cp), jnp.float32)
        for t in range(9):                         # unrolled: 9 MXU matmuls
            kh, kw = t // 3, t % 3
            tap = src_ref[0, kh:kh + H, kw:kw + W, :].reshape(M, Cp)
            acc = acc + jnp.dot(tap.astype(jnp.bfloat16), w_ref[t],
                                preferred_element_type=jnp.float32)
        return acc

    # conv1 + bias + ReLU (f32 epilogue)
    h = jnp.maximum(conv3x3(x_ref, w1_ref) + b1_ref[...], 0.0)

    # re-pad the intermediate spatially inside VMEM (border stays zero)
    h_scr[...] = jnp.zeros_like(h_scr)
    h_scr[0, 1:1 + H, 1:1 + W, :] = h.reshape(H, W, Cp)

    # conv2 + bias + residual + ReLU
    res = x_ref[0, 1:1 + H, 1:1 + W, :].reshape(M, Cp)
    out = jnp.maximum(conv3x3(h_scr, w2_ref) + b2_ref[...] + res, 0.0)
    o_ref[...] = out.reshape(1, H, W, Cp).astype(o_ref.dtype)


# ---------------------------------------------------------------------------
# Wrapper: layout plumbing only (NCHW <-> NHWC, channel/spatial padding)
# ---------------------------------------------------------------------------
def resblock_conv_forward(params, x):
    """ResBlock_Conv.forward semantics. x: (B, C, H, W) f32 -> (B, C, H, W)."""
    B, C, H, W = x.shape
    Cp = ((C + 127) // 128) * 128          # lane-dense channel padding

    # NCHW -> NHWC, zero-pad channels to Cp, zero-pad spatially by 1 (halo).
    x_nhwc = jnp.transpose(x.astype(jnp.float32), (0, 2, 3, 1))
    x_pad = jnp.pad(x_nhwc, ((0, 0), (1, 1), (1, 1), (0, Cp - C)))

    def prep_w(w):   # (Cout, Cin, 3, 3) -> (9, Cp, Cp) bf16, tap-major
        Cout, Cin, k, _ = w.shape
        wt = jnp.transpose(w, (2, 3, 1, 0)).reshape(k * k, Cin, Cout)
        wt = jnp.pad(wt, ((0, 0), (0, Cp - Cin), (0, Cp - Cout)))
        return wt.astype(jnp.bfloat16)

    def prep_b(b):
        return jnp.pad(b, (0, Cp - b.shape[0])).reshape(1, Cp).astype(jnp.float32)

    w1, b1 = prep_w(params["conv1_w"]), prep_b(params["conv1_b"])
    w2, b2 = prep_w(params["conv2_w"]), prep_b(params["conv2_b"])

    kernel = functools.partial(_resblock_kernel, H=H, W=W, Cp=Cp)
    out = pl.pallas_call(
        kernel,
        out_shape=jax.ShapeDtypeStruct((B, H, W, Cp), jnp.float32),
        grid=(B,),
        in_specs=[
            pl.BlockSpec((1, H + 2, W + 2, Cp), lambda b: (b, 0, 0, 0)),
            pl.BlockSpec((9, Cp, Cp), lambda b: (0, 0, 0)),
            pl.BlockSpec((1, Cp), lambda b: (0, 0)),
            pl.BlockSpec((9, Cp, Cp), lambda b: (0, 0, 0)),
            pl.BlockSpec((1, Cp), lambda b: (0, 0)),
        ],
        out_specs=pl.BlockSpec((1, H, W, Cp), lambda b: (b, 0, 0, 0)),
        scratch_shapes=[pltpu.VMEM((1, H + 2, W + 2, Cp), jnp.float32)],
        compiler_params=pltpu.CompilerParams(
            dimension_semantics=("parallel",)),
    )(x_pad, w1, b1, w2, b2)

    # Back to the module's NCHW contract, drop padded channels.
    return jnp.transpose(out[..., :C], (0, 3, 1, 2))


# ---------------------------------------------------------------------------
# Pure-JAX reference (for correctness check)
# ---------------------------------------------------------------------------
def resblock_conv_ref(params, x):
    dn = ("NCHW", "OIHW", "NCHW")
    y = jax.lax.conv_general_dilated(x, params["conv1_w"], (1, 1),
                                     ((1, 1), (1, 1)), dimension_numbers=dn)
    y = jax.nn.relu(y + params["conv1_b"][None, :, None, None])
    y = jax.lax.conv_general_dilated(y, params["conv2_w"], (1, 1),
                                     ((1, 1), (1, 1)), dimension_numbers=dn)
    y = y + params["conv2_b"][None, :, None, None] + x
    return jax.nn.relu(y)


# ---------------------------------------------------------------------------
# Demo
# ---------------------------------------------------------------------------
def init_params(key, in_channels):
    k1, k2, k3, k4 = jax.random.split(key, 4)
    fan_in = in_channels * 3 * 3
    bound = 1.0 / (fan_in ** 0.5)          # PyTorch Conv2d default init
    u = lambda k, s: jax.random.uniform(k, s, jnp.float32, -bound, bound)
    return {
        "conv1_w": u(k1, (in_channels, in_channels, 3, 3)),
        "conv1_b": u(k2, (in_channels,)),
        "conv2_w": u(k3, (in_channels, in_channels, 3, 3)),
        "conv2_b": u(k4, (in_channels,)),
    }


if __name__ == "__main__":
    root = jax.random.PRNGKey(0)
    k_params, k_x = jax.random.split(root)

    B, C, H, W = 2, 32, 16, 16
    params = init_params(k_params, C)
    x = jax.random.normal(k_x, (B, C, H, W), jnp.float32)

    out = jax.jit(resblock_conv_forward)(params, x)
    jax.block_until_ready(out)

    ref = resblock_conv_ref(params, x)

    assert out.shape == (B, C, H, W)
    assert bool(jnp.all(jnp.isfinite(out)))
    max_err = float(jnp.max(jnp.abs(out - ref)))
    # bf16 matmul operands with f32 accumulation -> small, bounded error.
    assert max_err < 5e-2, f"max abs err vs reference = {max_err}"
    print("KERNEL_OK")
</pallas_src>

<mosaic_0001>
module attributes {stable_mosaic.version = 11 : i64} {
  func.func @_resblock_kernel(%arg0: i32, %arg1: memref<1x18x18x128xf32, #tpu.memory_space<vmem>>, %arg2: memref<9x128x128xbf16, #tpu.memory_space<vmem>>, %arg3: memref<1x128xf32, #tpu.memory_space<vmem>>, %arg4: memref<9x128x128xbf16, #tpu.memory_space<vmem>>, %arg5: memref<1x128xf32, #tpu.memory_space<vmem>>, %arg6: memref<1x16x16x128xf32, #tpu.memory_space<vmem>>, %arg7: memref<1x18x18x128xf32, #tpu.memory_space<vmem>>) attributes {dimension_semantics = [#tpu.dimension_semantics<parallel>], iteration_bounds = array<i64: 2>, scalar_prefetch = 0 : i64, scratch_operands = 1 : i64, tpu.core_type = #tpu.core_type<tc>, window_params = [{transform_indices = @transform_0, window_bounds = array<i64: 1, 18, 18, 128>}, {pipeline_mode = #tpu.pipeline_mode<synchronous>, transform_indices = @transform_1, window_bounds = array<i64: 9, 128, 128>}, {pipeline_mode = #tpu.pipeline_mode<synchronous>, transform_indices = @transform_2, window_bounds = array<i64: 1, 128>}, {pipeline_mode = #tpu.pipeline_mode<synchronous>, transform_indices = @transform_3, window_bounds = array<i64: 9, 128, 128>}, {pipeline_mode = #tpu.pipeline_mode<synchronous>, transform_indices = @transform_4, window_bounds = array<i64: 1, 128>}, {transform_indices = @transform_5, window_bounds = array<i64: 1, 16, 16, 128>}]} {
    %cst = arith.constant 0.000000e+00 : f32
    %0 = vector.broadcast %cst : f32 to vector<256x128xf32>
    %c0 = arith.constant 0 : index
    %c0_0 = arith.constant 0 : index
    %c0_1 = arith.constant 0 : index
    %c0_2 = arith.constant 0 : index
    %1 = vector.load %arg1[%c0, %c0_0, %c0_1, %c0_2] : memref<1x18x18x128xf32, #tpu.memory_space<vmem>>, vector<1x16x16x128xf32>
    %2 = vector.shape_cast %1 : vector<1x16x16x128xf32> to vector<16x16x128xf32>
    %3 = vector.shape_cast %2 : vector<16x16x128xf32> to vector<256x128xf32>
    %4 = arith.truncf %3 : vector<256x128xf32> to vector<256x128xbf16>
    %c0_3 = arith.constant 0 : index
    %c0_4 = arith.constant 0 : index
    %c0_5 = arith.constant 0 : index
    %5 = vector.load %arg2[%c0_3, %c0_4, %c0_5] : memref<9x128x128xbf16, #tpu.memory_space<vmem>>, vector<1x128x128xbf16>
    %6 = vector.shape_cast %5 : vector<1x128x128xbf16> to vector<128x128xbf16>
    %cst_6 = arith.constant dense<0.000000e+00> : vector<256x128xf32>
    %7 = tpu.matmul %4, %6, %cst_6 {dimension_numbers = #tpu.dot_dimension_numbers<[1], [0], [0], [1], [0, 0, 1, 1], [], []>} : vector<256x128xbf16>, vector<128x128xbf16>, vector<256x128xf32> -> vector<256x128xf32>
    %8 = arith.addf %0, %7 : vector<256x128xf32>
    %c0_7 = arith.constant 0 : index
    %c0_8 = arith.constant 0 : index
    %c1 = arith.constant 1 : index
    %c0_9 = arith.constant 0 : index
    %9 = vector.load %arg1[%c0_7, %c0_8, %c1, %c0_9] : memref<1x18x18x128xf32, #tpu.memory_space<vmem>>, vector<1x16x16x128xf32>
    %10 = vector.shape_cast %9 : vector<1x16x16x128xf32> to vector<16x16x128xf32>
    %11 = vector.shape_cast %10 : vector<16x16x128xf32> to vector<256x128xf32>
    %12 = arith.truncf %11 : vector<256x128xf32> to vector<256x128xbf16>
    %c1_10 = arith.constant 1 : index
    %c0_11 = arith.constant 0 : index
    %c0_12 = arith.constant 0 : index
    %13 = vector.load %arg2[%c1_10, %c0_11, %c0_12] : memref<9x128x128xbf16, #tpu.memory_space<vmem>>, vector<1x128x128xbf16>
    %14 = vector.shape_cast %13 : vector<1x128x128xbf16> to vector<128x128xbf16>
    %cst_13 = arith.constant dense<0.000000e+00> : vector<256x128xf32>
    %15 = tpu.matmul %12, %14, %cst_13 {dimension_numbers = #tpu.dot_dimension_numbers<[1], [0], [0], [1], [0, 0, 1, 1], [], []>} : vector<256x128xbf16>, vector<128x128xbf16>, vector<256x128xf32> -> vector<256x128xf32>
    %16 = arith.addf %8, %15 : vector<256x128xf32>
    %c0_14 = arith.constant 0 : index
    %c0_15 = arith.constant 0 : index
    %c2 = arith.constant 2 : index
    %c0_16 = arith.constant 0 : index
    %17 = vector.load %arg1[%c0_14, %c0_15, %c2, %c0_16] : memref<1x18x18x128xf32, #tpu.memory_space<vmem>>, vector<1x16x16x128xf32>
    %18 = vector.shape_cast %17 : vector<1x16x16x128xf32> to vector<16x16x128xf32>
    %19 = vector.shape_cast %18 : vector<16x16x128xf32> to vector<256x128xf32>
    %20 = arith.truncf %19 : vector<256x128xf32> to vector<256x128xbf16>
    %c2_17 = arith.constant 2 : index
    %c0_18 = arith.constant 0 : index
    %c0_19 = arith.constant 0 : index
    %21 = vector.load %arg2[%c2_17, %c0_18, %c0_19] : memref<9x128x128xbf16, #tpu.memory_space<vmem>>, vector<1x128x128xbf16>
    %22 = vector.shape_cast %21 : vector<1x128x128xbf16> to vector<128x128xbf16>
    %cst_20 = arith.constant dense<0.000000e+00> : vector<256x128xf32>
    %23 = tpu.matmul %20, %22, %cst_20 {dimension_numbers = #tpu.dot_dimension_numbers<[1], [0], [0], [1], [0, 0, 1, 1], [], []>} : vector<256x128xbf16>, vector<128x128xbf16>, vector<256x128xf32> -> vector<256x128xf32>
    %24 = arith.addf %16, %23 : vector<256x128xf32>
    %c0_21 = arith.constant 0 : index
    %c1_22 = arith.constant 1 : index
    %c0_23 = arith.constant 0 : index
    %c0_24 = arith.constant 0 : index
    %25 = vector.load %arg1[%c0_21, %c1_22, %c0_23, %c0_24] : memref<1x18x18x128xf32, #tpu.memory_space<vmem>>, vector<1x16x16x128xf32>
    %26 = vector.shape_cast %25 : vector<1x16x16x128xf32> to vector<16x16x128xf32>
    %27 = vector.shape_cast %26 : vector<16x16x128xf32> to vector<256x128xf32>
    %28 = arith.truncf %27 : vector<256x128xf32> to vector<256x128xbf16>
    %c3 = arith.constant 3 : index
    %c0_25 = arith.constant 0 : index
    %c0_26 = arith.constant 0 : index
    %29 = vector.load %arg2[%c3, %c0_25, %c0_26] : memref<9x128x128xbf16, #tpu.memory_space<vmem>>, vector<1x128x128xbf16>
    %30 = vector.shape_cast %29 : vector<1x128x128xbf16> to vector<128x128xbf16>
    %cst_27 = arith.constant dense<0.000000e+00> : vector<256x128xf32>
    %31 = tpu.matmul %28, %30, %cst_27 {dimension_numbers = #tpu.dot_dimension_numbers<[1], [0], [0], [1], [0, 0, 1, 1], [], []>} : vector<256x128xbf16>, vector<128x128xbf16>, vector<256x128xf32> -> vector<256x128xf32>
    %32 = arith.addf %24, %31 : vector<256x128xf32>
    %c0_28 = arith.constant 0 : index
    %c1_29 = arith.constant 1 : index
    %c1_30 = arith.constant 1 : index
    %c0_31 = arith.constant 0 : index
    %33 = vector.load %arg1[%c0_28, %c1_29, %c1_30, %c0_31] : memref<1x18x18x128xf32, #tpu.memory_space<vmem>>, vector<1x16x16x128xf32>
    %34 = vector.shape_cast %33 : vector<1x16x16x128xf32> to vector<16x16x128xf32>
    %35 = vector.shape_cast %34 : vector<16x16x128xf32> to vector<256x128xf32>
    %36 = arith.truncf %35 : vector<256x128xf32> to vector<256x128xbf16>
    %c4 = arith.constant 4 : index
    %c0_32 = arith.constant 0 : index
    %c0_33 = arith.constant 0 : index
    %37 = vector.load %arg2[%c4, %c0_32, %c0_33] : memref<9x128x128xbf16, #tpu.memory_space<vmem>>, vector<1x128x128xbf16>
    %38 = vector.shape_cast %37 : vector<1x128x128xbf16> to vector<128x128xbf16>
    %cst_34 = arith.constant dense<0.000000e+00> : vector<256x128xf32>
    %39 = tpu.matmul %36, %38, %cst_34 {dimension_numbers = #tpu.dot_dimension_numbers<[1], [0], [0], [1], [0, 0, 1, 1], [], []>} : vector<256x128xbf16>, vector<128x128xbf16>, vector<256x128xf32> -> vector<256x128xf32>
    %40 = arith.addf %32, %39 : vector<256x128xf32>
    %c0_35 = arith.constant 0 : index
    %c1_36 = arith.constant 1 : index
    %c2_37 = arith.constant 2 : index
    %c0_38 = arith.constant 0 : index
    %41 = vector.load %arg1[%c0_35, %c1_36, %c2_37, %c0_38] : memref<1x18x18x128xf32, #tpu.memory_space<vmem>>, vector<1x16x16x128xf32>
    %42 = vector.shape_cast %41 : vector<1x16x16x128xf32> to vector<16x16x128xf32>
    %43 = vector.shape_cast %42 : vector<16x16x128xf32> to vector<256x128xf32>
    %44 = arith.truncf %43 : vector<256x128xf32> to vector<256x128xbf16>
    %c5 = arith.constant 5 : index
    %c0_39 = arith.constant 0 : index
    %c0_40 = arith.constant 0 : index
    %45 = vector.load %arg2[%c5, %c0_39, %c0_40] : memref<9x128x128xbf16, #tpu.memory_space<vmem>>, vector<1x128x128xbf16>
    %46 = vector.shape_cast %45 : vector<1x128x128xbf16> to vector<128x128xbf16>
    %cst_41 = arith.constant dense<0.000000e+00> : vector<256x128xf32>
    %47 = tpu.matmul %44, %46, %cst_41 {dimension_numbers = #tpu.dot_dimension_numbers<[1], [0], [0], [1], [0, 0, 1, 1], [], []>} : vector<256x128xbf16>, vector<128x128xbf16>, vector<256x128xf32> -> vector<256x128xf32>
    %48 = arith.addf %40, %47 : vector<256x128xf32>
    %c0_42 = arith.constant 0 : index
    %c2_43 = arith.constant 2 : index
    %c0_44 = arith.constant 0 : index
    %c0_45 = arith.constant 0 : index
    %49 = vector.load %arg1[%c0_42, %c2_43, %c0_44, %c0_45] : memref<1x18x18x128xf32, #tpu.memory_space<vmem>>, vector<1x16x16x128xf32>
    %50 = vector.shape_cast %49 : vector<1x16x16x128xf32> to vector<16x16x128xf32>
    %51 = vector.shape_cast %50 : vector<16x16x128xf32> to vector<256x128xf32>
    %52 = arith.truncf %51 : vector<256x128xf32> to vector<256x128xbf16>
    %c6 = arith.constant 6 : index
    %c0_46 = arith.constant 0 : index
    %c0_47 = arith.constant 0 : index
    %53 = vector.load %arg2[%c6, %c0_46, %c0_47] : memref<9x128x128xbf16, #tpu.memory_space<vmem>>, vector<1x128x128xbf16>
    %54 = vector.shape_cast %53 : vector<1x128x128xbf16> to vector<128x128xbf16>
    %cst_48 = arith.constant dense<0.000000e+00> : vector<256x128xf32>
    %55 = tpu.matmul %52, %54, %cst_48 {dimension_numbers = #tpu.dot_dimension_numbers<[1], [0], [0], [1], [0, 0, 1, 1], [], []>} : vector<256x128xbf16>, vector<128x128xbf16>, vector<256x128xf32> -> vector<256x128xf32>
    %56 = arith.addf %48, %55 : vector<256x128xf32>
    %c0_49 = arith.constant 0 : index
    %c2_50 = arith.constant 2 : index
    %c1_51 = arith.constant 1 : index
    %c0_52 = arith.constant 0 : index
    %57 = vector.load %arg1[%c0_49, %c2_50, %c1_51, %c0_52] : memref<1x18x18x128xf32, #tpu.memory_space<vmem>>, vector<1x16x16x128xf32>
    %58 = vector.shape_cast %57 : vector<1x16x16x128xf32> to vector<16x16x128xf32>
    %59 = vector.shape_cast %58 : vector<16x16x128xf32> to vector<256x128xf32>
    %60 = arith.truncf %59 : vector<256x128xf32> to vector<256x128xbf16>
    %c7 = arith.constant 7 : index
    %c0_53 = arith.constant 0 : index
    %c0_54 = arith.constant 0 : index
    %61 = vector.load %arg2[%c7, %c0_53, %c0_54] : memref<9x128x128xbf16, #tpu.memory_space<vmem>>, vector<1x128x128xbf16>
    %62 = vector.shape_cast %61 : vector<1x128x128xbf16> to vector<128x128xbf16>
    %cst_55 = arith.constant dense<0.000000e+00> : vector<256x128xf32>
    %63 = tpu.matmul %60, %62, %cst_55 {dimension_numbers = #tpu.dot_dimension_numbers<[1], [0], [0], [1], [0, 0, 1, 1], [], []>} : vector<256x128xbf16>, vector<128x128xbf16>, vector<256x128xf32> -> vector<256x128xf32>
    %64 = arith.addf %56, %63 : vector<256x128xf32>
    %c0_56 = arith.constant 0 : index
    %c2_57 = arith.constant 2 : index
    %c2_58 = arith.constant 2 : index
    %c0_59 = arith.constant 0 : index
    %65 = vector.load %arg1[%c0_56, %c2_57, %c2_58, %c0_59] : memref<1x18x18x128xf32, #tpu.memory_space<vmem>>, vector<1x16x16x128xf32>
    %66 = vector.shape_cast %65 : vector<1x16x16x128xf32> to vector<16x16x128xf32>
    %67 = vector.shape_cast %66 : vector<16x16x128xf32> to vector<256x128xf32>
    %68 = arith.truncf %67 : vector<256x128xf32> to vector<256x128xbf16>
    %c8 = arith.constant 8 : index
    %c0_60 = arith.constant 0 : index
    %c0_61 = arith.constant 0 : index
    %69 = vector.load %arg2[%c8, %c0_60, %c0_61] : memref<9x128x128xbf16, #tpu.memory_space<vmem>>, vector<1x128x128xbf16>
    %70 = vector.shape_cast %69 : vector<1x128x128xbf16> to vector<128x128xbf16>
    %cst_62 = arith.constant dense<0.000000e+00> : vector<256x128xf32>
    %71 = tpu.matmul %68, %70, %cst_62 {dimension_numbers = #tpu.dot_dimension_numbers<[1], [0], [0], [1], [0, 0, 1, 1], [], []>} : vector<256x128xbf16>, vector<128x128xbf16>, vector<256x128xf32> -> vector<256x128xf32>
    %72 = arith.addf %64, %71 : vector<256x128xf32>
    %c0_63 = arith.constant 0 : index
    %c0_64 = arith.constant 0 : index
    %73 = vector.load %arg3[%c0_63, %c0_64] : memref<1x128xf32, #tpu.memory_space<vmem>>, vector<1x128xf32>
    %74 = vector.broadcast %73 : vector<1x128xf32> to vector<256x128xf32>
    %75 = arith.addf %72, %74 : vector<256x128xf32>
    %cst_65 = arith.constant 0.000000e+00 : f32
    %76 = vector.broadcast %cst_65 : f32 to vector<256x128xf32>
    %77 = arith.maximumf %75, %76 : vector<256x128xf32>
    %cst_66 = arith.constant 0.000000e+00 : f32
    %78 = vector.broadcast %cst_66 : f32 to vector<1x18x18x128xf32>
    %c0_67 = arith.constant 0 : index
    %c0_68 = arith.constant 0 : index
    %c0_69 = arith.constant 0 : index
    %c0_70 = arith.constant 0 : index
    %79 = vector.load %arg7[%c0_67, %c0_68, %c0_69, %c0_70] : memref<1x18x18x128xf32, #tpu.memory_space<vmem>>, vector<1x18x18x128xf32>
    tpu.vector_store %arg7[%c0_67, %c0_68, %c0_69, %c0_70], %78 {strides = array<i32>} : memref<1x18x18x128xf32, #tpu.memory_space<vmem>>, vector<1x18x18x128xf32>,
    %80 = vector.shape_cast %77 : vector<256x128xf32> to vector<16x16x128xf32>
    %c0_71 = arith.constant 0 : index
    %c1_72 = arith.constant 1 : index
    %c1_73 = arith.constant 1 : index
    %c0_74 = arith.constant 0 : index
    %81 = vector.load %arg7[%c0_71, %c1_72, %c1_73, %c0_74] : memref<1x18x18x128xf32, #tpu.memory_space<vmem>>, vector<1x16x16x128xf32>
    %82 = vector.shape_cast %81 : vector<1x16x16x128xf32> to vector<16x16x128xf32>
    %83 = vector.shape_cast %80 : vector<16x16x128xf32> to vector<1x16x16x128xf32>
    tpu.vector_store %arg7[%c0_71, %c1_72, %c1_73, %c0_74], %83 {strides = array<i32>} : memref<1x18x18x128xf32, #tpu.memory_space<vmem>>, vector<1x16x16x128xf32>,
    %c0_75 = arith.constant 0 : index
    %c1_76 = arith.constant 1 : index
    %c1_77 = arith.constant 1 : index
    %c0_78 = arith.constant 0 : index
    %84 = vector.load %arg1[%c0_75, %c1_76, %c1_77, %c0_78] : memref<1x18x18x128xf32, #tpu.memory_space<vmem>>, vector<1x16x16x128xf32>
    %85 = vector.shape_cast %84 : vector<1x16x16x128xf32> to vector<16x16x128xf32>
    %86 = vector.shape_cast %85 : vector<16x16x128xf32> to vector<256x128xf32>
    %cst_79 = arith.constant 0.000000e+00 : f32
    %87 = vector.broadcast %cst_79 : f32 to vector<256x128xf32>
    %c0_80 = arith.constant 0 : index
    %c0_81 = arith.constant 0 : index
    %c0_82 = arith.constant 0 : index
    %c0_83 = arith.constant 0 : index
    %88 = vector.load %arg7[%c0_80, %c0_81, %c0_82, %c0_83] : memref<1x18x18x128xf32, #tpu.memory_space<vmem>>, vector<1x16x16x128xf32>
    %89 = vector.shape_cast %88 : vector<1x16x16x128xf32> to vector<16x16x128xf32>
    %90 = vector.shape_cast %89 : vector<16x16x128xf32> to vector<256x128xf32>
    %91 = arith.truncf %90 : vector<256x128xf32> to vector<256x128xbf16>
    %c0_84 = arith.constant 0 : index
    %c0_85 = arith.constant 0 : index
    %c0_86 = arith.constant 0 : index
    %92 = vector.load %arg4[%c0_84, %c0_85, %c0_86] : memref<9x128x128xbf16, #tpu.memory_space<vmem>>, vector<1x128x128xbf16>
    %93 = vector.shape_cast %92 : vector<1x128x128xbf16> to vector<128x128xbf16>
    %cst_87 = arith.constant dense<0.000000e+00> : vector<256x128xf32>
    %94 = tpu.matmul %91, %93, %cst_87 {dimension_numbers = #tpu.dot_dimension_numbers<[1], [0], [0], [1], [0, 0, 1, 1], [], []>} : vector<256x128xbf16>, vector<128x128xbf16>, vector<256x128xf32> -> vector<256x128xf32>
    %95 = arith.addf %87, %94 : vector<256x128xf32>
    %c0_88 = arith.constant 0 : index
    %c0_89 = arith.constant 0 : index
    %c1_90 = arith.constant 1 : index
    %c0_91 = arith.constant 0 : index
    %96 = vector.load %arg7[%c0_88, %c0_89, %c1_90, %c0_91] : memref<1x18x18x128xf32, #tpu.memory_space<vmem>>, vector<1x16x16x128xf32>
    %97 = vector.shape_cast %96 : vector<1x16x16x128xf32> to vector<16x16x128xf32>
    %98 = vector.shape_cast %97 : vector<16x16x128xf32> to vector<256x128xf32>
    %99 = arith.truncf %98 : vector<256x128xf32> to vector<256x128xbf16>
    %c1_92 = arith.constant 1 : index
    %c0_93 = arith.constant 0 : index
    %c0_94 = arith.constant 0 : index
    %100 = vector.load %arg4[%c1_92, %c0_93, %c0_94] : memref<9x128x128xbf16, #tpu.memory_space<vmem>>, vector<1x128x128xbf16>
    %101 = vector.shape_cast %100 : vector<1x128x128xbf16> to vector<128x128xbf16>
    %cst_95 = arith.constant dense<0.000000e+00> : vector<256x128xf32>
    %102 = tpu.matmul %99, %101, %cst_95 {dimension_numbers = #tpu.dot_dimension_numbers<[1], [0], [0], [1], [0, 0, 1, 1], [], []>} : vector<256x128xbf16>, vector<128x128xbf16>, vector<256x128xf32> -> vector<256x128xf32>
    %103 = arith.addf %95, %102 : vector<256x128xf32>
    %c0_96 = arith.constant 0 : index
    %c0_97 = arith.constant 0 : index
    %c2_98 = arith.constant 2 : index
    %c0_99 = arith.constant 0 : index
    %104 = vector.load %arg7[%c0_96, %c0_97, %c2_98, %c0_99] : memref<1x18x18x128xf32, #tpu.memory_space<vmem>>, vector<1x16x16x128xf32>
    %105 = vector.shape_cast %104 : vector<1x16x16x128xf32> to vector<16x16x128xf32>
    %106 = vector.shape_cast %105 : vector<16x16x128xf32> to vector<256x128xf32>
    %107 = arith.truncf %106 : vector<256x128xf32> to vector<256x128xbf16>
    %c2_100 = arith.constant 2 : index
    %c0_101 = arith.constant 0 : index
    %c0_102 = arith.constant 0 : index
    %108 = vector.load %arg4[%c2_100, %c0_101, %c0_102] : memref<9x128x128xbf16, #tpu.memory_space<vmem>>, vector<1x128x128xbf16>
    %109 = vector.shape_cast %108 : vector<1x128x128xbf16> to vector<128x128xbf16>
    %cst_103 = arith.constant dense<0.000000e+00> : vector<256x128xf32>
    %110 = tpu.matmul %107, %109, %cst_103 {dimension_numbers = #tpu.dot_dimension_numbers<[1], [0], [0], [1], [0, 0, 1, 1], [], []>} : vector<256x128xbf16>, vector<128x128xbf16>, vector<256x128xf32> -> vector<256x128xf32>
    %111 = arith.addf %103, %110 : vector<256x128xf32>
    %c0_104 = arith.constant 0 : index
    %c1_105 = arith.constant 1 : index
    %c0_106 = arith.constant 0 : index
    %c0_107 = arith.constant 0 : index
    %112 = vector.load %arg7[%c0_104, %c1_105, %c0_106, %c0_107] : memref<1x18x18x128xf32, #tpu.memory_space<vmem>>, vector<1x16x16x128xf32>
    %113 = vector.shape_cast %112 : vector<1x16x16x128xf32> to vector<16x16x128xf32>
    %114 = vector.shape_cast %113 : vector<16x16x128xf32> to vector<256x128xf32>
    %115 = arith.truncf %114 : vector<256x128xf32> to vector<256x128xbf16>
    %c3_108 = arith.constant 3 : index
    %c0_109 = arith.constant 0 : index
    %c0_110 = arith.constant 0 : index
    %116 = vector.load %arg4[%c3_108, %c0_109, %c0_110] : memref<9x128x128xbf16, #tpu.memory_space<vmem>>, vector<1x128x128xbf16>
    %117 = vector.shape_cast %116 : vector<1x128x128xbf16> to vector<128x128xbf16>
    %cst_111 = arith.constant dense<0.000000e+00> : vector<256x128xf32>
    %118 = tpu.matmul %115, %117, %cst_111 {dimension_numbers = #tpu.dot_dimension_numbers<[1], [0], [0], [1], [0, 0, 1, 1], [], []>} : vector<256x128xbf16>, vector<128x128xbf16>, vector<256x128xf32> -> vector<256x128xf32>
    %119 = arith.addf %111, %118 : vector<256x128xf32>
    %c0_112 = arith.constant 0 : index
    %c1_113 = arith.constant 1 : index
    %c1_114 = arith.constant 1 : index
    %c0_115 = arith.constant 0 : index
    %120 = vector.load %arg7[%c0_112, %c1_113, %c1_114, %c0_115] : memref<1x18x18x128xf32, #tpu.memory_space<vmem>>, vector<1x16x16x128xf32>
    %121 = vector.shape_cast %120 : vector<1x16x16x128xf32> to vector<16x16x128xf32>
    %122 = vector.shape_cast %121 : vector<16x16x128xf32> to vector<256x128xf32>
    %123 = arith.truncf %122 : vector<256x128xf32> to vector<256x128xbf16>
    %c4_116 = arith.constant 4 : index
    %c0_117 = arith.constant 0 : index
    %c0_118 = arith.constant 0 : index
    %124 = vector.load %arg4[%c4_116, %c0_117, %c0_118] : memref<9x128x128xbf16, #tpu.memory_space<vmem>>, vector<1x128x128xbf16>
    %125 = vector.shape_cast %124 : vector<1x128x128xbf16> to vector<128x128xbf16>
    %cst_119 = arith.constant dense<0.000000e+00> : vector<256x128xf32>
    %126 = tpu.matmul %123, %125, %cst_119 {dimension_numbers = #tpu.dot_dimension_numbers<[1], [0], [0], [1], [0, 0, 1, 1], [], []>} : vector<256x128xbf16>, vector<128x128xbf16>, vector<256x128xf32> -> vector<256x128xf32>
    %127 = arith.addf %119, %126 : vector<256x128xf32>
    %c0_120 = arith.constant 0 : index
    %c1_121 = arith.constant 1 : index
    %c2_122 = arith.constant 2 : index
    %c0_123 = arith.constant 0 : index
    %128 = vector.load %arg7[%c0_120, %c1_121, %c2_122, %c0_123] : memref<1x18x18x128xf32, #tpu.memory_space<vmem>>, vector<1x16x16x128xf32>
    %129 = vector.shape_cast %128 : vector<1x16x16x128xf32> to vector<16x16x128xf32>
    %130 = vector.shape_cast %129 : vector<16x16x128xf32> to vector<256x128xf32>
    %131 = arith.truncf %130 : vector<256x128xf32> to vector<256x128xbf16>
    %c5_124 = arith.constant 5 : index
    %c0_125 = arith.constant 0 : index
    %c0_126 = arith.constant 0 : index
    %132 = vector.load %arg4[%c5_124, %c0_125, %c0_126] : memref<9x128x128xbf16, #tpu.memory_space<vmem>>, vector<1x128x128xbf16>
    %133 = vector.shape_cast %132 : vector<1x128x128xbf16> to vector<128x128xbf16>
    %cst_127 = arith.constant dense<0.000000e+00> : vector<256x128xf32>
    %134 = tpu.matmul %131, %133, %cst_127 {dimension_numbers = #tpu.dot_dimension_numbers<[1], [0], [0], [1], [0, 0, 1, 1], [], []>} : vector<256x128xbf16>, vector<128x128xbf16>, vector<256x128xf32> -> vector<256x128xf32>
    %135 = arith.addf %127, %134 : vector<256x128xf32>
    %c0_128 = arith.constant 0 : index
    %c2_129 = arith.constant 2 : index
    %c0_130 = arith.constant 0 : index
    %c0_131 = arith.constant 0 : index
    %136 = vector.load %arg7[%c0_128, %c2_129, %c0_130, %c0_131] : memref<1x18x18x128xf32, #tpu.memory_space<vmem>>, vector<1x16x16x128xf32>
    %137 = vector.shape_cast %136 : vector<1x16x16x128xf32> to vector<16x16x128xf32>
    %138 = vector.shape_cast %137 : vector<16x16x128xf32> to vector<256x128xf32>
    %139 = arith.truncf %138 : vector<256x128xf32> to vector<256x128xbf16>
    %c6_132 = arith.constant 6 : index
    %c0_133 = arith.constant 0 : index
    %c0_134 = arith.constant 0 : index
    %140 = vector.load %arg4[%c6_132, %c0_133, %c0_134] : memref<9x128x128xbf16, #tpu.memory_space<vmem>>, vector<1x128x128xbf16>
    %141 = vector.shape_cast %140 : vector<1x128x128xbf16> to vector<128x128xbf16>
    %cst_135 = arith.constant dense<0.000000e+00> : vector<256x128xf32>
    %142 = tpu.matmul %139, %141, %cst_135 {dimension_numbers = #tpu.dot_dimension_numbers<[1], [0], [0], [1], [0, 0, 1, 1], [], []>} : vector<256x128xbf16>, vector<128x128xbf16>, vector<256x128xf32> -> vector<256x128xf32>
    %143 = arith.addf %135, %142 : vector<256x128xf32>
    %c0_136 = arith.constant 0 : index
    %c2_137 = arith.constant 2 : index
    %c1_138 = arith.constant 1 : index
    %c0_139 = arith.constant 0 : index
    %144 = vector.load %arg7[%c0_136, %c2_137, %c1_138, %c0_139] : memref<1x18x18x128xf32, #tpu.memory_space<vmem>>, vector<1x16x16x128xf32>
    %145 = vector.shape_cast %144 : vector<1x16x16x128xf32> to vector<16x16x128xf32>
    %146 = vector.shape_cast %145 : vector<16x16x128xf32> to vector<256x128xf32>
    %147 = arith.truncf %146 : vector<256x128xf32> to vector<256x128xbf16>
    %c7_140 = arith.constant 7 : index
    %c0_141 = arith.constant 0 : index
    %c0_142 = arith.constant 0 : index
    %148 = vector.load %arg4[%c7_140, %c0_141, %c0_142] : memref<9x128x128xbf16, #tpu.memory_space<vmem>>, vector<1x128x128xbf16>
    %149 = vector.shape_cast %148 : vector<1x128x128xbf16> to vector<128x128xbf16>
    %cst_143 = arith.constant dense<0.000000e+00> : vector<256x128xf32>
    %150 = tpu.matmul %147, %149, %cst_143 {dimension_numbers = #tpu.dot_dimension_numbers<[1], [0], [0], [1], [0, 0, 1, 1], [], []>} : vector<256x128xbf16>, vector<128x128xbf16>, vector<256x128xf32> -> vector<256x128xf32>
    %151 = arith.addf %143, %150 : vector<256x128xf32>
    %c0_144 = arith.constant 0 : index
    %c2_145 = arith.constant 2 : index
    %c2_146 = arith.constant 2 : index
    %c0_147 = arith.constant 0 : index
    %152 = vector.load %arg7[%c0_144, %c2_145, %c2_146, %c0_147] : memref<1x18x18x128xf32, #tpu.memory_space<vmem>>, vector<1x16x16x128xf32>
    %153 = vector.shape_cast %152 : vector<1x16x16x128xf32> to vector<16x16x128xf32>
    %154 = vector.shape_cast %153 : vector<16x16x128xf32> to vector<256x128xf32>
    %155 = arith.truncf %154 : vector<256x128xf32> to vector<256x128xbf16>
    %c8_148 = arith.constant 8 : index
    %c0_149 = arith.constant 0 : index
    %c0_150 = arith.constant 0 : index
    %156 = vector.load %arg4[%c8_148, %c0_149, %c0_150] : memref<9x128x128xbf16, #tpu.memory_space<vmem>>, vector<1x128x128xbf16>
    %157 = vector.shape_cast %156 : vector<1x128x128xbf16> to vector<128x128xbf16>
    %cst_151 = arith.constant dense<0.000000e+00> : vector<256x128xf32>
    %158 = tpu.matmul %155, %157, %cst_151 {dimension_numbers = #tpu.dot_dimension_numbers<[1], [0], [0], [1], [0, 0, 1, 1], [], []>} : vector<256x128xbf16>, vector<128x128xbf16>, vector<256x128xf32> -> vector<256x128xf32>
    %159 = arith.addf %151, %158 : vector<256x128xf32>
    %c0_152 = arith.constant 0 : index
    %c0_153 = arith.constant 0 : index
    %160 = vector.load %arg5[%c0_152, %c0_153] : memref<1x128xf32, #tpu.memory_space<vmem>>, vector<1x128xf32>
    %161 = vector.broadcast %160 : vector<1x128xf32> to vector<256x128xf32>
    %162 = arith.addf %159, %161 : vector<256x128xf32>
    %163 = arith.addf %162, %86 : vector<256x128xf32>
    %cst_154 = arith.constant 0.000000e+00 : f32
    %164 = vector.broadcast %cst_154 : f32 to vector<256x128xf32>
    %165 = arith.maximumf %163, %164 : vector<256x128xf32>
    %166 = vector.shape_cast %165 : vector<256x128xf32> to vector<1x16x16x128xf32>
    %c0_155 = arith.constant 0 : index
    %c0_156 = arith.constant 0 : index
    %c0_157 = arith.constant 0 : index
    %c0_158 = arith.constant 0 : index
    %167 = vector.load %arg6[%c0_155, %c0_156, %c0_157, %c0_158] : memref<1x16x16x128xf32, #tpu.memory_space<vmem>>, vector<1x16x16x128xf32>
    tpu.vector_store %arg6[%c0_155, %c0_156, %c0_157, %c0_158], %166 {strides = array<i32>} : memref<1x16x16x128xf32, #tpu.memory_space<vmem>>, vector<1x16x16x128xf32>,
    return
  }
  func.func @transform_0(%arg0: i32) -> (i32, i32, i32, i32) {
    %c0_i32 = arith.constant 0 : i32
    %c0_i32_0 = arith.constant 0 : i32
    %c0_i32_1 = arith.constant 0 : i32
    %c0_i32_2 = arith.constant 0 : i32
    return %arg0, %c0_i32, %c0_i32_0, %c0_i32_1 : i32, i32, i32, i32
  }
  func.func @transform_1(%arg0: i32) -> (i32, i32, i32) {
    %c0_i32 = arith.constant 0 : i32
    %c0_i32_0 = arith.constant 0 : i32
    %c0_i32_1 = arith.constant 0 : i32
    %c0_i32_2 = arith.constant 0 : i32
    return %c0_i32, %c0_i32_0, %c0_i32_1 : i32, i32, i32
  }
  func.func @transform_2(%arg0: i32) -> (i32, i32) {
    %c0_i32 = arith.constant 0 : i32
    %c0_i32_0 = arith.constant 0 : i32
    %c0_i32_1 = arith.constant 0 : i32
    return %c0_i32, %c0_i32_0 : i32, i32
  }
  func.func @transform_3(%arg0: i32) -> (i32, i32, i32) {
    %c0_i32 = arith.constant 0 : i32
    %c0_i32_0 = arith.constant 0 : i32
    %c0_i32_1 = arith.constant 0 : i32
    %c0_i32_2 = arith.constant 0 : i32
    return %c0_i32, %c0_i32_0, %c0_i32_1 : i32, i32, i32
  }
  func.func @transform_4(%arg0: i32) -> (i32, i32) {
    %c0_i32 = arith.constant 0 : i32
    %c0_i32_0 = arith.constant 0 : i32
    %c0_i32_1 = arith.constant 0 : i32
    return %c0_i32, %c0_i32_0 : i32, i32
  }
  func.func @transform_5(%arg0: i32) -> (i32, i32, i32, i32) {
    %c0_i32 = arith.constant 0 : i32
    %c0_i32_0 = arith.constant 0 : i32
    %c0_i32_1 = arith.constant 0 : i32
    %c0_i32_2 = arith.constant 0 : i32
    return %arg0, %c0_i32, %c0_i32_0, %c0_i32_1 : i32, i32, i32, i32
  }
}

</mosaic_0001>

<bundles_post_ra>
// kernel: resblock_conv_forward.1
= control target key start
LH: loop header
LB: loop body
LE: loop exit
PB: predicated region body
PF: predicated region fallthrough
CT: control target
= control target key end

     0   :  { %s8627_s18 = smov 0   ;;  %s9807_s0 = inlined_call_operand.vmem [shape: f32[2,18,18,128], index: 0, kind: input, shape index: {}]   ;;  %s9808_s1 = inlined_call_operand.vmem [shape: bf16[9,128,128], index: 1, kind: input, shape index: {}]   ;;  %s9809_s2 = inlined_call_operand.vmem [shape: f32[1,128], index: 2, kind: input, shape index: {}]   ;;  %s9810_s3 = inlined_call_operand.vmem [shape: bf16[9,128,128], index: 3, kind: input, shape index: {}]   ;;  %s9811_s4 = inlined_call_operand.vmem [shape: f32[1,128], index: 4, kind: input, shape index: {}]   ;;  %s9812_s5 = inlined_call_operand.vmem [shape: f32[2,16,16,128], index: 5, kind: output, shape index: {}]  }
   0x1 LB: > { %s5987_s19 = sadd.s32 4294967295, %s8593_s18   ;;  %p5991_p0 = scmp.ge.s32.totalorder %s8593_s18, 1  ;;  %s8593_s18 = sphi %s8627_s18, %s15_s18  }
   0x2   : > { %p187_p1 = scmp.lt.s32.totalorder %s8593_s18, 3 }
   0x4   : > { %p188_p2 = pnand %p5991_p0, %p187_p1 }
   0x5   : > { %v8442_v0 = vld [vmem:[%s9808_s1 + $0x40] sm:$0xff] (!%p188_p2)   ;;  %p215_p3 = scmp.lt.s32.totalorder (!%p188_p2), %s5987_s19, 1  ;;  %v8443_v1 = vld [vmem:[%s9808_s1 + $0x48] sm:$0xff] (!%p188_p2)   ;;  %v8444_v2 = vld [vmem:[%s9808_s1 + $0x50] sm:$0xff] (!%p188_p2)  }
   0x6   : > { %191 = sbr.rel (%p188_p2) target bundleno = 1561 (0x619), region = 40  ;;  %7056 = vmatprep.subr.bf16.mxu0 (!%p188_p2), %v8442_v0  ;;  %v8445_v3 = vld [vmem:[%s9808_s1 + $0x58] sm:$0xff] (!%p188_p2)   ;;  %v8446_v7 = vld [vmem:[%s9808_s1 + $0x60] sm:$0xff] (!%p188_p2)   ;;  %v8447_v8 = vld [vmem:[%s9808_s1 + $0x68] sm:$0xff] (!%p188_p2)  }
   0x7   : > { %7057 = vmatpush3.bf16.msra.mxu0 (!%p188_p2), %v8442_v0  ;;  %v8448_v9 = vld [vmem:[%s9808_s1 + $0x70] sm:$0xff] (!%p188_p2)   ;;  %v8449_v10 = vld [vmem:[%s9808_s1 + $0x78] sm:$0xff] (!%p188_p2)   ;;  %v8450_v13 = vld [vmem:[%s9808_s1] sm:$0xff] (!%p188_p2)  }
   0x8   : > { %7058 = vmatprep.subr.bf16.mxu0 (!%p188_p2), %v8443_v1  ;;  %v8451_v18 = vld [vmem:[%s9808_s1 + $0x8] sm:$0xff] (!%p188_p2)   ;;  %v8452_v23 = vld [vmem:[%s9808_s1 + $0x10] sm:$0xff] (!%p188_p2)   ;;  %v8453_v26 = vld [vmem:[%s9808_s1 + $0x18] sm:$0xff] (!%p188_p2)  }
   0x9   : > { %v8454_v31 = vld [vmem:[%s9808_s1 + $0x20] sm:$0xff] (!%p188_p2)   ;;  %v8455_v34 = vld [vmem:[%s9808_s1 + $0x28] sm:$0xff] (!%p188_p2)   ;;  %v8456_v39 = vld [vmem:[%s9808_s1 + $0x30] sm:$0xff] (!%p188_p2)  }
   0xa   : > { %v8457_v41 = vld [vmem:[%s9808_s1 + $0x38] sm:$0xff] (!%p188_p2)   ;;  %v8458_v47 = vld [vmem:[%s9808_s1 + $0x80] sm:$0xff] (!%p188_p2)  }
   0xb   : > { %7059 = vmatpush3.bf16.msra.mxu0 (!%p188_p2), %v8443_v1 }
   0xc   : > { %7060 = vmatprep.subr.bf16.mxu0 (!%p188_p2), %v8444_v2 }
   0xd   : > { %s9814_s19 = smov (!%p215_p3, %s5987_s19), 1 }
   0xe   : > { %s8432_s26 = smul.u32 432, %s9814_s19  ;;  %s6623_s30 = sshll.u32 %s9814_s19, 8 }
   0xf   : > { %7061 = vmatpush3.bf16.msra.mxu0 %v8444_v2  ;;  %s9713_s8 = scalar_lea.vmem %s9812_s5, %s6623_s30 }
  0x10   : > { %s8650_s29 = scalar_lea.vmem %s9807_s0, %s8432_s26  ;;  %7062 = vmatprep.subr.bf16.mxu0 %v8445_v3 }
  0x11   : > { %v290_v4 = vld [vmem:[%s8650_s29 + $0x1] sm:$0xff]  ;;  %v291_v5 = vld [vmem:[%s8650_s29 + $0x9] sm:$0xff]  ;;  %v292_v11 = vld [vmem:[%s8650_s29 + $0x19] sm:$0xff] }
  0x12   : > { %v322_v6 = vpack.c.bf16 %v291_v5, %v290_v4  ;;  %v293_v12 = vld [vmem:[%s8650_s29 + $0x21] sm:$0xff]  ;;  %v294_v14 = vld [vmem:[%s8650_s29 + $0x31] sm:$0xff]  ;;  %v295_v15 = vld [vmem:[%s8650_s29 + $0x39] sm:$0xff] }
  0x13   : > { %7063 = vmatpush3.bf16.msra.mxu0 %v8445_v3  ;;  %v8676_v16 = vpack.c.bf16 %v293_v12, %v292_v11  ;;  %v8678_v17 = vpack.c.bf16 %v295_v15, %v294_v14  ;;  %v296_v19 = vld [vmem:[%s8650_s29 + $0x49] sm:$0xff]  ;;  %v297_v20 = vld [vmem:[%s8650_s29 + $0x51] sm:$0xff]  ;;  %v298_v21 = vld [vmem:[%s8650_s29 + $0x61] sm:$0xff] }
  0x14   : > { %7072 = vmatprep.mubr.bf16.mxu0 %v322_v6  ;;  %7064 = vmatprep.subr.bf16.mxu0 %v8446_v7  ;;  %v299_v22 = vld [vmem:[%s8650_s29 + $0x69] sm:$0xff]  ;;  %v8692_v24 = vpack.c.bf16 %v297_v20, %v296_v19  ;;  %v300_v27 = vld [vmem:[%s8650_s29 + $0x79] sm:$0xff]  ;;  %v301_v28 = vld [vmem:[%s8650_s29 + $0x81] sm:$0xff] }
  0x15   : > { %v8694_v25 = vpack.c.bf16 %v299_v22, %v298_v21  ;;  %v302_v29 = vld [vmem:[%s8650_s29 + $0x91] sm:$0xff]  ;;  %v303_v30 = vld [vmem:[%s8650_s29 + $0x99] sm:$0xff]  ;;  %v8708_v32 = vpack.c.bf16 %v301_v28, %v300_v27  ;;  %v304_v35 = vld [vmem:[%s8650_s29 + $0xa9] sm:$0xff] }
  0x16   : > { %v8710_v33 = vpack.c.bf16 %v303_v30, %v302_v29  ;;  %v305_v36 = vld [vmem:[%s8650_s29 + $0xb1] sm:$0xff]  ;;  %v306_v37 = vld [vmem:[%s8650_s29 + $0xc1] sm:$0xff]  ;;  %v307_v38 = vld [vmem:[%s8650_s29 + $0xc9] sm:$0xff] }
  0x17   : > { %7065 = vmatpush3.bf16.msra.mxu0 %v8446_v7  ;;  %v8724_v40 = vpack.c.bf16 %v305_v36, %v304_v35  ;;  %v8729_v42 = vpack.c.bf16 %v307_v38, %v306_v37  ;;  %v308_v43 = vld [vmem:[%s8650_s29 + $0xd9] sm:$0xff]  ;;  %v309_v44 = vld [vmem:[%s8650_s29 + $0xe1] sm:$0xff]  ;;  %v310_v45 = vld [vmem:[%s8650_s29 + $0xf1] sm:$0xff] }
  0x18   : > { %7066 = vmatprep.subr.bf16.mxu0 %v8447_v8  ;;  %v311_v46 = vld [vmem:[%s8650_s29 + $0xf9] sm:$0xff]  ;;  %v8740_v48 = vpack.c.bf16 %v309_v44, %v308_v43  ;;  %v312_v50 = vld [vmem:[%s8650_s29 + $0x109] sm:$0xff]  ;;  %v313_v51 = vld [vmem:[%s8650_s29 + $0x111] sm:$0xff] }
  0x19   : > { %v8742_v49 = vpack.c.bf16 %v311_v46, %v310_v45  ;;  %v314_v52 = vld [vmem:[%s8650_s29 + $0x121] sm:$0xff]  ;;  %v315_v53 = vld [vmem:[%s8650_s29 + $0x129] sm:$0xff]  ;;  %v8750_v54 = vpack.c.bf16 %v313_v51, %v312_v50  ;;  %v316_v56 = vld [vmem:[%s8650_s29 + $0x139] sm:$0xff] }
  0x1a   : > { %v8752_v55 = vpack.c.bf16 %v315_v53, %v314_v52  ;;  %v317_v57 = vld [vmem:[%s8650_s29 + $0x141] sm:$0xff]  ;;  %v318_v58 = vld [vmem:[%s8650_s29 + $0x151] sm:$0xff]  ;;  %v319_v59 = vld [vmem:[%s8650_s29 + $0x159] sm:$0xff] }
  0x1b   : > { %7067 = vmatpush3.bf16.msra.mxu0 %v8447_v8  ;;  %v8760_v60 = vpack.c.bf16 %v317_v57, %v316_v56  ;;  %v8762_v61 = vpack.c.bf16 %v319_v59, %v318_v58  ;;  %v320_v62 = vld [vmem:[%s8650_s29 + $0x169] sm:$0xff]  ;;  %v321_v63 = vld [vmem:[%s8650_s29 + $0x171] sm:$0xff]  ;;  %v226_v0 = vld [vmem:[%s8650_s29] sm:$0xff] }
  0x1c   : > { %7068 = vmatprep.subr.bf16.mxu0 %v8448_v9  ;;  %v227_v1 = vld [vmem:[%s8650_s29 + $0x8] sm:$0xff]  ;;  %v8770_v2 = vpack.c.bf16 %v321_v63, %v320_v62  ;;  %v228_v4 = vld [vmem:[%s8650_s29 + $0x18] sm:$0xff]  ;;  %v229_v5 = vld [vmem:[%s8650_s29 + $0x20] sm:$0xff] }
  0x1d   : > { %v258_v3 = vpack.c.bf16 %v227_v1, %v226_v0  ;;  %v230_v6 = vld [vmem:[%s8650_s29 + $0x30] sm:$0xff]  ;;  %v231_v7 = vld [vmem:[%s8650_s29 + $0x38] sm:$0xff]  ;;  %v8777_v8 = vpack.c.bf16 %v229_v5, %v228_v4  ;;  %v232_v11 = vld [vmem:[%s8650_s29 + $0x48] sm:$0xff] }
  0x1e   : > { %v233_v12 = vld [vmem:[%s8650_s29 + $0x50] sm:$0xff]  ;;  %v235_v14 = vld [vmem:[%s8650_s29 + $0x68] sm:$0xff]  ;;  %v8461_v19 = vld [vmem:[%s9808_s1 + $0x98] sm:$0xff]  }
  0x1f   : > { %7069 = vmatpush3.bf16.msra.mxu0 %v8448_v9  ;;  %v8459_v9 = vld [vmem:[%s9808_s1 + $0x88] sm:$0xff]   ;;  %v8460_v15 = vld [vmem:[%s9808_s1 + $0x90] sm:$0xff]   ;;  %v236_v21 = vld [vmem:[%s8650_s29 + $0x78] sm:$0xff] }
  0x20   : > { %7070 = vmatprep.subr.bf16.mxu0 %v8449_v10  ;;  %v237_v22 = vld [vmem:[%s8650_s29 + $0x80] sm:$0xff]  ;;  %v8463_v29 = vld [vmem:[%s9808_s1 + $0xa8] sm:$0xff]   ;;  %v8464_v37 = vld [vmem:[%s9808_s1 + $0xb0] sm:$0xff]  }
  0x21   : > { %v8462_v27 = vld [vmem:[%s9808_s1 + $0xa0] sm:$0xff]   ;;  %v8809_v28 = vpack.c.bf16 %v237_v22, %v236_v21  ;;  %v243_v36 = vld [vmem:[%s8650_s29 + $0xc8] sm:$0xff]  ;;  %v244_v43 = vld [vmem:[%s8650_s29 + $0xd8] sm:$0xff] }
  0x22   : > { %v242_v35 = vld [vmem:[%s8650_s29 + $0xc0] sm:$0xff]  ;;  %v246_v45 = vld [vmem:[%s8650_s29 + $0xf0] sm:$0xff]  ;;  %v247_v46 = vld [vmem:[%s8650_s29 + $0xf8] sm:$0xff] }
  0x23   : > { %7071 = vmatpush3.bf16.msra.mxu0 %v8449_v10  ;;  %v8782_v10 = vpack.c.bf16 %v231_v7, %v230_v6  ;;  %v245_v44 = vld [vmem:[%s8650_s29 + $0xe0] sm:$0xff]  ;;  %v8843_v51 = vpack.c.bf16 %v247_v46, %v246_v45  ;;  %v248_v52 = vld [vmem:[%s8650_s29 + $0x108] sm:$0xff]  ;;  %v249_v53 = vld [vmem:[%s8650_s29 + $0x110] sm:$0xff] }
  0x24   : > { %7104 = vmatprep.subr.bf16.mxu0 %v8450_v13  ;;  %v8841_v50 = vpack.c.bf16 %v245_v44, %v244_v43  ;;  %v250_v56 = vld [vmem:[%s8650_s29 + $0x120] sm:$0xff]  ;;  %v251_v57 = vld [vmem:[%s8650_s29 + $0x128] sm:$0xff]  ;;  %v8851_v58 = vpack.c.bf16 %v249_v53, %v248_v52  ;;  %v252_v62 = vld [vmem:[%s8650_s29 + $0x138] sm:$0xff] }
  0x25   : > { %v8853_v59 = vpack.c.bf16 %v251_v57, %v250_v56  ;;  %v253_v63 = vld [vmem:[%s8650_s29 + $0x140] sm:$0xff]  ;;  %v254_v0 = vld [vmem:[%s8650_s29 + $0x150] sm:$0xff]  ;;  %v255_v1 = vld [vmem:[%s8650_s29 + $0x158] sm:$0xff] }
  0x26   : > { %7073 = vmatmul.mubr.bf16.vlgmr.msra.gmra.mrb[0].mxu0 %v8676_v16  ;;  %v8863_v4 = vpack.c.bf16 %v255_v1, %v254_v0  ;;  %v256_v5 = vld [vmem:[%s8650_s29 + $0x168] sm:$0xff]  ;;  %v257_v6 = vld [vmem:[%s8650_s29 + $0x170] sm:$0xff]  ;;  %v786_v45 = vld [vmem:[%s8650_s29 + $0x9a] sm:$0xff] }
  0x27   : > { %7105 = vmatpush3.bf16.msra.mxu0 %v8450_v13  ;;  %7076 = vmatprep.mubr.bf16.mxu0 %v8678_v17  ;;  %v234_v13 = vld [vmem:[%s8650_s29 + $0x60] sm:$0xff]  ;;  %v785_v44 = vld [vmem:[%s8650_s29 + $0x92] sm:$0xff]  ;;  %v8471_v53 = vld [vmem:[%s9808_s1 + $0xe8] sm:$0xff]  }
  0x28   : > { %7106 = vmatprep.subr.bf16.mxu0 %v8451_v18  ;;  %v8798_v20 = vpack.c.bf16 %v235_v14, %v234_v13  ;;  %v773_v7 = vld [vmem:[%s8650_s29 + $0x2] sm:$0xff]  ;;  %v775_v13 = vld [vmem:[%s8650_s29 + $0x1a] sm:$0xff]  ;;  %v8912_v52 = vpack.c.bf16 %v786_v45, %v785_v44  ;;  %v787_v56 = vld [vmem:[%s8650_s29 + $0xaa] sm:$0xff] }
  0x29   : > { %v776_v14 = vld [vmem:[%s8650_s29 + $0x22] sm:$0xff]  ;;  %v788_v57 = vld [vmem:[%s8650_s29 + $0xb2] sm:$0xff]  ;;  %v802_v44 = vld [vmem:[%s8650_s29 + $0x15a] sm:$0xff] }
  0x2a   : > { %v8878_v21 = vpack.c.bf16 %v776_v14, %v775_v13  ;;  %v784_v43 = vld [vmem:[%s8650_s29 + $0x82] sm:$0xff]  ;;  %v8472_v0 = vld [vmem:[%s9808_s1 + $0xf0] sm:$0xff]   ;;  %v8926_v1 = vpack.c.bf16 %v788_v57, %v787_v56  ;;  %v794_v13 = vld [vmem:[%s8650_s29 + $0xfa] sm:$0xff] }
  0x2b   : > { %7107 = vmatpush3.bf16.msra.mxu0 %v8451_v18  ;;  %v8793_v18 = vpack.c.bf16 %v233_v12, %v232_v11  ;;  %v8871_v11 = vpack.c.bf16 %v257_v6, %v256_v5  ;;  %v8470_v46 = vld [vmem:[%s9808_s1 + $0xe0] sm:$0xff]   ;;  %v8473_v6 = vld [vmem:[%s9808_s1 + $0xf8] sm:$0xff]  }
  0x2c   : > { %7108 = vmatprep.subr.bf16.mxu0 %v8452_v23  ;;  %v8474_v14 = vld [vmem:[%s9808_s1 + $0x100] sm:$0xff]   ;;  %v804_v56 = vld [vmem:[%s8650_s29 + $0x172] sm:$0xff] }
  0x2e   : > { %7077 = vmatmul.mubr.bf16.gmra.mrb[4].mxu0 %v8692_v24 }
  0x2f   : > { %7080 = vmatprep.mubr.bf16.mxu0 %v8694_v25  ;;  %7109 = vmatpush3.bf16.msra.mxu0 %v8452_v23  ;;  %v238_v23 = vld [vmem:[%s8650_s29 + $0x90] sm:$0xff] }
  0x30   : > { %7110 = vmatprep.subr.bf16.mxu0 %v8453_v26 }
  0x33   : > { %7111 = vmatpush3.bf16.msra.mxu0 %v8453_v26  ;;  %v239_v26 = vld [vmem:[%s8650_s29 + $0x98] sm:$0xff] }
  0x34   : > { %7112 = vmatprep.subr.bf16.mxu0 %v8454_v31  ;;  %v8814_v30 = vpack.c.bf16 %v239_v26, %v238_v23  ;;  %v8467_v23 = vld [vmem:[%s9808_s1 + $0xc8] sm:$0xff]  }
  0x35   : > { %v779_v26 = vld [vmem:[%s8650_s29 + $0x4a] sm:$0xff] }
  0x36   : > { %7081 = vmatmul.mubr.bf16.gmra.mrb[8].mxu0 %v8708_v32 }
  0x37   : > { %7084 = vmatprep.mubr.bf16.mxu0 %v8710_v33  ;;  %7113 = vmatpush3.bf16.msra.mxu0 %v8454_v31  ;;  %v240_v31 = vld [vmem:[%s8650_s29 + $0xa8] sm:$0xff] }
  0x38   : > { %7114 = vmatprep.subr.bf16.mxu0 %v8455_v34 }
  0x3b   : > { %7115 = vmatpush3.bf16.msra.mxu0 %v8455_v34  ;;  %v241_v34 = vld [vmem:[%s8650_s29 + $0xb0] sm:$0xff] }
  0x3c   : > { %7116 = vmatprep.subr.bf16.mxu0 %v8456_v39  ;;  %v8825_v38 = vpack.c.bf16 %v241_v34, %v240_v31  ;;  %v782_v31 = vld [vmem:[%s8650_s29 + $0x6a] sm:$0xff] }
  0x3d   : > { %v8468_v34 = vld [vmem:[%s9808_s1 + $0xd0] sm:$0xff]  }
  0x3e   : > { %7085 = vmatmul.mubr.bf16.gmra.mrb[12].mxu0 %v8724_v40 }
  0x3f   : > { %7088 = vmatprep.mubr.bf16.mxu0 %v8729_v42  ;;  %7117 = vmatpush3.bf16.msra.mxu0 %v8456_v39  ;;  %v8465_v39 = vld [vmem:[%s9808_s1 + $0xb8] sm:$0xff]  }
  0x40   : > { %7118 = vmatprep.subr.bf16.mxu0 %v8457_v41 }
  0x43   : > { %7119 = vmatpush3.bf16.msra.mxu0 %v8457_v41  ;;  %v8830_v41 = vpack.c.bf16 %v243_v36, %v242_v35 }
  0x44   : > { %7152 = vmatprep.subr.bf16.mxu0 %v8458_v47 }
  0x46   : > { %7089 = vmatmul.mubr.bf16.gmra.mrb[16].mxu0 %v8740_v48 }
  0x47   : > { %7092 = vmatprep.mubr.bf16.mxu0 %v8742_v49 }
  0x4e   : > { %7093 = vmatmul.mubr.bf16.gmra.mrb[20].mxu0 %v8750_v54 }
  0x4f   : > { %7096 = vmatprep.mubr.bf16.mxu0 %v8752_v55 }
  0x56   : > { %7097 = vmatmul.mubr.bf16.gmra.mrb[24].mxu0 %v8760_v60 }
  0x57   : > { %7100 = vmatprep.mubr.bf16.mxu0 %v8762_v61 }
  0x5e   : > { %7101 = vmatmul.mubr.bf16.gmra.mrb[28].mxu0 %v8770_v2 }
  0x5f   : > { %7120 = vmatprep.mubr.bf16.mxu0 %v258_v3  ;;  %v8861_v3 = vpack.c.bf16 %v253_v63, %v252_v62  ;;  %v789_v62 = vld [vmem:[%s8650_s29 + $0xc2] sm:$0xff]  ;;  %v790_v63 = vld [vmem:[%s8650_s29 + $0xca] sm:$0xff] }
  0x60   : > { %v8928_v5 = vpack.c.bf16 %v790_v63, %v789_v62  ;;  %v8475_v62 = vld [vmem:[%s9808_s1 + $0x108] sm:$0xff]   ;;  %v8476_v63 = vld [vmem:[%s9808_s1 + $0x110] sm:$0xff]  }
  0x66   : > { %7121 = vmatmul.mubr.bf16.vlgmr.msra.gmra.mrb[0].mxu0 %v8777_v8 }
  0x67   : > { %7153 = vmatpush3.bf16.msra.mxu0 %v8458_v47  ;;  %7124 = vmatprep.mubr.bf16.mxu0 %v8782_v10  ;;  %v8466_v47 = vld [vmem:[%s9808_s1 + $0xc0] sm:$0xff]  }
  0x68   : > { %7154 = vmatprep.subr.bf16.mxu0 %v8459_v9 }
  0x6b   : > { %7155 = vmatpush3.bf16.msra.mxu0 %v8459_v9  ;;  %v774_v9 = vld [vmem:[%s8650_s29 + $0xa] sm:$0xff] }
  0x6c   : > { %7156 = vmatprep.subr.bf16.mxu0 %v8460_v15  ;;  %v805_v12 = vpack.c.bf16 %v774_v9, %v773_v7  ;;  %v791_v7 = vld [vmem:[%s8650_s29 + $0xda] sm:$0xff]  ;;  %v792_v9 = vld [vmem:[%s8650_s29 + $0xe2] sm:$0xff] }
  0x6e   : > { %7125 = vmatmul.mubr.bf16.gmra.mrb[4].mxu0 %v8793_v18 }
  0x6f   : > { %7128 = vmatprep.mubr.bf16.mxu0 %v8798_v20  ;;  %7157 = vmatpush3.bf16.msra.mxu0 %v8460_v15  ;;  %v777_v15 = vld [vmem:[%s8650_s29 + $0x32] sm:$0xff] }
  0x70   : > { %7158 = vmatprep.subr.bf16.mxu0 %v8461_v19 }
  0x73   : > { %7159 = vmatpush3.bf16.msra.mxu0 %v8461_v19  ;;  %v778_v19 = vld [vmem:[%s8650_s29 + $0x3a] sm:$0xff] }
  0x74   : > { %7160 = vmatprep.subr.bf16.mxu0 %v8462_v27  ;;  %v8880_v22 = vpack.c.bf16 %v778_v19, %v777_v15  ;;  %v8942_v15 = vpack.c.bf16 %v792_v9, %v791_v7  ;;  %v8480_v7 = vld [vmem:[%s9808_s1 + $0x130] sm:$0xff]   ;;  %v8481_v9 = vld [vmem:[%s9808_s1 + $0x138] sm:$0xff]  }
  0x76   : > { %7129 = vmatmul.mubr.bf16.gmra.mrb[8].mxu0 %v8809_v28 }
  0x77   : > { %7132 = vmatprep.mubr.bf16.mxu0 %v8814_v30  ;;  %7161 = vmatpush3.bf16.msra.mxu0 %v8462_v27  ;;  %v780_v27 = vld [vmem:[%s8650_s29 + $0x52] sm:$0xff] }
  0x78   : > { %7162 = vmatprep.subr.bf16.mxu0 %v8463_v29  ;;  %v8894_v35 = vpack.c.bf16 %v780_v27, %v779_v26  ;;  %v796_v26 = vld [vmem:[%s8650_s29 + $0x112] sm:$0xff]  ;;  %v797_v27 = vld [vmem:[%s8650_s29 + $0x122] sm:$0xff] }
  0x7b   : > { %7163 = vmatpush3.bf16.msra.mxu0 %v8463_v29  ;;  %v781_v29 = vld [vmem:[%s8650_s29 + $0x62] sm:$0xff] }
  0x7c   : > { %7164 = vmatprep.subr.bf16.mxu0 %v8464_v37  ;;  %v8896_v36 = vpack.c.bf16 %v782_v31, %v781_v29  ;;  %v798_v29 = vld [vmem:[%s8650_s29 + $0x12a] sm:$0xff] }
  0x7e   : > { %7133 = vmatmul.mubr.bf16.gmra.mrb[12].mxu0 %v8825_v38 }
  0x7f   : > { %7136 = vmatprep.mubr.bf16.mxu0 %v8830_v41  ;;  %7165 = vmatpush3.bf16.msra.mxu0 %v8464_v37  ;;  %v8469_v37 = vld [vmem:[%s9808_s1 + $0xd8] sm:$0xff]  }
  0x80   : > { %7166 = vmatprep.subr.bf16.mxu0 %v8465_v39 }
  0x83   : > { %7167 = vmatpush3.bf16.msra.mxu0 %v8465_v39  ;;  %v783_v39 = vld [vmem:[%s8650_s29 + $0x7a] sm:$0xff] }
  0x84   : > { %7200 = vmatprep.subr.bf16.mxu0 %v8466_v47 }
  0x86   : > { %7137 = vmatmul.mubr.bf16.gmra.mrb[16].mxu0 %v8841_v50 }
  0x87   : > { %7140 = vmatprep.mubr.bf16.mxu0 %v8843_v51 }
  0x8e   : > { %7141 = vmatmul.mubr.bf16.gmra.mrb[20].mxu0 %v8851_v58 }
  0x8f   : > { %7144 = vmatprep.mubr.bf16.mxu0 %v8853_v59 }
  0x96   : > { %7145 = vmatmul.mubr.bf16.gmra.mrb[24].mxu0 %v8861_v3 }
  0x97   : > { %7148 = vmatprep.mubr.bf16.mxu0 %v8863_v4 }
  0x9e   : > { %7149 = vmatmul.mubr.bf16.gmra.mrb[28].mxu0 %v8871_v11 }
  0x9f   : > { %7168 = vmatprep.mubr.bf16.mxu0 %v805_v12  ;;  %v793_v12 = vld [vmem:[%s8650_s29 + $0xf2] sm:$0xff] }
  0xa0   : > { %v8944_v19 = vpack.c.bf16 %v794_v13, %v793_v12  ;;  %v8482_v12 = vld [vmem:[%s9808_s1 + $0x140] sm:$0xff]  }
  0xa1   : > { %v6081_v13 = vld [vmem:[%s8650_s29 + $0x180] sm:$0xff] }
  0xa6   : > { %7169 = vmatmul.mubr.bf16.vlgmr.msra.gmra.mrb[0].mxu0 %v8878_v21 }
  0xa7   : > { %7201 = vmatpush3.bf16.msra.mxu0 %v8466_v47  ;;  %7172 = vmatprep.mubr.bf16.mxu0 %v8880_v22  ;;  %v8910_v47 = vpack.c.bf16 %v784_v43, %v783_v39  ;;  %v800_v39 = vld [vmem:[%s8650_s29 + $0x142] sm:$0xff]  ;;  %v801_v43 = vld [vmem:[%s8650_s29 + $0x152] sm:$0xff] }
  0xa8   : > { %7202 = vmatprep.subr.bf16.mxu0 %v8467_v23 }
  0xab   : > { %7203 = vmatpush3.bf16.msra.mxu0 %v8467_v23  ;;  %v795_v23 = vld [vmem:[%s8650_s29 + $0x10a] sm:$0xff] }
  0xac   : > { %7204 = vmatprep.subr.bf16.mxu0 %v8468_v34  ;;  %v8952_v31 = vpack.c.bf16 %v796_v26, %v795_v23  ;;  %v8483_v26 = vld [vmem:[%s9808_s1 + $0x148] sm:$0xff]  }
  0xae   : > { %7173 = vmatmul.mubr.bf16.gmra.mrb[4].mxu0 %v8894_v35 }
  0xaf   : > { %7176 = vmatprep.mubr.bf16.mxu0 %v8896_v36  ;;  %7205 = vmatpush3.bf16.msra.mxu0 %v8468_v34  ;;  %v8954_v34 = vpack.c.bf16 %v798_v29, %v797_v27  ;;  %v8484_v27 = vld [vmem:[%s9808_s1 + $0x150] sm:$0xff]  }
  0xb0   : > { %7206 = vmatprep.subr.bf16.mxu0 %v8469_v37  ;;  %v6280_v29 = vld [vmem:[%s8650_s29 + $0x69] sm:$0xff] }
  0xb3   : > { %7207 = vmatpush3.bf16.msra.mxu0 %v8469_v37  ;;  %v799_v37 = vld [vmem:[%s8650_s29 + $0x13a] sm:$0xff] }
  0xb4   : > { %7208 = vmatprep.subr.bf16.mxu0 %v8470_v46  ;;  %v8962_v45 = vpack.c.bf16 %v800_v39, %v799_v37  ;;  %v8507_v39 = vld [vmem:[%s9808_s1 + $0x208] sm:$0xff]  }
  0xb6   : > { %7177 = vmatmul.mubr.bf16.gmra.mrb[8].mxu0 %v8910_v47 }
  0xb7   : > { %7180 = vmatprep.mubr.bf16.mxu0 %v8912_v52  ;;  %7209 = vmatpush3.bf16.msra.mxu0 %v8470_v46  ;;  %v8964_v46 = vpack.c.bf16 %v802_v44, %v801_v43  ;;  %v8517_v43 = vld [vmem:[%s9810_s3 + $0x58] sm:$0xff]  }
  0xb8   : > { %7210 = vmatprep.subr.bf16.mxu0 %v8471_v53  ;;  %v6281_v44 = vld [vmem:[%s8650_s29 + $0x79] sm:$0xff] }
  0xbb   : > { %7211 = vmatpush3.bf16.msra.mxu0 %v8471_v53  ;;  %v803_v53 = vld [vmem:[%s8650_s29 + $0x16a] sm:$0xff] }
  0xbc   : > { %7212 = vmatprep.subr.bf16.mxu0 %v8472_v0  ;;  %v8970_v57 = vpack.c.bf16 %v804_v56, %v803_v53  ;;  %v6284_v53 = vld [vmem:[%s8650_s29 + $0x99] sm:$0xff]  ;;  %v8508_v56 = vld [vmem:[%s9808_s1 + $0x210] sm:$0xff]  }
  0xbe   : > { %7181 = vmatmul.mubr.bf16.gmra.mrb[12].mxu0 %v8926_v1 }
  0xbf   : > { %7184 = vmatprep.mubr.bf16.mxu0 %v8928_v5  ;;  %7213 = vmatpush3.bf16.msra.mxu0 %v8472_v0  ;;  %v8478_v0 = vld [vmem:[%s9808_s1 + $0x120] sm:$0xff]  }
  0xc0   : > { %7214 = vmatprep.subr.bf16.mxu0 %v8473_v6 }
  0xc3   : > { %7215 = vmatpush3.bf16.msra.mxu0 %v8473_v6  ;;  %v8479_v6 = vld [vmem:[%s9808_s1 + $0x128] sm:$0xff]  }
  0xc4   : > { %7248 = vmatprep.subr.bf16.mxu0 %v8474_v14 }
  0xc6   : > { %7185 = vmatmul.mubr.bf16.gmra.mrb[16].mxu0 %v8942_v15 }
  0xc7   : > { %7188 = vmatprep.mubr.bf16.mxu0 %v8944_v19 }
  0xce   : > { %7189 = vmatmul.mubr.bf16.gmra.mrb[20].mxu0 %v8952_v31 }
  0xcf   : > { %7192 = vmatprep.mubr.bf16.mxu0 %v8954_v34 }
  0xd6   : > { %7193 = vmatmul.mubr.bf16.gmra.mrb[24].mxu0 %v8962_v45 }
  0xd7   : > { %7196 = vmatprep.mubr.bf16.mxu0 %v8964_v46 }
  0xde   : > { %7197 = vmatmul.mubr.bf16.gmra.mrb[28].mxu0 %v8970_v57 }
  0xdf   : > { %7216 = vmatprep.mubr.bf16.mxu0 %v8777_v8  ;;  %v8477_v8 = vld [vmem:[%s9808_s1 + $0x118] sm:$0xff]  }
  0xe6   : > { %7217 = vmatmul.mubr.bf16.vlgmr.msra.gmra.mrb[0].mxu0 %v8782_v10 }
  0xe7   : > { %7249 = vmatpush3.bf16.msra.mxu0 %v8474_v14  ;;  %7220 = vmatprep.mubr.bf16.mxu0 %v8793_v18  ;;  %v6082_v14 = vld [vmem:[%s8650_s29 + $0x188] sm:$0xff] }
  0xe8   : > { %7250 = vmatprep.subr.bf16.mxu0 %v8475_v62  ;;  %v9014_v23 = vpack.c.bf16 %v6082_v14, %v6081_v13  ;;  %v8511_v14 = vld [vmem:[%s9808_s1 + $0x228] sm:$0xff]  }
  0xeb   : > { %7251 = vmatpush3.bf16.msra.mxu0 %v8475_v62 }
  0xec   : > { %7252 = vmatprep.subr.bf16.mxu0 %v8476_v63 }
  0xee   : > { %7221 = vmatmul.mubr.bf16.gmra.mrb[4].mxu0 %v8798_v20 }
  0xef   : > { %7224 = vmatprep.mubr.bf16.mxu0 %v8809_v28  ;;  %7253 = vmatpush3.bf16.msra.mxu0 %v8476_v63  ;;  %v8509_v63 = vld [vmem:[%s9808_s1 + $0x218] sm:$0xff]  }
  0xf0   : > { %7254 = vmatprep.subr.bf16.mxu0 %v8477_v8 }
  0xf3   : > { %7255 = vmatpush3.bf16.msra.mxu0 %v8477_v8  ;;  %v6285_v8 = vld [vmem:[%s8650_s29 + $0xa9] sm:$0xff] }
  0xf4   : > { %7256 = vmatprep.subr.bf16.mxu0 %v8478_v0 }
  0xf6   : > { %7225 = vmatmul.mubr.bf16.gmra.mrb[8].mxu0 %v8814_v30 }
  0xf7   : > { %7228 = vmatprep.mubr.bf16.mxu0 %v8825_v38  ;;  %7257 = vmatpush3.bf16.msra.mxu0 %v8478_v0  ;;  %v6286_v0 = vld [vmem:[%s8650_s29 + $0xb1] sm:$0xff] }
  0xf8   : > { %7258 = vmatprep.subr.bf16.mxu0 %v8479_v6 }
  0xfb   : > { %7259 = vmatpush3.bf16.msra.mxu0 %v8479_v6  ;;  %v6287_v6 = vld [vmem:[%s8650_s29 + $0xc1] sm:$0xff] }
  0xfc   : > { %7260 = vmatprep.subr.bf16.mxu0 %v8480_v7 }
  0xfe   : > { %7229 = vmatmul.mubr.bf16.gmra.mrb[12].mxu0 %v8830_v41 }
  0xff   : > { %7232 = vmatprep.mubr.bf16.mxu0 %v8841_v50  ;;  %7261 = vmatpush3.bf16.msra.mxu0 %v8480_v7  ;;  %v6288_v7 = vld [vmem:[%s8650_s29 + $0xc9] sm:$0xff] }
 0x100   : > { %7262 = vmatprep.subr.bf16.mxu0 %v8481_v9  ;;  %v2343_v13 = vpack.c.bf16 %v6288_v7, %v6287_v6 }
 0x103   : > { %7263 = vmatpush3.bf16.msra.mxu0 %v8481_v9  ;;  %v8510_v9 = vld [vmem:[%s9808_s1 + $0x220] sm:$0xff]  }
 0x104   : > { %7296 = vmatprep.subr.bf16.mxu0 %v8482_v12 }
 0x106   : > { %7233 = vmatmul.mubr.bf16.gmra.mrb[16].mxu0 %v8843_v51 }
 0x107   : > { %7236 = vmatprep.mubr.bf16.mxu0 %v8851_v58 }
 0x10e   : > { %7237 = vmatmul.mubr.bf16.gmra.mrb[20].mxu0 %v8853_v59 }
 0x10f   : > { %7240 = vmatprep.mubr.bf16.mxu0 %v8861_v3 }
 0x116   : > { %7241 = vmatmul.mubr.bf16.gmra.mrb[24].mxu0 %v8863_v4 }
 0x117   : > { %7244 = vmatprep.mubr.bf16.mxu0 %v8871_v11 }
 0x11e   : > { %7245 = vmatmul.mubr.bf16.gmra.mrb[28].mxu0 %v9014_v23 }
 0x11f   : > { %7264 = vmatprep.mubr.bf16.mxu0 %v8676_v16  ;;  %v8485_v16 = vld [vmem:[%s9808_s1 + $0x158] sm:$0xff]  }
 0x126   : > { %7265 = vmatmul.mubr.bf16.vlgmr.msra.gmra.mrb[0].mxu0 %v8678_v17  ;;  %v8486_v17 = vld [vmem:[%s9808_s1 + $0x160] sm:$0xff]  }
 0x127   : > { %7297 = vmatpush3.bf16.msra.mxu0 %v8482_v12  ;;  %7268 = vmatprep.mubr.bf16.mxu0 %v8692_v24  ;;  %v8487_v24 = vld [vmem:[%s9808_s1 + $0x168] sm:$0xff]   ;;  %v2342_v12 = vpack.c.bf16 %v6286_v0, %v6285_v8 }
 0x128   : > { %7298 = vmatprep.subr.bf16.mxu0 %v8483_v26  ;;  %v6351_v8 = vld [vmem:[%s8650_s29 + $0x122] sm:$0xff]  ;;  %v6352_v0 = vld [vmem:[%s8650_s29 + $0x12a] sm:$0xff] }
 0x129   : > { %v2653_v7 = vpack.c.bf16 %v6352_v0, %v6351_v8 }
 0x12b   : > { %7299 = vmatpush3.bf16.msra.mxu0 %v8483_v26  ;;  %v6290_v26 = vld [vmem:[%s8650_s29 + $0xe1] sm:$0xff] }
 0x12c   : > { %7300 = vmatprep.subr.bf16.mxu0 %v8484_v27 }
 0x12e   : > { %7269 = vmatmul.mubr.bf16.gmra.mrb[4].mxu0 %v8694_v25  ;;  %v8488_v25 = vld [vmem:[%s9808_s1 + $0x170] sm:$0xff]  }
 0x12f   : > { %7272 = vmatprep.mubr.bf16.mxu0 %v8708_v32  ;;  %7301 = vmatpush3.bf16.msra.mxu0 %v8484_v27  ;;  %v8489_v32 = vld [vmem:[%s9808_s1 + $0x178] sm:$0xff]  }
 0x130   : > { %7302 = vmatprep.subr.bf16.mxu0 %v8485_v16  ;;  %v6291_v27 = vld [vmem:[%s8650_s29 + $0xf1] sm:$0xff] }
 0x133   : > { %7303 = vmatpush3.bf16.msra.mxu0 %v8485_v16  ;;  %v6292_v16 = vld [vmem:[%s8650_s29 + $0xf9] sm:$0xff] }
 0x134   : > { %7304 = vmatprep.subr.bf16.mxu0 %v8486_v17 }
 0x136   : > { %7273 = vmatmul.mubr.bf16.gmra.mrb[8].mxu0 %v8710_v33  ;;  %v8490_v33 = vld [vmem:[%s9808_s1 + $0x180] sm:$0xff]  }
 0x137   : > { %7276 = vmatprep.mubr.bf16.mxu0 %v8724_v40  ;;  %7305 = vmatpush3.bf16.msra.mxu0 %v8486_v17  ;;  %v6137_v40 = vld [vmem:[%s8650_s29 + $0x181] sm:$0xff]  ;;  %v8512_v17 = vld [vmem:[%s9808_s1 + $0x230] sm:$0xff]  }
 0x138   : > { %7306 = vmatprep.subr.bf16.mxu0 %v8487_v24 }
 0x13b   : > { %7307 = vmatpush3.bf16.msra.mxu0 %v8487_v24 }
 0x13c   : > { %7308 = vmatprep.subr.bf16.mxu0 %v8488_v25 }
 0x13e   : > { %7277 = vmatmul.mubr.bf16.gmra.mrb[12].mxu0 %v8729_v42  ;;  %v6138_v42 = vld [vmem:[%s8650_s29 + $0x189] sm:$0xff] }
 0x13f   : > { %7280 = vmatprep.mubr.bf16.mxu0 %v8740_v48  ;;  %7309 = vmatpush3.bf16.msra.mxu0 %v8488_v25  ;;  %v9058_v48 = vpack.c.bf16 %v6138_v42, %v6137_v40  ;;  %v2345_v25 = vpack.c.bf16 %v6292_v16, %v6291_v27  ;;  %v6294_v40 = vld [vmem:[%s8650_s29 + $0x111] sm:$0xff]  ;;  %v6295_v42 = vld [vmem:[%s8650_s29 + $0x121] sm:$0xff] }
 0x140   : > { %7310 = vmatprep.subr.bf16.mxu0 %v8489_v32  ;;  %v6357_v27 = vld [vmem:[%s8650_s29 + $0x16a] sm:$0xff]  ;;  %v6358_v16 = vld [vmem:[%s8650_s29 + $0x172] sm:$0xff] }
 0x143   : > { %7311 = vmatpush3.bf16.msra.mxu0 %v8489_v32  ;;  %v8513_v32 = vld [vmem:[%s9808_s1 + $0x238] sm:$0xff]  }
 0x144   : > { %7344 = vmatprep.subr.bf16.mxu0 %v8490_v33 }
 0x146   : > { %7281 = vmatmul.mubr.bf16.gmra.mrb[16].mxu0 %v8742_v49  ;;  %v8491_v49 = vld [vmem:[%s9808_s1 + $0x188] sm:$0xff]  }
 0x147   : > { %7284 = vmatprep.mubr.bf16.mxu0 %v8750_v54  ;;  %v8492_v54 = vld [vmem:[%s9808_s1 + $0x190] sm:$0xff]  }
 0x14e   : > { %7285 = vmatmul.mubr.bf16.gmra.mrb[20].mxu0 %v8752_v55  ;;  %v8493_v55 = vld [vmem:[%s9808_s1 + $0x198] sm:$0xff]  }
 0x14f   : > { %7288 = vmatprep.mubr.bf16.mxu0 %v8760_v60  ;;  %v8494_v60 = vld [vmem:[%s9808_s1 + $0x1a0] sm:$0xff]  }
 0x156   : > { %7289 = vmatmul.mubr.bf16.gmra.mrb[24].mxu0 %v8762_v61  ;;  %v8495_v61 = vld [vmem:[%s9808_s1 + $0x1a8] sm:$0xff]  }
 0x157   : > { %7292 = vmatprep.mubr.bf16.mxu0 %v8770_v2  ;;  %v8496_v2 = vld [vmem:[%s9808_s1 + $0x1b0] sm:$0xff]  }
 0x15e   : > { %7293 = vmatmul.mubr.bf16.gmra.mrb[28].mxu0 %v9058_v48 }
 0x15f   : > { %7312 = vmatprep.mubr.bf16.mxu0 %v8878_v21  ;;  %v8497_v21 = vld [vmem:[%s9808_s1 + $0x1b8] sm:$0xff]  }
 0x166   : > { %7313 = vmatmul.mubr.bf16.vlgmr.msra.gmra.mrb[0].mxu0 %v8880_v22  ;;  %v8498_v22 = vld [vmem:[%s9808_s1 + $0x1c0] sm:$0xff]  }
 0x167   : > { %7345 = vmatpush3.bf16.msra.mxu0 %v8490_v33  ;;  %7316 = vmatprep.mubr.bf16.mxu0 %v8894_v35  ;;  %v6193_v35 = vld [vmem:[%s8650_s29 + $0x182] sm:$0xff] }
 0x168   : > { %7346 = vmatprep.subr.bf16.mxu0 %v8491_v49  ;;  %v6293_v33 = vld [vmem:[%s8650_s29 + $0x109] sm:$0xff] }
 0x16b   : > { %7347 = vmatpush3.bf16.msra.mxu0 %v8491_v49  ;;  %v6296_v49 = vld [vmem:[%s8650_s29 + $0x129] sm:$0xff] }
 0x16c   : > { %7348 = vmatprep.subr.bf16.mxu0 %v8492_v54 }
 0x16e   : > { %7317 = vmatmul.mubr.bf16.gmra.mrb[4].mxu0 %v8896_v36  ;;  %v6194_v36 = vld [vmem:[%s8650_s29 + $0x18a] sm:$0xff] }
 0x16f   : > { %7320 = vmatprep.mubr.bf16.mxu0 %v8910_v47  ;;  %7349 = vmatpush3.bf16.msra.mxu0 %v8492_v54  ;;  %v9102_v47 = vpack.c.bf16 %v6194_v36, %v6193_v35  ;;  %v2346_v54 = vpack.c.bf16 %v6294_v40, %v6293_v33  ;;  %v6301_v36 = vld [vmem:[%s8650_s29 + $0x169] sm:$0xff]  ;;  %v8518_v33 = vld [vmem:[%s9810_s3 + $0x60] sm:$0xff]  }
 0x170   : > { %7350 = vmatprep.subr.bf16.mxu0 %v8493_v55  ;;  %v8519_v40 = vld [vmem:[%s9810_s3 + $0x68] sm:$0xff]  }
 0x173   : > { %7351 = vmatpush3.bf16.msra.mxu0 %v8493_v55  ;;  %v2347_v55 = vpack.c.bf16 %v6296_v49, %v6295_v42  ;;  %v8595_v42 = vmov 0.0   ;;  %v8521_v49 = vld [vmem:[%s9810_s3 + $0x78] sm:$0xff]  }
 0x174   : > { %7352 = vmatprep.subr.bf16.mxu0 %v8494_v60  ;;  %2994 = vst [vmem:[#allocation2 + $0x30] sm:$0xff] %v8595_v42  ;;  %2995 = vst [vmem:[#allocation2 + $0x38] sm:$0xff] %v8595_v42 }
 0x175   : > { %2988 = vst [vmem:[#allocation2] sm:$0xff] %v8595_v42  ;;  %2989 = vst [vmem:[#allocation2 + $0x8] sm:$0xff] %v8595_v42 }
 0x176   : > { %7321 = vmatmul.mubr.bf16.gmra.mrb[8].mxu0 %v8912_v52  ;;  %v8499_v52 = vld [vmem:[%s9808_s1 + $0x1c8] sm:$0xff]   ;;  %2990 = vst [vmem:[#allocation2 + $0x10] sm:$0x3] %v8595_v42  ;;  %2991 = vst [vmem:[#allocation2 + $0x18] sm:$0xff] %v8595_v42 }
 0x177   : > { %7324 = vmatprep.mubr.bf16.mxu0 %v8926_v1  ;;  %7353 = vmatpush3.bf16.msra.mxu0 %v8494_v60  ;;  %v8500_v1 = vld [vmem:[%s9808_s1 + $0x1d0] sm:$0xff]   ;;  %v6297_v60 = vld [vmem:[%s8650_s29 + $0x139] sm:$0xff]  ;;  %2992 = vst [vmem:[#allocation2 + $0x20] sm:$0xff] %v8595_v42  ;;  %2993 = vst [vmem:[#allocation2 + $0x28] sm:$0x3] %v8595_v42 }
 0x178   : > { %7354 = vmatprep.subr.bf16.mxu0 %v8495_v61  ;;  %2996 = vst [vmem:[#allocation2 + $0x40] sm:$0x3] %v8595_v42  ;;  %2997 = vst [vmem:[#allocation2 + $0x48] sm:$0xff] %v8595_v42 }
 0x179   : > { %2998 = vst [vmem:[#allocation2 + $0x50] sm:$0xff] %v8595_v42  ;;  %2999 = vst [vmem:[#allocation2 + $0x58] sm:$0x3] %v8595_v42 }
 0x17a   : > { %3000 = vst [vmem:[#allocation2 + $0x60] sm:$0xff] %v8595_v42  ;;  %3001 = vst [vmem:[#allocation2 + $0x68] sm:$0xff] %v8595_v42 }
 0x17b   : > { %7355 = vmatpush3.bf16.msra.mxu0 %v8495_v61  ;;  %v6298_v61 = vld [vmem:[%s8650_s29 + $0x141] sm:$0xff]  ;;  %3002 = vst [vmem:[#allocation2 + $0x70] sm:$0x3] %v8595_v42  ;;  %3003 = vst [vmem:[#allocation2 + $0x78] sm:$0xff] %v8595_v42 }
 0x17c   : > { %7356 = vmatprep.subr.bf16.mxu0 %v8496_v2  ;;  %3004 = vst [vmem:[#allocation2 + $0x80] sm:$0xff] %v8595_v42  ;;  %3005 = vst [vmem:[#allocation2 + $0x88] sm:$0x3] %v8595_v42 }
 0x17d   : > { %3006 = vst [vmem:[#allocation2 + $0x90] sm:$0xff] %v8595_v42  ;;  %3007 = vst [vmem:[#allocation2 + $0x98] sm:$0xff] %v8595_v42 }
 0x17e   : > { %7325 = vmatmul.mubr.bf16.gmra.mrb[12].mxu0 %v8928_v5  ;;  %v6276_v5 = vld [vmem:[%s8650_s29 + $0x39] sm:$0xff]  ;;  %3008 = vst [vmem:[#allocation2 + $0xa0] sm:$0x3] %v8595_v42  ;;  %3009 = vst [vmem:[#allocation2 + $0xa8] sm:$0xff] %v8595_v42 }
 0x17f   : > { %7328 = vmatprep.mubr.bf16.mxu0 %v8942_v15  ;;  %7357 = vmatpush3.bf16.msra.mxu0 %v8496_v2  ;;  %v6299_v2 = vld [vmem:[%s8650_s29 + $0x151] sm:$0xff]  ;;  %3010 = vst [vmem:[#allocation2 + $0xb0] sm:$0xff] %v8595_v42  ;;  %3011 = vst [vmem:[#allocation2 + $0xb8] sm:$0x3] %v8595_v42 }
 0x180   : > { %7358 = vmatprep.subr.bf16.mxu0 %v8497_v21  ;;  %3012 = vst [vmem:[#allocation2 + $0xc0] sm:$0xff] %v8595_v42  ;;  %3013 = vst [vmem:[#allocation2 + $0xc8] sm:$0xff] %v8595_v42 }
 0x181   : > { %3014 = vst [vmem:[#allocation2 + $0xd0] sm:$0x3] %v8595_v42  ;;  %3015 = vst [vmem:[#allocation2 + $0xd8] sm:$0xff] %v8595_v42 }
 0x182   : > { %3016 = vst [vmem:[#allocation2 + $0xe0] sm:$0xff] %v8595_v42  ;;  %3017 = vst [vmem:[#allocation2 + $0xe8] sm:$0x3] %v8595_v42 }
 0x183   : > { %7359 = vmatpush3.bf16.msra.mxu0 %v8497_v21  ;;  %v6300_v21 = vld [vmem:[%s8650_s29 + $0x159] sm:$0xff]  ;;  %3018 = vst [vmem:[#allocation2 + $0xf0] sm:$0xff] %v8595_v42  ;;  %3019 = vst [vmem:[#allocation2 + $0xf8] sm:$0xff] %v8595_v42 }
 0x184   : > { %7392 = vmatprep.subr.bf16.mxu0 %v8498_v22  ;;  %v2349_v35 = vpack.c.bf16 %v6300_v21, %v6299_v2  ;;  %3020 = vst [vmem:[#allocation2 + $0x100] sm:$0x3] %v8595_v42  ;;  %3021 = vst [vmem:[#allocation2 + $0x108] sm:$0xff] %v8595_v42  ;;  %v9259_v2 = vld [vmem:[%s9809_s2] ss:$0 sm:$0xff] }
 0x185   : > { %3022 = vst [vmem:[#allocation2 + $0x110] sm:$0xff] %v8595_v42  ;;  %3023 = vst [vmem:[#allocation2 + $0x118] sm:$0x3] %v8595_v42 }
 0x186   : > { %7329 = vmatmul.mubr.bf16.gmra.mrb[16].mxu0 %v8944_v19  ;;  %v6279_v19 = vld [vmem:[%s8650_s29 + $0x61] sm:$0xff]  ;;  %3024 = vst [vmem:[#allocation2 + $0x120] sm:$0xff] %v8595_v42  ;;  %3025 = vst [vmem:[#allocation2 + $0x128] sm:$0xff] %v8595_v42 }
 0x187   : > { %7332 = vmatprep.mubr.bf16.mxu0 %v8952_v31  ;;  %v2339_v37 = vpack.c.bf16 %v6280_v29, %v6279_v19  ;;  %v6341_v29 = vld [vmem:[%s8650_s29 + $0xaa] sm:$0xff]  ;;  %3026 = vst [vmem:[#allocation2 + $0x130] sm:$0x3] %v8595_v42  ;;  %3027 = vst [vmem:[#allocation2 + $0x138] sm:$0xff] %v8595_v42 }
 0x188   : > { %3028 = vst [vmem:[#allocation2 + $0x140] sm:$0xff] %v8595_v42  ;;  %3029 = vst [vmem:[#allocation2 + $0x148] sm:$0x3] %v8595_v42 }
 0x189   : > { %3030 = vst [vmem:[#allocation2 + $0x150] sm:$0xff] %v8595_v42  ;;  %3031 = vst [vmem:[#allocation2 + $0x158] sm:$0xff] %v8595_v42 }
 0x18a   : > { %3032 = vst [vmem:[#allocation2 + $0x160] sm:$0x3] %v8595_v42  ;;  %3033 = vst [vmem:[#allocation2 + $0x168] sm:$0xff] %v8595_v42 }
 0x18b   : > { %3034 = vst [vmem:[#allocation2 + $0x170] sm:$0xff] %v8595_v42  ;;  %3035 = vst [vmem:[#allocation2 + $0x178] sm:$0x3] %v8595_v42 }
 0x18c   : > { %3036 = vst [vmem:[#allocation2 + $0x180] sm:$0xff] %v8595_v42  ;;  %3037 = vst [vmem:[#allocation2 + $0x188] sm:$0xff] %v8595_v42 }
 0x18d   : > { %3038 = vst [vmem:[#allocation2 + $0x190] sm:$0x3] %v8595_v42  ;;  %3039 = vst [vmem:[#allocation2 + $0x198] sm:$0xff] %v8595_v42 }
 0x18e   : > { %7333 = vmatmul.mubr.bf16.gmra.mrb[20].mxu0 %v8954_v34  ;;  %v8516_v34 = vld [vmem:[%s9810_s3 + $0x50] sm:$0xff]   ;;  %3040 = vst [vmem:[#allocation2 + $0x1a0] sm:$0xff] %v8595_v42  ;;  %3041 = vst [vmem:[#allocation2 + $0x1a8] sm:$0x3] %v8595_v42 }
 0x18f   : > { %7336 = vmatprep.mubr.bf16.mxu0 %v8962_v45  ;;  %v6282_v45 = vld [vmem:[%s8650_s29 + $0x81] sm:$0xff] }
 0x196   : > { %7337 = vmatmul.mubr.bf16.gmra.mrb[24].mxu0 %v8964_v46  ;;  %v6283_v46 = vld [vmem:[%s8650_s29 + $0x91] sm:$0xff] }
 0x197   : > { %7340 = vmatprep.mubr.bf16.mxu0 %v8970_v57  ;;  %v2340_v57 = vpack.c.bf16 %v6282_v45, %v6281_v44  ;;  %v2341_v62 = vpack.c.bf16 %v6284_v53, %v6283_v46  ;;  %v6345_v44 = vld [vmem:[%s8650_s29 + $0xda] sm:$0xff]  ;;  %v6346_v45 = vld [vmem:[%s8650_s29 + $0xe2] sm:$0xff]  ;;  %v6347_v46 = vld [vmem:[%s8650_s29 + $0xf2] sm:$0xff] }
 0x198   : > { %v6348_v53 = vld [vmem:[%s8650_s29 + $0xfa] sm:$0xff] }
 0x19e   : > { %7341 = vmatmul.mubr.bf16.gmra.mrb[28].mxu0 %v9102_v47 }
 0x19f   : > { %7360 = vmatprep.mubr.bf16.mxu0 %v8782_v10  ;;  %v8501_v10 = vld [vmem:[%s9808_s1 + $0x1d8] sm:$0xff]  }
 0x1a6   : > { %7361 = vmatmul.mubr.bf16.vlgmr.msra.gmra.mrb[0].mxu0 %v8793_v18  ;;  %v8502_v18 = vld [vmem:[%s9808_s1 + $0x1e0] sm:$0xff]  }
 0x1a7   : > { %7393 = vmatpush3.bf16.msra.mxu0 %v8498_v22  ;;  %7364 = vmatprep.mubr.bf16.mxu0 %v8798_v20  ;;  %v8503_v20 = vld [vmem:[%s9808_s1 + $0x1e8] sm:$0xff]   ;;  %v2348_v22 = vpack.c.bf16 %v6298_v61, %v6297_v60  ;;  %v8522_v61 = vld [vmem:[%s9810_s3] sm:$0xff]  }
 0x1a8   : > { %7394 = vmatprep.subr.bf16.mxu0 %v8499_v52 }
 0x1ab   : > { %7395 = vmatpush3.bf16.msra.mxu0 %v8499_v52  ;;  %v6302_v52 = vld [vmem:[%s8650_s29 + $0x171] sm:$0xff] }
 0x1ac   : > { %7396 = vmatprep.subr.bf16.mxu0 %v8500_v1 }
 0x1ae   : > { %7365 = vmatmul.mubr.bf16.gmra.mrb[4].mxu0 %v8809_v28  ;;  %v8504_v28 = vld [vmem:[%s9808_s1 + $0x1f0] sm:$0xff]  }
 0x1af   : > { %7368 = vmatprep.mubr.bf16.mxu0 %v8814_v30  ;;  %7397 = vmatpush3.bf16.msra.mxu0 %v8500_v1  ;;  %v8505_v30 = vld [vmem:[%s9808_s1 + $0x1f8] sm:$0xff]   ;;  %v2350_v1 = vpack.c.bf16 %v6302_v52, %v6301_v36 }
 0x1b0   : > { %7398 = vmatprep.subr.bf16.mxu0 %v8501_v10 }
 0x1b3   : > { %7399 = vmatpush3.bf16.msra.mxu0 %v8501_v10  ;;  %v6305_v10 = vld [vmem:[%s8650_s29 + $0x199] sm:$0xff] }
 0x1b4   : > { %7400 = vmatprep.subr.bf16.mxu0 %v8502_v18 }
 0x1b6   : > { %7369 = vmatmul.mubr.bf16.gmra.mrb[8].mxu0 %v8825_v38  ;;  %v8506_v38 = vld [vmem:[%s9808_s1 + $0x200] sm:$0xff]  }
 0x1b7   : > { %7372 = vmatprep.mubr.bf16.mxu0 %v8830_v41  ;;  %7401 = vmatpush3.bf16.msra.mxu0 %v8502_v18  ;;  %v6249_v41 = vld [vmem:[%s8650_s29 + $0x198] sm:$0xff]  ;;  %v6306_v18 = vld [vmem:[%s8650_s29 + $0x1a1] sm:$0xff] }
 0x1b8   : > { %7402 = vmatprep.subr.bf16.mxu0 %v8503_v20 }
 0x1bb   : > { %7403 = vmatpush3.bf16.msra.mxu0 %v8503_v20  ;;  %v6331_v20 = vld [vmem:[%s8650_s29 + $0x32] sm:$0xff] }
 0x1bc   : > { %7404 = vmatprep.subr.bf16.mxu0 %v8504_v28 }
 0x1be   : > { %7373 = vmatmul.mubr.bf16.gmra.mrb[12].mxu0 %v8841_v50  ;;  %v6250_v50 = vld [vmem:[%s8650_s29 + $0x1a0] sm:$0xff] }
 0x1bf   : > { %7376 = vmatprep.mubr.bf16.mxu0 %v8843_v51  ;;  %7405 = vmatpush3.bf16.msra.mxu0 %v8504_v28  ;;  %v6275_v51 = vld [vmem:[%s8650_s29 + $0x31] sm:$0xff]  ;;  %v2046_v15 = vpack.c.bf16 %v6250_v50, %v6249_v41  ;;  %v6332_v28 = vld [vmem:[%s8650_s29 + $0x3a] sm:$0xff] }
 0x1c0   : > { %7406 = vmatprep.subr.bf16.mxu0 %v8505_v30  ;;  %v6333_v41 = vld [vmem:[%s8650_s29 + $0x4a] sm:$0xff]  ;;  %v6334_v50 = vld [vmem:[%s8650_s29 + $0x52] sm:$0xff] }
 0x1c3   : > { %7407 = vmatpush3.bf16.msra.mxu0 %v8505_v30  ;;  %v2352_v30 = vpack.c.bf16 %v6306_v18, %v6305_v10 }
 0x1c4   : > { %7440 = vmatprep.subr.bf16.mxu0 %v8506_v38 }
 0x1c6   : > { %7377 = vmatmul.mubr.bf16.gmra.mrb[16].mxu0 %v8851_v58  ;;  %v2337_v58 = vpack.c.bf16 %v6276_v5, %v6275_v51  ;;  %v6335_v51 = vld [vmem:[%s8650_s29 + $0x62] sm:$0xff]  ;;  %v6336_v5 = vld [vmem:[%s8650_s29 + $0x6a] sm:$0xff] }
 0x1c7   : > { %7380 = vmatprep.mubr.bf16.mxu0 %v8853_v59  ;;  %v8514_v59 = vld [vmem:[%s9810_s3 + $0x40] sm:$0xff]  }
 0x1c8   : > { %7488 = vmatprep.subr.bf16.mxu1 %v8514_v59 }
 0x1c9   : > { %7489 = vmatpush3.bf16.msra.mxu1 %v8514_v59  ;;  %v6338_v59 = vld [vmem:[%s8650_s29 + $0x82] sm:$0xff] }
 0x1ce   : > { %7381 = vmatmul.mubr.bf16.gmra.mrb[20].mxu0 %v8861_v3  ;;  %v8515_v3 = vld [vmem:[%s9810_s3 + $0x48] sm:$0xff]  }
 0x1cf   : > { %7384 = vmatprep.mubr.bf16.mxu0 %v8863_v4  ;;  %v6277_v4 = vld [vmem:[%s8650_s29 + $0x49] sm:$0xff]  ;;  %7490 = vmatprep.subr.bf16.mxu1 %v8515_v3 }
 0x1d0   : > { %7491 = vmatpush3.bf16.msra.mxu1 %v8515_v3  ;;  %v6339_v3 = vld [vmem:[%s8650_s29 + $0x92] sm:$0xff] }
 0x1d1   : > { %7492 = vmatprep.subr.bf16.mxu1 %v8516_v34 }
 0x1d4   : > { %7493 = vmatpush3.bf16.msra.mxu1 %v8516_v34  ;;  %v6343_v34 = vld [vmem:[%s8650_s29 + $0xc2] sm:$0xff] }
 0x1d5   : > { %7494 = vmatprep.subr.bf16.mxu1 %v8517_v43 }
 0x1d6   : > { %7385 = vmatmul.mubr.bf16.gmra.mrb[24].mxu0 %v8871_v11  ;;  %v6278_v11 = vld [vmem:[%s8650_s29 + $0x51] sm:$0xff] }
 0x1d7   : > { %7388 = vmatprep.mubr.bf16.mxu0 %v9014_v23  ;;  %v2338_v31 = vpack.c.bf16 %v6278_v11, %v6277_v4  ;;  %v6289_v23 = vld [vmem:[%s8650_s29 + $0xd9] sm:$0xff] }
 0x1d8   : > { %7495 = vmatpush3.bf16.msra.mxu1 %v8517_v43  ;;  %v2344_v24 = vpack.c.bf16 %v6290_v26, %v6289_v23  ;;  %v6340_v4 = vld [vmem:[%s8650_s29 + $0x9a] sm:$0xff] }
 0x1d9   : > { %v2647_v19 = vpack.c.bf16 %v6340_v4, %v6339_v3  ;;  %7496 = vmatprep.subr.bf16.mxu1 %v8518_v33 }
 0x1dc   : > { %7497 = vmatpush3.bf16.msra.mxu1 %v8518_v33 }
 0x1dd   : > { %7498 = vmatprep.subr.bf16.mxu1 %v8519_v40 }
 0x1de   : > { %7389 = vmatmul.mubr.bf16.gmra.mrb[28].mxu0 %v2046_v15  ;;  %v2645_v15 = vpack.c.bf16 %v6336_v5, %v6335_v51  ;;  %v8523_v5 = vld [vmem:[%s9810_s3 + $0x8] sm:$0xff]  }
 0x1df   : > { %7408 = vmatprep.mubr.bf16.mxu0 %v2337_v58  ;;  %v6337_v58 = vld [vmem:[%s8650_s29 + $0x7a] sm:$0xff] }
 0x1e0   : > { %v2646_v11 = vpack.c.bf16 %v6338_v59, %v6337_v58  ;;  %7499 = vmatpush3.bf16.msra.mxu1 %v8519_v40 }
 0x1e6   : > { %7409 = vmatmul.mubr.bf16.vlgmr.msra.gmra.mrb[0].mxu0 %v2338_v31  ;;  %v6342_v31 = vld [vmem:[%s8650_s29 + $0xb2] sm:$0xff] }
 0x1e7   : > { %7441 = vmatpush3.bf16.msra.mxu0 %v8506_v38  ;;  %7412 = vmatprep.mubr.bf16.mxu0 %v2339_v37  ;;  %v2643_v38 = vpack.c.bf16 %v6332_v28, %v6331_v20  ;;  %v6344_v37 = vld [vmem:[%s8650_s29 + $0xca] sm:$0xff] }
 0x1e8   : > { %7442 = vmatprep.subr.bf16.mxu0 %v8507_v39  ;;  %v2649_v43 = vpack.c.bf16 %v6344_v37, %v6343_v34 }
 0x1eb   : > { %7443 = vmatpush3.bf16.msra.mxu0 %v8507_v39  ;;  %v2648_v39 = vpack.c.bf16 %v6342_v31, %v6341_v29  ;;  %v8524_v31 = vld [vmem:[%s9810_s3 + $0x10] sm:$0xff]  }
 0x1ec   : > { %7444 = vmatprep.subr.bf16.mxu0 %v8508_v56 }
 0x1ee   : > { %7413 = vmatmul.mubr.bf16.gmra.mrb[4].mxu0 %v2340_v57  ;;  %v2651_v57 = vpack.c.bf16 %v6348_v53, %v6347_v46 }
 0x1ef   : > { %7416 = vmatprep.mubr.bf16.mxu0 %v2341_v62  ;;  %7445 = vmatpush3.bf16.msra.mxu0 %v8508_v56  ;;  %v2650_v56 = vpack.c.bf16 %v6346_v45, %v6345_v44  ;;  %v6349_v62 = vld [vmem:[%s8650_s29 + $0x10a] sm:$0xff]  ;;  %v8525_v45 = vld [vmem:[%s9810_s3 + $0x18] sm:$0xff]  }
 0x1f0   : > { %7446 = vmatprep.subr.bf16.mxu0 %v8509_v63 }
 0x1f3   : > { %7447 = vmatpush3.bf16.msra.mxu0 %v8509_v63  ;;  %v6350_v63 = vld [vmem:[%s8650_s29 + $0x112] sm:$0xff] }
 0x1f4   : > { %7448 = vmatprep.subr.bf16.mxu0 %v8510_v9  ;;  %v2652_v6 = vpack.c.bf16 %v6350_v63, %v6349_v62 }
 0x1f6   : > { %7417 = vmatmul.mubr.bf16.gmra.mrb[8].mxu0 %v2342_v12  ;;  %v6354_v12 = vld [vmem:[%s8650_s29 + $0x142] sm:$0xff] }
 0x1f7   : > { %7420 = vmatprep.mubr.bf16.mxu0 %v2343_v13  ;;  %7449 = vmatpush3.bf16.msra.mxu0 %v8510_v9  ;;  %v6353_v9 = vld [vmem:[%s8650_s29 + $0x13a] sm:$0xff]  ;;  %v6355_v13 = vld [vmem:[%s8650_s29 + $0x152] sm:$0xff] }
 0x1f8   : > { %7450 = vmatprep.subr.bf16.mxu0 %v8511_v14  ;;  %v2654_v23 = vpack.c.bf16 %v6354_v12, %v6353_v9 }
 0x1fb   : > { %7451 = vmatpush3.bf16.msra.mxu0 %v8511_v14  ;;  %v6356_v14 = vld [vmem:[%s8650_s29 + $0x15a] sm:$0xff] }
 0x1fc   : > { %7452 = vmatprep.subr.bf16.mxu0 %v8512_v17  ;;  %v2655_v26 = vpack.c.bf16 %v6356_v14, %v6355_v13 }
 0x1fe   : > { %7421 = vmatmul.mubr.bf16.gmra.mrb[12].mxu0 %v2344_v24  ;;  %v6361_v24 = vld [vmem:[%s8650_s29 + $0x19a] sm:$0xff] }
 0x1ff   : > { %7424 = vmatprep.mubr.bf16.mxu0 %v2345_v25  ;;  %7453 = vmatpush3.bf16.msra.mxu0 %v8512_v17  ;;  %v2656_v17 = vpack.c.bf16 %v6358_v16, %v6357_v27  ;;  %v6362_v25 = vld [vmem:[%s8650_s29 + $0x1a2] sm:$0xff] }
 0x200   : > { %7454 = vmatprep.subr.bf16.mxu0 %v8513_v32 }
 0x203   : > { %7455 = vmatpush3.bf16.msra.mxu0 %v8513_v32  ;;  %v2658_v32 = vpack.c.bf16 %v6362_v25, %v6361_v24 }
 0x206   : > { %7425 = vmatmul.mubr.bf16.gmra.mrb[16].mxu0 %v2346_v54  ;;  %v3171_v54 = vld [vmem:[#allocation2 + $0x1] sm:$0xff] }
 0x207   : > { %7428 = vmatprep.mubr.bf16.mxu0 %v2347_v55  ;;  %v3172_v55 = vld [vmem:[#allocation2 + $0x9] sm:$0xff] }
 0x208   : > { %v3203_v60 = vpack.c.bf16 %v3172_v55, %v3171_v54 }
 0x20a   : > { %7504 = vmatprep.mubr.bf16.mxu1 %v3203_v60 }
 0x20e   : > { %7429 = vmatmul.mubr.bf16.gmra.mrb[20].mxu0 %v2348_v22 }
 0x20f   : > { %7432 = vmatprep.mubr.bf16.mxu0 %v2349_v35 }
 0x216   : > { %7433 = vmatmul.mubr.bf16.gmra.mrb[24].mxu0 %v2350_v1 }
 0x217   : > { %7436 = vmatprep.mubr.bf16.mxu0 %v9058_v48  ;;  %v2644_v48 = vpack.c.bf16 %v6334_v50, %v6333_v41 }
 0x21e   : > { %7437 = vmatmul.mubr.bf16.gmra.mrb[28].mxu0 %v2352_v30 }
 0x21f   : > { %7456 = vmatprep.mubr.bf16.mxu0 %v2643_v38 }
 0x226   : > { %7457 = vmatmul.mubr.bf16.vlgmr.msra.gmra.mrb[0].mxu0 %v2644_v48 }
 0x227   : > { %7460 = vmatprep.mubr.bf16.mxu0 %v2645_v15 }
 0x22e   : > { %7461 = vmatmul.mubr.bf16.gmra.mrb[4].mxu0 %v2646_v11 }
 0x22f   : > { %7464 = vmatprep.mubr.bf16.mxu0 %v2647_v19 }
 0x236   : > { %7465 = vmatmul.mubr.bf16.gmra.mrb[8].mxu0 %v2648_v39 }
 0x237   : > { %7468 = vmatprep.mubr.bf16.mxu0 %v2649_v43 }
 0x23e   : > { %7469 = vmatmul.mubr.bf16.gmra.mrb[12].mxu0 %v2650_v56 }
 0x23f   : > { %7472 = vmatprep.mubr.bf16.mxu0 %v2651_v57 }
 0x246   : > { %7473 = vmatmul.mubr.bf16.gmra.mrb[16].mxu0 %v2652_v6 }
 0x247   : > { %7476 = vmatprep.mubr.bf16.mxu0 %v2653_v7  ;;  %v8526_v7 = vld [vmem:[%s9810_s3 + $0x20] sm:$0xff]  }
 0x24e   : > { %7477 = vmatmul.mubr.bf16.gmra.mrb[20].mxu0 %v2654_v23 }
 0x24f   : > { %7480 = vmatprep.mubr.bf16.mxu0 %v2655_v26  ;;  %v8527_v26 = vld [vmem:[%s9810_s3 + $0x28] sm:$0xff]  }
 0x256   : > { %7481 = vmatmul.mubr.bf16.gmra.mrb[24].mxu0 %v2656_v17 }
 0x257   : > { %7484 = vmatprep.mubr.bf16.mxu0 %v9102_v47  ;;  %v8520_v47 = vld [vmem:[%s9810_s3 + $0x70] sm:$0xff]  }
 0x258   : > { %7500 = vmatprep.subr.bf16.mxu1 %v8520_v47 }
 0x259   : > { %7501 = vmatpush3.bf16.msra.mxu1 %v8520_v47  ;;  %v8528_v47 = vld [vmem:[%s9810_s3 + $0x30] sm:$0xff]  }
 0x25a   : > { %7502 = vmatprep.subr.bf16.mxu1 %v8521_v49 }
 0x25d   : > { %7503 = vmatpush3.bf16.msra.mxu1 %v8521_v49 }
 0x25e   : > { %7485 = vmatmul.mubr.bf16.gmra.mrb[28].mxu0 %v2658_v32  ;;  %7536 = vmatprep.subr.bf16.mxu1 %v8522_v61 }
 0x2f9   : > { %v7458_v21 = vpop.f32.mrb[0].mxu0 }
 0x2fa   : > { %v2926_v22 = vadd.f32 %v7458_v21, %v9259_v2  ;;  %v2758_v35 = vpop.f32.mrb[1].mxu0  ;;  %v8529_v21 = vld [vmem:[%s9810_s3 + $0x38] sm:$0xff]  }
 0x2fb   : > { %v2924_v36 = vadd.f32 %v9259_v2, %v2758_v35  ;;  %v7459_v52 = vpop.f32.mrb[2].mxu0 }
 0x2fc   : > { %v2958_v1 = vmax.f32 %v2926_v22, 0.0  ;;  %v2927_v10 = vadd.f32 %v7459_v52, %v9259_v2  ;;  %v2761_v18 = vpop.f32.mrb[3].mxu0 }
 0x2fd   : > { %v2956_v20 = vmax.f32 %v2924_v36, 0.0  ;;  %v2925_v28 = vadd.f32 %v9259_v2, %v2761_v18 }
 0x2fe   : > { %3045 = vst [vmem:[#allocation2 + $0x31] sm:$0xff] %v2958_v1  ;;  %v2959_v30 = vmax.f32 %v2927_v10, 0.0 }
 0x2ff   : > { %3043 = vst [vmem:[#allocation2 + $0x19] sm:$0xff] %v2956_v20  ;;  %v2957_v38 = vmax.f32 %v2925_v28, 0.0 }
 0x300   : > { %3046 = vst [vmem:[#allocation2 + $0x39] sm:$0xff] %v2959_v30  ;;  %v3205_v41 = vpack.c.bf16 %v2959_v30, %v2958_v1  ;;  %v9316_v30 = vld [vmem:[%s9810_s3 + $0x80] sm:$0xff]  }
 0x301   : > { %3044 = vst [vmem:[#allocation2 + $0x21] sm:$0xff] %v2957_v38  ;;  %v7462_v50 = vpop.f32.mrb[4].mxu0  ;;  %v3204_v51 = vpack.c.bf16 %v2957_v38, %v2956_v20 }
 0x302   : > { %v2930_v48 = vadd.f32 %v7462_v50, %v9259_v2  ;;  %v2774_v15 = vpop.f32.mrb[5].mxu0 }
 0x303   : > { %v2928_v58 = vadd.f32 %v9259_v2, %v2774_v15  ;;  %v7463_v59 = vpop.f32.mrb[6].mxu0  ;;  %7505 = vmatmul.mubr.bf16.vlgmr.msra.gmra.mrb[0].mxu1 %v3204_v51 }
 0x304   : > { %v2962_v3 = vmax.f32 %v2930_v48, 0.0  ;;  %v2931_v4 = vadd.f32 %v7463_v59, %v9259_v2  ;;  %v2777_v11 = vpop.f32.mrb[7].mxu0  ;;  %7508 = vmatprep.mubr.bf16.mxu1 %v3205_v41  ;;  %7537 = vmatpush3.bf16.msra.mxu1 %v8522_v61 }
 0x305   : > { %v2960_v19 = vmax.f32 %v2928_v58, 0.0  ;;  %v2929_v29 = vadd.f32 %v9259_v2, %v2777_v11  ;;  %7538 = vmatprep.subr.bf16.mxu1 %v8523_v5 }
 0x306   : > { %3049 = vst [vmem:[#allocation2 + $0x61] sm:$0xff] %v2962_v3  ;;  %v2963_v34 = vmax.f32 %v2931_v4, 0.0 }
 0x307   : > { %3047 = vst [vmem:[#allocation2 + $0x49] sm:$0xff] %v2960_v19  ;;  %v2961_v37 = vmax.f32 %v2929_v29, 0.0 }
 0x308   : > { %3050 = vst [vmem:[#allocation2 + $0x69] sm:$0xff] %v2963_v34  ;;  %v3207_v39 = vpack.c.bf16 %v2963_v34, %v2962_v3  ;;  %7539 = vmatpush3.bf16.msra.mxu1 %v8523_v5 }
 0x309   : > { %3048 = vst [vmem:[#allocation2 + $0x51] sm:$0xff] %v2961_v37  ;;  %v7466_v43 = vpop.f32.mrb[8].mxu0  ;;  %v3206_v44 = vpack.c.bf16 %v2961_v37, %v2960_v19  ;;  %7540 = vmatprep.subr.bf16.mxu1 %v8524_v31 }
 0x30a   : > { %v2934_v46 = vadd.f32 %v7466_v43, %v9259_v2  ;;  %v2790_v53 = vpop.f32.mrb[9].mxu0 }
 0x30b   : > { %v2932_v56 = vadd.f32 %v9259_v2, %v2790_v53  ;;  %v7467_v57 = vpop.f32.mrb[10].mxu0  ;;  %7509 = vmatmul.mubr.bf16.gmra.mrb[4].mxu1 %v3206_v44 }
 0x30c   : > { %v2966_v62 = vmax.f32 %v2934_v46, 0.0  ;;  %v2935_v63 = vadd.f32 %v7467_v57, %v9259_v2  ;;  %v2793_v8 = vpop.f32.mrb[11].mxu0  ;;  %7512 = vmatprep.mubr.bf16.mxu1 %v3207_v39  ;;  %7541 = vmatpush3.bf16.msra.mxu1 %v8524_v31 }
 0x30d   : > { %v2964_v0 = vmax.f32 %v2932_v56, 0.0  ;;  %v2933_v6 = vadd.f32 %v9259_v2, %v2793_v8  ;;  %7542 = vmatprep.subr.bf16.mxu1 %v8525_v45 }
 0x30e   : > { %3053 = vst [vmem:[#allocation2 + $0x91] sm:$0xff] %v2966_v62  ;;  %v2967_v9 = vmax.f32 %v2935_v63, 0.0 }
 0x30f   : > { %3051 = vst [vmem:[#allocation2 + $0x79] sm:$0xff] %v2964_v0  ;;  %v9285_v12 = vmax.f32 %v2933_v6, 0.0 }
 0x310   : > { %3054 = vst [vmem:[#allocation2 + $0x99] sm:$0xff] %v2967_v9  ;;  %v3209_v13 = vpack.c.bf16 %v2967_v9, %v2966_v62  ;;  %7543 = vmatpush3.bf16.msra.mxu1 %v8525_v45 }
 0x311   : > { %3052 = vst [vmem:[#allocation2 + $0x81] sm:$0xff] %v9285_v12  ;;  %v7470_v14 = vpop.f32.mrb[12].mxu0  ;;  %v3208_v23 = vpack.c.bf16 %v9285_v12, %v2964_v0  ;;  %7544 = vmatprep.subr.bf16.mxu1 %v8526_v7 }
 0x312   : > { %v2938_v27 = vadd.f32 %v7470_v14, %v9259_v2  ;;  %v2806_v16 = vpop.f32.mrb[13].mxu0 }
 0x313   : > { %v2936_v17 = vadd.f32 %v9259_v2, %v2806_v16  ;;  %v7471_v24 = vpop.f32.mrb[14].mxu0  ;;  %7513 = vmatmul.mubr.bf16.gmra.mrb[8].mxu1 %v3208_v23 }
 0x314   : > { %v2970_v25 = vmax.f32 %v2938_v27, 0.0  ;;  %v2939_v32 = vadd.f32 %v7471_v24, %v9259_v2  ;;  %v2809_v33 = vpop.f32.mrb[15].mxu0  ;;  %7516 = vmatprep.mubr.bf16.mxu1 %v3209_v13  ;;  %7545 = vmatpush3.bf16.msra.mxu1 %v8526_v7 }
 0x315   : > { %v2968_v40 = vmax.f32 %v2936_v17, 0.0  ;;  %v2937_v42 = vadd.f32 %v9259_v2, %v2809_v33  ;;  %7546 = vmatprep.subr.bf16.mxu1 %v8527_v26 }
 0x316   : > { %3057 = vst [vmem:[#allocation2 + $0xc1] sm:$0xff] %v2970_v25  ;;  %v9299_v49 = vmax.f32 %v2939_v32, 0.0 }
 0x317   : > { %3055 = vst [vmem:[#allocation2 + $0xa9] sm:$0xff] %v2968_v40  ;;  %v2969_v54 = vmax.f32 %v2937_v42, 0.0 }
 0x318   : > { %3058 = vst [vmem:[#allocation2 + $0xc9] sm:$0xff] %v9299_v49  ;;  %v3211_v55 = vpack.c.bf16 %v9299_v49, %v2970_v25  ;;  %7547 = vmatpush3.bf16.msra.mxu1 %v8527_v26 }
 0x319   : > { %3056 = vst [vmem:[#allocation2 + $0xb1] sm:$0xff] %v2969_v54  ;;  %v7474_v60 = vpop.f32.mrb[16].mxu0  ;;  %v9303_v61 = vpack.c.bf16 %v2969_v54, %v2968_v40  ;;  %7548 = vmatprep.subr.bf16.mxu1 %v8528_v47  ;;  %v8596_v54 = vmov 0.0|0.0  }
 0x31a   : > { %v2942_v22 = vadd.f32 %v7474_v60, %v9259_v2  ;;  %v2822_v35 = vpop.f32.mrb[17].mxu0  ;;  %v3112_v60 = vld [vmem:[#allocation2 + $0x38] sm:$0xff] }
 0x31b   : > { %v2940_v36 = vadd.f32 %v9259_v2, %v2822_v35  ;;  %v7475_v52 = vpop.f32.mrb[18].mxu0  ;;  %7517 = vmatmul.mubr.bf16.gmra.mrb[12].mxu1 %v9303_v61  ;;  %v8531_v35 = vld [vmem:[%s9810_s3 + $0x88] sm:$0xff]  }
 0x31c   : > { %v2974_v1 = vmax.f32 %v2942_v22, 0.0  ;;  %v2943_v10 = vadd.f32 %v7475_v52, %v9259_v2  ;;  %v2825_v18 = vpop.f32.mrb[19].mxu0  ;;  %7520 = vmatprep.mubr.bf16.mxu1 %v3211_v55  ;;  %7549 = vmatpush3.bf16.msra.mxu1 %v8528_v47  ;;  %v3110_v55 = vld [vmem:[#allocation2 + $0x20] sm:$0xff]  ;;  %v8532_v52 = vld [vmem:[%s9810_s3 + $0x90] sm:$0xff]  }
 0x31d   : > { %v2972_v20 = vmax.f32 %v2940_v36, 0.0  ;;  %v2941_v28 = vadd.f32 %v9259_v2, %v2825_v18  ;;  %7550 = vmatprep.subr.bf16.mxu1 %v8529_v21  ;;  %v3113_v18 = vld [vmem:[#allocation2 + $0x48] sm:$0xff] }
 0x31e   : > { %3061 = vst [vmem:[#allocation2 + $0xf1] sm:$0xff] %v2974_v1  ;;  %v2975_v38 = vmax.f32 %v2943_v10, 0.0  ;;  %v3116_v10 = vld [vmem:[#allocation2 + $0x68] sm:$0xff] }
 0x31f   : > { %3059 = vst [vmem:[#allocation2 + $0xd9] sm:$0xff] %v2972_v20  ;;  %v2973_v41 = vmax.f32 %v2941_v28, 0.0  ;;  %v3115_v28 = vld [vmem:[#allocation2 + $0x60] sm:$0xff] }
 0x320   : > { %3062 = vst [vmem:[#allocation2 + $0xf9] sm:$0xff] %v2975_v38  ;;  %v9318_v50 = vpack.c.bf16 %v2975_v38, %v2974_v1  ;;  %7551 = vmatpush3.bf16.msra.mxu1 %v8529_v21  ;;  %v3109_v21 = vld [vmem:[#allocation2 + $0x18] sm:$0xff]  ;;  %v3114_v1 = vld [vmem:[#allocation2 + $0x50] sm:$0xff] }
 0x321   : > { %3060 = vst [vmem:[#allocation2 + $0xe1] sm:$0xff] %v2973_v41  ;;  %v7478_v51 = vpop.f32.mrb[20].mxu0  ;;  %v9320_v5 = vpack.c.bf16 %v2973_v41, %v2972_v20  ;;  %7584 = vmatprep.subr.bf16.mxu1 %v9316_v30  ;;  %v9354_v22 = vpack.c.bf16 %v3110_v55, %v3109_v21  ;;  %v9367_v20 = vpack.c.bf16 %v3114_v1, %v3113_v18  ;;  %v8533_v38 = vld [vmem:[%s9810_s3 + $0x98] sm:$0xff]   ;;  %v8539_v18 = vld [vmem:[%s9810_s3 + $0xc8] sm:$0xff]  }
 0x322   : > { %v2946_v48 = vadd.f32 %v7478_v51, %v9259_v2  ;;  %v2838_v15 = vpop.f32.mrb[21].mxu0  ;;  %v9372_v41 = vpack.c.bf16 %v3116_v10, %v3115_v28  ;;  %v3118_v51 = vld [vmem:[#allocation2 + $0x80] sm:$0xff] }
 0x323   : > { %v2944_v58 = vadd.f32 %v9259_v2, %v2838_v15  ;;  %v7479_v59 = vpop.f32.mrb[22].mxu0  ;;  %7521 = vmatmul.mubr.bf16.gmra.mrb[16].mxu1 %v9320_v5  ;;  %v3117_v15 = vld [vmem:[#allocation2 + $0x78] sm:$0xff] }
 0x324   : > { %v2978_v3 = vmax.f32 %v2946_v48, 0.0  ;;  %v2947_v4 = vadd.f32 %v7479_v59, %v9259_v2  ;;  %v2841_v11 = vpop.f32.mrb[23].mxu0  ;;  %7524 = vmatprep.mubr.bf16.mxu1 %v9318_v50  ;;  %v3120_v48 = vld [vmem:[#allocation2 + $0x98] sm:$0xff]  ;;  %v3119_v59 = vld [vmem:[#allocation2 + $0x90] sm:$0xff] }
 0x325   : > { %v2976_v19 = vmax.f32 %v2944_v58, 0.0  ;;  %v2945_v29 = vadd.f32 %v9259_v2, %v2841_v11  ;;  %v9379_v58 = vpack.c.bf16 %v3118_v51, %v3117_v15  ;;  %v8536_v11 = vld [vmem:[%s9810_s3 + $0xb0] sm:$0xff]   ;;  %v3659_v1 = vld [vmem:[#allocation2 + $0x3a] sm:$0xff] }
 0x326   : > { %3065 = vst [vmem:[#allocation2 + $0x121] sm:$0xff] %v2978_v3  ;;  %v2979_v31 = vmax.f32 %v2947_v4, 0.0  ;;  %v9384_v4 = vpack.c.bf16 %v3120_v48, %v3119_v59  ;;  %v3661_v51 = vld [vmem:[#allocation2 + $0x52] sm:$0xff]  ;;  %v3662_v48 = vld [vmem:[#allocation2 + $0x62] sm:$0xff]  ;;  %v3663_v15 = vld [vmem:[#allocation2 + $0x6a] sm:$0xff] }
 0x327   : > { %3063 = vst [vmem:[#allocation2 + $0x109] sm:$0xff] %v2976_v19  ;;  %v2977_v34 = vmax.f32 %v2945_v29, 0.0  ;;  %v3124_v29 = vld [vmem:[#allocation2 + $0xc8] sm:$0xff] }
 0x328   : > { %3066 = vst [vmem:[#allocation2 + $0x129] sm:$0xff] %v2979_v31  ;;  %v9329_v37 = vpack.c.bf16 %v2979_v31, %v2978_v3  ;;  %v8535_v3 = vld [vmem:[%s9810_s3 + $0xa8] sm:$0xff]  }
 0x329   : > { %3064 = vst [vmem:[#allocation2 + $0x111] sm:$0xff] %v2977_v34  ;;  %v7482_v39 = vpop.f32.mrb[24].mxu0  ;;  %v9331_v43 = vpack.c.bf16 %v2977_v34, %v2976_v19  ;;  %v3122_v19 = vld [vmem:[#allocation2 + $0xb0] sm:$0xff]  ;;  %v3121_v31 = vld [vmem:[#allocation2 + $0xa8] sm:$0xff] }
 0x32a   : > { %v2950_v44 = vadd.f32 %v7482_v39, %v9259_v2  ;;  %v2854_v45 = vpop.f32.mrb[25].mxu0  ;;  %v9391_v34 = vpack.c.bf16 %v3122_v19, %v3121_v31  ;;  %v3123_v39 = vld [vmem:[#allocation2 + $0xc0] sm:$0xff] }
 0x32b   : > { %v2948_v46 = vadd.f32 %v9259_v2, %v2854_v45  ;;  %v7483_v53 = vpop.f32.mrb[26].mxu0  ;;  %7525 = vmatmul.mubr.bf16.gmra.mrb[20].mxu1 %v9331_v43  ;;  %v9396_v45 = vpack.c.bf16 %v3124_v29, %v3123_v39  ;;  %v8542_v19 = vld [vmem:[%s9810_s3 + $0xe0] sm:$0xff]   ;;  %v3666_v39 = vld [vmem:[#allocation2 + $0x92] sm:$0xff] }
 0x32c   : > { %v2982_v56 = vmax.f32 %v2950_v44, 0.0  ;;  %v2951_v57 = vadd.f32 %v7483_v53, %v9259_v2  ;;  %v2857_v62 = vpop.f32.mrb[27].mxu0  ;;  %7528 = vmatprep.mubr.bf16.mxu1 %v9329_v37  ;;  %v8537_v44 = vld [vmem:[%s9810_s3 + $0xb8] sm:$0xff]   ;;  %v3126_v53 = vld [vmem:[#allocation2 + $0xe0] sm:$0xff] }
 0x32d   : > { %v2980_v63 = vmax.f32 %v2948_v46, 0.0  ;;  %v2949_v8 = vadd.f32 %v9259_v2, %v2857_v62  ;;  %v8538_v46 = vld [vmem:[%s9810_s3 + $0xc0] sm:$0xff]  }
 0x32e   : > { %3069 = vst [vmem:[#allocation2 + $0x151] sm:$0xff] %v2982_v56  ;;  %v2983_v0 = vmax.f32 %v2951_v57, 0.0  ;;  %v3125_v57 = vld [vmem:[#allocation2 + $0xd8] sm:$0xff]  ;;  %v3665_v31 = vld [vmem:[#allocation2 + $0x82] sm:$0xff] }
 0x32f   : > { %3067 = vst [vmem:[#allocation2 + $0x139] sm:$0xff] %v2980_v63  ;;  %v2981_v6 = vmax.f32 %v2949_v8, 0.0  ;;  %v9403_v62 = vpack.c.bf16 %v3126_v53, %v3125_v57  ;;  %v3664_v29 = vld [vmem:[#allocation2 + $0x7a] sm:$0xff]  ;;  %v8543_v53 = vld [vmem:[%s9810_s3 + $0xe8] sm:$0xff]   ;;  %v8544_v57 = vld [vmem:[%s9810_s3 + $0xf0] sm:$0xff]  }
 0x330   : > { %3070 = vst [vmem:[#allocation2 + $0x159] sm:$0xff] %v2983_v0  ;;  %v9339_v7 = vpack.c.bf16 %v2983_v0, %v2982_v56  ;;  %v3128_v56 = vld [vmem:[#allocation2 + $0xf8] sm:$0xff]  ;;  %v3130_v0 = vld [vmem:[#allocation2 + $0x110] sm:$0xff] }
 0x331   : > { %3068 = vst [vmem:[#allocation2 + $0x141] sm:$0xff] %v2981_v6  ;;  %v7486_v9 = vpop.f32.mrb[28].mxu0  ;;  %v9341_v13 = vpack.c.bf16 %v2981_v6, %v2980_v63  ;;  %v3127_v63 = vld [vmem:[#allocation2 + $0xf0] sm:$0xff]  ;;  %v3132_v6 = vld [vmem:[#allocation2 + $0x128] sm:$0xff] }
 0x332   : > { %v2954_v14 = vadd.f32 %v7486_v9, %v9259_v2  ;;  %v2870_v23 = vpop.f32.mrb[29].mxu0  ;;  %v9405_v8 = vpack.c.bf16 %v3128_v56, %v3127_v63  ;;  %v3129_v9 = vld [vmem:[#allocation2 + $0x108] sm:$0xff] }
 0x333   : > { %v2952_v26 = vadd.f32 %v9259_v2, %v2870_v23  ;;  %v7487_v27 = vpop.f32.mrb[30].mxu0  ;;  %7529 = vmatmul.mubr.bf16.gmra.mrb[24].mxu1 %v9341_v13  ;;  %v3131_v23 = vld [vmem:[#allocation2 + $0x120] sm:$0xff]  ;;  %v3668_v63 = vld [vmem:[#allocation2 + $0xaa] sm:$0xff] }
 0x334   : > { %v2986_v16 = vmax.f32 %v2954_v14, 0.0  ;;  %v2955_v17 = vadd.f32 %v7487_v27, %v9259_v2  ;;  %v2873_v24 = vpop.f32.mrb[31].mxu0  ;;  %7532 = vmatprep.mubr.bf16.mxu1 %v9339_v7  ;;  %v9409_v14 = vpack.c.bf16 %v3130_v0, %v3129_v9  ;;  %v3669_v0 = vld [vmem:[#allocation2 + $0xb2] sm:$0xff]  ;;  %v3671_v9 = vld [vmem:[#allocation2 + $0xca] sm:$0xff] }
 0x335   : > { %v2984_v25 = vmax.f32 %v2952_v26, 0.0  ;;  %v2953_v32 = vadd.f32 %v9259_v2, %v2873_v24  ;;  %v3111_v2 = vld [vmem:[#allocation2 + $0x30] sm:$0xff]  ;;  %v9411_v26 = vpack.c.bf16 %v3132_v6, %v3131_v23  ;;  %v3670_v6 = vld [vmem:[#allocation2 + $0xc2] sm:$0xff]  ;;  %v9460_v23 = vpack.c.bf16 %v3669_v0, %v3668_v63 }
 0x336   : > { %3073 = vst [vmem:[#allocation2 + $0x181] sm:$0xff] %v2986_v16  ;;  %v2987_v33 = vmax.f32 %v2955_v17, 0.0  ;;  %v9359_v36 = vpack.c.bf16 %v3112_v60, %v3111_v2  ;;  %v3133_v17 = vld [vmem:[#allocation2 + $0x138] sm:$0xff]  ;;  %v8551_v63 = vld [vmem:[%s9810_s3 + $0x128] sm:$0xff]   ;;  %v8552_v0 = vld [vmem:[%s9810_s3 + $0x130] sm:$0xff]  }
 0x337   : > { %3071 = vst [vmem:[#allocation2 + $0x169] sm:$0xff] %v2984_v25  ;;  %v2985_v40 = vmax.f32 %v2953_v32, 0.0  ;;  %v3656_v2 = vld [vmem:[#allocation2 + $0x1a] sm:$0xff] }
 0x338   : > { %3074 = vst [vmem:[#allocation2 + $0x189] sm:$0xff] %v2987_v33  ;;  %v9349_v42 = vpack.c.bf16 %v2987_v33, %v2986_v16  ;;  %v3134_v27 = vld [vmem:[#allocation2 + $0x140] sm:$0xff]  ;;  %v3136_v16 = vld [vmem:[#allocation2 + $0x158] sm:$0xff] }
 0x339   : > { %3072 = vst [vmem:[#allocation2 + $0x171] sm:$0xff] %v2985_v40  ;;  %v9351_v47 = vpack.c.bf16 %v2985_v40, %v2984_v25  ;;  %v9415_v24 = vpack.c.bf16 %v3134_v27, %v3133_v17  ;;  %v3135_v25 = vld [vmem:[#allocation2 + $0x150] sm:$0xff]  ;;  %v3654_v33 = vld [vmem:[#allocation2 + $0x2] sm:$0xff]  ;;  %v8545_v27 = vld [vmem:[%s9810_s3 + $0xf8] sm:$0xff]  }
 0x33a   : > { %v9417_v32 = vpack.c.bf16 %v3136_v16, %v3135_v25  ;;  %v3655_v40 = vld [vmem:[#allocation2 + $0xa] sm:$0xff]  ;;  %v9465_v16 = vpack.c.bf16 %v3671_v9, %v3670_v6  ;;  %v8546_v17 = vld [vmem:[%s9810_s3 + $0x100] sm:$0xff]   ;;  %v8553_v6 = vld [vmem:[%s9810_s3 + $0x138] sm:$0xff]  }
 0x33b   : > { %7533 = vmatmul.mubr.bf16.gmra.mrb[28].mxu1 %v9351_v47  ;;  %v3686_v60 = vpack.c.bf16 %v3655_v40, %v3654_v33  ;;  %v3672_v25 = vld [vmem:[#allocation2 + $0xda] sm:$0xff]  ;;  %v3673_v33 = vld [vmem:[#allocation2 + $0xe2] sm:$0xff]  ;;  %v3674_v40 = vld [vmem:[#allocation2 + $0xf2] sm:$0xff] }
 0x33c   : > { %7552 = vmatprep.mubr.bf16.mxu1 %v8596_v54  ;;  %v8554_v9 = vld [vmem:[%s9810_s3 + $0x140] sm:$0xff]  }
 0x33e   : > { %v3137_v55 = vld [vmem:[#allocation2 + $0x168] sm:$0xff] }
 0x340   : > { %v3138_v54 = vld [vmem:[#allocation2 + $0x170] sm:$0xff] }
 0x341   : > { %v9421_v21 = vpack.c.bf16 %v3138_v54, %v3137_v55  ;;  %v3675_v54 = vld [vmem:[#allocation2 + $0xfa] sm:$0xff]  ;;  %v9472_v55 = vpack.c.bf16 %v3673_v33, %v3672_v25 }
 0x342   : > { %v3990_v25 = vld [vmem:[#allocation2 + $0x180] sm:$0xff] }
 0x343   : > { %7553 = vmatmul.mubr.bf16.vlgmr.msra.gmra.mrb[0].mxu1 %v9354_v22 }
 0x344   : > { %7556 = vmatprep.mubr.bf16.mxu1 %v9359_v36  ;;  %7585 = vmatpush3.bf16.msra.mxu1 %v9316_v30  ;;  %v8534_v30 = vld [vmem:[%s9810_s3 + $0xa0] sm:$0xff]  }
 0x345   : > { %7586 = vmatprep.subr.bf16.mxu1 %v8531_v35 }
 0x348   : > { %7587 = vmatpush3.bf16.msra.mxu1 %v8531_v35  ;;  %v3657_v35 = vld [vmem:[#allocation2 + $0x22] sm:$0xff] }
 0x349   : > { %7588 = vmatprep.subr.bf16.mxu1 %v8532_v52  ;;  %v9424_v10 = vpack.c.bf16 %v3657_v35, %v3656_v2  ;;  %v3676_v2 = vld [vmem:[#allocation2 + $0x10a] sm:$0xff]  ;;  %v3677_v35 = vld [vmem:[#allocation2 + $0x112] sm:$0xff] }
 0x34b   : > { %7557 = vmatmul.mubr.bf16.gmra.mrb[4].mxu1 %v9367_v20 }
 0x34c   : > { %7560 = vmatprep.mubr.bf16.mxu1 %v9372_v41  ;;  %7589 = vmatpush3.bf16.msra.mxu1 %v8532_v52  ;;  %v3658_v52 = vld [vmem:[#allocation2 + $0x32] sm:$0xff] }
 0x34d   : > { %7590 = vmatprep.subr.bf16.mxu1 %v8533_v38  ;;  %v9429_v28 = vpack.c.bf16 %v3659_v1, %v3658_v52  ;;  %v3678_v52 = vld [vmem:[#allocation2 + $0x122] sm:$0xff]  ;;  %v3679_v1 = vld [vmem:[#allocation2 + $0x12a] sm:$0xff] }
 0x350   : > { %7591 = vmatpush3.bf16.msra.mxu1 %v8533_v38  ;;  %v8540_v38 = vld [vmem:[%s9810_s3 + $0xd0] sm:$0xff]  }
 0x351   : > { %7592 = vmatprep.subr.bf16.mxu1 %v8534_v30 }
 0x353   : > { %7561 = vmatmul.mubr.bf16.gmra.mrb[8].mxu1 %v9379_v58 }
 0x354   : > { %7564 = vmatprep.mubr.bf16.mxu1 %v9384_v4  ;;  %7593 = vmatpush3.bf16.msra.mxu1 %v8534_v30  ;;  %v3660_v30 = vld [vmem:[#allocation2 + $0x4a] sm:$0xff] }
 0x355   : > { %7594 = vmatprep.subr.bf16.mxu1 %v8535_v3  ;;  %v9436_v59 = vpack.c.bf16 %v3661_v51, %v3660_v30  ;;  %v3680_v30 = vld [vmem:[#allocation2 + $0x13a] sm:$0xff]  ;;  %v3681_v51 = vld [vmem:[#allocation2 + $0x142] sm:$0xff] }
 0x358   : > { %7595 = vmatpush3.bf16.msra.mxu1 %v8535_v3  ;;  %v8541_v3 = vld [vmem:[%s9810_s3 + $0xd8] sm:$0xff]  }
 0x359   : > { %7596 = vmatprep.subr.bf16.mxu1 %v8536_v11 }
 0x35b   : > { %7565 = vmatmul.mubr.bf16.gmra.mrb[12].mxu1 %v9391_v34 }
 0x35c   : > { %7568 = vmatprep.mubr.bf16.mxu1 %v9396_v45  ;;  %7597 = vmatpush3.bf16.msra.mxu1 %v8536_v11  ;;  %v9441_v11 = vpack.c.bf16 %v3663_v15, %v3662_v48  ;;  %v3682_v48 = vld [vmem:[#allocation2 + $0x152] sm:$0xff]  ;;  %v3683_v15 = vld [vmem:[#allocation2 + $0x15a] sm:$0xff] }
 0x35d   : > { %7598 = vmatprep.subr.bf16.mxu1 %v8537_v44 }
 0x360   : > { %7599 = vmatpush3.bf16.msra.mxu1 %v8537_v44  ;;  %v3667_v44 = vld [vmem:[#allocation2 + $0x9a] sm:$0xff] }
 0x361   : > { %7632 = vmatprep.subr.bf16.mxu1 %v8538_v46  ;;  %v9453_v56 = vpack.c.bf16 %v3667_v44, %v3666_v39  ;;  %v8547_v44 = vld [vmem:[%s9810_s3 + $0x108] sm:$0xff]  }
 0x363   : > { %7569 = vmatmul.mubr.bf16.gmra.mrb[16].mxu1 %v9403_v62 }
 0x364   : > { %7572 = vmatprep.mubr.bf16.mxu1 %v9405_v8 }
 0x36b   : > { %7573 = vmatmul.mubr.bf16.gmra.mrb[20].mxu1 %v9409_v14 }
 0x36c   : > { %7576 = vmatprep.mubr.bf16.mxu1 %v9411_v26 }
 0x373   : > { %7577 = vmatmul.mubr.bf16.gmra.mrb[24].mxu1 %v9415_v24 }
 0x374   : > { %7580 = vmatprep.mubr.bf16.mxu1 %v9417_v32 }
 0x37b   : > { %7581 = vmatmul.mubr.bf16.gmra.mrb[28].mxu1 %v9421_v21 }
 0x37c   : > { %7600 = vmatprep.mubr.bf16.mxu1 %v3686_v60  ;;  %v9474_v60 = vpack.c.bf16 %v3675_v54, %v3674_v40  ;;  %v4266_v40 = vld [vmem:[#allocation2 + $0x19] sm:$0xff] }
 0x383   : > { %7601 = vmatmul.mubr.bf16.vlgmr.msra.gmra.mrb[0].mxu1 %v9424_v10 }
 0x384   : > { %7604 = vmatprep.mubr.bf16.mxu1 %v9429_v28  ;;  %7633 = vmatpush3.bf16.msra.mxu1 %v8538_v46  ;;  %v9448_v46 = vpack.c.bf16 %v3665_v31, %v3664_v29  ;;  %v3684_v29 = vld [vmem:[#allocation2 + $0x16a] sm:$0xff]  ;;  %v3685_v31 = vld [vmem:[#allocation2 + $0x172] sm:$0xff] }
 0x385   : > { %7634 = vmatprep.subr.bf16.mxu1 %v8539_v18  ;;  %v9490_v39 = vpack.c.bf16 %v3685_v31, %v3684_v29  ;;  %v4273_v29 = vld [vmem:[#allocation2 + $0x69] sm:$0xff]  ;;  %v9547_v31 = vld [vmem:[#allocation2 + $0x79] sm:$0xff] }
 0x388   : > { %7635 = vmatpush3.bf16.msra.mxu1 %v8539_v18  ;;  %v9478_v18 = vpack.c.bf16 %v3677_v35, %v3676_v2  ;;  %v4269_v2 = vld [vmem:[#allocation2 + $0x39] sm:$0xff]  ;;  %v4271_v35 = vld [vmem:[#allocation2 + $0x51] sm:$0xff] }
 0x389   : > { %7636 = vmatprep.subr.bf16.mxu1 %v8540_v38 }
 0x38b   : > { %7605 = vmatmul.mubr.bf16.gmra.mrb[4].mxu1 %v9436_v59 }
 0x38c   : > { %7608 = vmatprep.mubr.bf16.mxu1 %v9441_v11  ;;  %7637 = vmatpush3.bf16.msra.mxu1 %v8540_v38  ;;  %v9480_v38 = vpack.c.bf16 %v3679_v1, %v3678_v52  ;;  %v4268_v52 = vld [vmem:[#allocation2 + $0x31] sm:$0xff] }
 0x38d   : > { %7638 = vmatprep.subr.bf16.mxu1 %v8541_v3  ;;  %v9535_v1 = vpack.c.bf16 %v4269_v2, %v4268_v52  ;;  %v5206_v52 = vld [vmem:[#allocation2 + $0x129] sm:$0xff] }
 0x390   : > { %7639 = vmatpush3.bf16.msra.mxu1 %v8541_v3  ;;  %v9484_v3 = vpack.c.bf16 %v3681_v51, %v3680_v30  ;;  %v4270_v30 = vld [vmem:[#allocation2 + $0x49] sm:$0xff] }
 0x391   : > { %7640 = vmatprep.subr.bf16.mxu1 %v8542_v19  ;;  %v8555_v51 = vld [vmem:[%s9810_s3 + $0x148] sm:$0xff]  }
 0x393   : > { %7609 = vmatmul.mubr.bf16.gmra.mrb[8].mxu1 %v9448_v46 }
 0x394   : > { %7612 = vmatprep.mubr.bf16.mxu1 %v9453_v56  ;;  %7641 = vmatpush3.bf16.msra.mxu1 %v8542_v19  ;;  %v9486_v19 = vpack.c.bf16 %v3683_v15, %v3682_v48  ;;  %v9540_v48 = vpack.c.bf16 %v4271_v35, %v4270_v30  ;;  %v8556_v15 = vld [vmem:[%s9810_s3 + $0x150] sm:$0xff]  }
 0x395   : > { %7642 = vmatprep.subr.bf16.mxu1 %v8543_v53  ;;  %v5204_v35 = vld [vmem:[#allocation2 + $0x111] sm:$0xff] }
 0x398   : > { %7643 = vmatpush3.bf16.msra.mxu1 %v8543_v53  ;;  %v8548_v53 = vld [vmem:[%s9810_s3 + $0x110] sm:$0xff]  }
 0x399   : > { %7644 = vmatprep.subr.bf16.mxu1 %v8544_v57 }
 0x39b   : > { %7613 = vmatmul.mubr.bf16.gmra.mrb[12].mxu1 %v9460_v23 }
 0x39c   : > { %7616 = vmatprep.mubr.bf16.mxu1 %v9465_v16  ;;  %7645 = vmatpush3.bf16.msra.mxu1 %v8544_v57  ;;  %v8550_v57 = vld [vmem:[%s9810_s3 + $0x120] sm:$0xff]  }
 0x39d   : > { %7646 = vmatprep.subr.bf16.mxu1 %v8545_v27 }
 0x3a0   : > { %7647 = vmatpush3.bf16.msra.mxu1 %v8545_v27  ;;  %v3991_v27 = vld [vmem:[#allocation2 + $0x188] sm:$0xff] }
 0x3a1   : > { %7680 = vmatprep.subr.bf16.mxu1 %v8546_v17  ;;  %v9532_v33 = vpack.c.bf16 %v3991_v27, %v3990_v25  ;;  %v8559_v27 = vld [vmem:[%s9810_s3 + $0x168] sm:$0xff]  }
 0x3a3   : > { %7617 = vmatmul.mubr.bf16.gmra.mrb[16].mxu1 %v9472_v55 }
 0x3a4   : > { %7620 = vmatprep.mubr.bf16.mxu1 %v9474_v60 }
 0x3ab   : > { %7621 = vmatmul.mubr.bf16.gmra.mrb[20].mxu1 %v9478_v18 }
 0x3ac   : > { %7624 = vmatprep.mubr.bf16.mxu1 %v9480_v38 }
 0x3b3   : > { %7625 = vmatmul.mubr.bf16.gmra.mrb[24].mxu1 %v9484_v3 }
 0x3b4   : > { %7628 = vmatprep.mubr.bf16.mxu1 %v9486_v19 }
 0x3bb   : > { %7629 = vmatmul.mubr.bf16.gmra.mrb[28].mxu1 %v9490_v39 }
 0x3bc   : > { %7648 = vmatprep.mubr.bf16.mxu1 %v9354_v22  ;;  %v8549_v22 = vld [vmem:[%s9810_s3 + $0x118] sm:$0xff]  }
 0x3c3   : > { %7649 = vmatmul.mubr.bf16.vlgmr.msra.gmra.mrb[0].mxu1 %v9359_v36 }
 0x3c4   : > { %7652 = vmatprep.mubr.bf16.mxu1 %v9367_v20  ;;  %7681 = vmatpush3.bf16.msra.mxu1 %v8546_v17  ;;  %v4267_v17 = vld [vmem:[#allocation2 + $0x21] sm:$0xff] }
 0x3c5   : > { %7682 = vmatprep.subr.bf16.mxu1 %v8547_v44  ;;  %v4298_v54 = vpack.c.bf16 %v4267_v17, %v4266_v40  ;;  %v9570_v17 = vld [vmem:[#allocation2 + $0xc1] sm:$0xff]  ;;  %v8561_v40 = vld [vmem:[%s9810_s3 + $0x178] sm:$0xff]  }
 0x3c6   : > { %v4305_v25 = vpack.c.bf16 %v9299_v49, %v9570_v17  ;;  %v8563_v49 = vld [vmem:[%s9810_s3 + $0x188] sm:$0xff]  }
 0x3c8   : > { %7683 = vmatpush3.bf16.msra.mxu1 %v8547_v44  ;;  %v4272_v44 = vld [vmem:[#allocation2 + $0x61] sm:$0xff] }
 0x3c9   : > { %7684 = vmatprep.subr.bf16.mxu1 %v8548_v53 }
 0x3cb   : > { %7653 = vmatmul.mubr.bf16.gmra.mrb[4].mxu1 %v9372_v41 }
 0x3cc   : > { %7656 = vmatprep.mubr.bf16.mxu1 %v9379_v58  ;;  %7685 = vmatpush3.bf16.msra.mxu1 %v8548_v53  ;;  %v9549_v53 = vpack.c.bf16 %v4273_v29, %v4272_v44  ;;  %v5210_v29 = vld [vmem:[#allocation2 + $0x159] sm:$0xff] }
 0x3cd   : > { %7686 = vmatprep.subr.bf16.mxu1 %v8549_v22 }
 0x3d0   : > { %7687 = vmatpush3.bf16.msra.mxu1 %v8549_v22  ;;  %v8557_v22 = vld [vmem:[%s9810_s3 + $0x158] sm:$0xff]  }
 0x3d1   : > { %7688 = vmatprep.subr.bf16.mxu1 %v8550_v57 }
 0x3d3   : > { %7657 = vmatmul.mubr.bf16.gmra.mrb[8].mxu1 %v9384_v4 }
 0x3d4   : > { %7660 = vmatprep.mubr.bf16.mxu1 %v9391_v34  ;;  %7689 = vmatpush3.bf16.msra.mxu1 %v8550_v57  ;;  %v4302_v57 = vpack.c.bf16 %v9285_v12, %v9547_v31  ;;  %v8560_v12 = vld [vmem:[%s9810_s3 + $0x170] sm:$0xff]  }
 0x3d5   : > { %7690 = vmatprep.subr.bf16.mxu1 %v8551_v63 }
 0x3d8   : > { %7691 = vmatpush3.bf16.msra.mxu1 %v8551_v63  ;;  %v8558_v63 = vld [vmem:[%s9810_s3 + $0x160] sm:$0xff]  }
 0x3d9   : > { %7692 = vmatprep.subr.bf16.mxu1 %v8552_v0 }
 0x3db   : > { %7661 = vmatmul.mubr.bf16.gmra.mrb[12].mxu1 %v9396_v45 }
 0x3dc   : > { %7664 = vmatprep.mubr.bf16.mxu1 %v9403_v62  ;;  %7693 = vmatpush3.bf16.msra.mxu1 %v8552_v0  ;;  %v4277_v0 = vld [vmem:[#allocation2 + $0x99] sm:$0xff] }
 0x3dd   : > { %7694 = vmatprep.subr.bf16.mxu1 %v8553_v6 }
 0x3e0   : > { %7695 = vmatpush3.bf16.msra.mxu1 %v8553_v6  ;;  %v4276_v6 = vld [vmem:[#allocation2 + $0x91] sm:$0xff] }
 0x3e1   : > { %7728 = vmatprep.subr.bf16.mxu1 %v8554_v9 }
 0x3e3   : > { %7665 = vmatmul.mubr.bf16.gmra.mrb[16].mxu1 %v9405_v8 }
 0x3e4   : > { %7668 = vmatprep.mubr.bf16.mxu1 %v9409_v14 }
 0x3eb   : > { %7669 = vmatmul.mubr.bf16.gmra.mrb[20].mxu1 %v9411_v26 }
 0x3ec   : > { %7672 = vmatprep.mubr.bf16.mxu1 %v9415_v24 }
 0x3f3   : > { %7673 = vmatmul.mubr.bf16.gmra.mrb[24].mxu1 %v9417_v32 }
 0x3f4   : > { %7676 = vmatprep.mubr.bf16.mxu1 %v9421_v21 }
 0x3fb   : > { %7677 = vmatmul.mubr.bf16.gmra.mrb[28].mxu1 %v9532_v33 }
 0x3fc   : > { %7696 = vmatprep.mubr.bf16.mxu1 %v4298_v54  ;;  %v8585_v54 = vld [vmem:[%s9810_s3 + $0x238] sm:$0xff]  }
 0x403   : > { %7697 = vmatmul.mubr.bf16.vlgmr.msra.gmra.mrb[0].mxu1 %v9535_v1 }
 0x404   : > { %7700 = vmatprep.mubr.bf16.mxu1 %v9540_v48  ;;  %7729 = vmatpush3.bf16.msra.mxu1 %v8554_v9  ;;  %v9560_v9 = vpack.c.bf16 %v4277_v0, %v4276_v6  ;;  %v5211_v0 = vld [vmem:[#allocation2 + $0x169] sm:$0xff] }
 0x405   : > { %7730 = vmatprep.subr.bf16.mxu1 %v8555_v51 }
 0x408   : > { %7731 = vmatpush3.bf16.msra.mxu1 %v8555_v51  ;;  %v5205_v51 = vld [vmem:[#allocation2 + $0x121] sm:$0xff] }
 0x409   : > { %7732 = vmatprep.subr.bf16.mxu1 %v8556_v15 }
 0x40b   : > { %7701 = vmatmul.mubr.bf16.gmra.mrb[4].mxu1 %v9549_v53 }
 0x40c   : > { %7704 = vmatprep.mubr.bf16.mxu1 %v4302_v57  ;;  %7733 = vmatpush3.bf16.msra.mxu1 %v8556_v15  ;;  %v5208_v15 = vld [vmem:[#allocation2 + $0x141] sm:$0xff]  ;;  %v5212_v57 = vld [vmem:[#allocation2 + $0x171] sm:$0xff] }
 0x40d   : > { %7734 = vmatprep.subr.bf16.mxu1 %v8557_v22  ;;  %v5230_v6 = vpack.c.bf16 %v5212_v57, %v5211_v0 }
 0x410   : > { %7735 = vmatpush3.bf16.msra.mxu1 %v8557_v22 }
 0x411   : > { %7736 = vmatprep.subr.bf16.mxu1 %v8558_v63 }
 0x413   : > { %7705 = vmatmul.mubr.bf16.gmra.mrb[8].mxu1 %v9560_v9 }
 0x414   : > { %7708 = vmatprep.mubr.bf16.mxu1 %v9303_v61  ;;  %7737 = vmatpush3.bf16.msra.mxu1 %v8558_v63  ;;  %v8562_v61 = vld [vmem:[%s9810_s3 + $0x180] sm:$0xff]   ;;  %v5214_v63 = vld [vmem:[#allocation2 + $0x189] sm:$0xff] }
 0x415   : > { %7738 = vmatprep.subr.bf16.mxu1 %v8559_v27 }
 0x418   : > { %7739 = vmatpush3.bf16.msra.mxu1 %v8559_v27 }
 0x419   : > { %7740 = vmatprep.subr.bf16.mxu1 %v8560_v12 }
 0x41b   : > { %7709 = vmatmul.mubr.bf16.gmra.mrb[12].mxu1 %v4305_v25 }
 0x41c   : > { %7712 = vmatprep.mubr.bf16.mxu1 %v9320_v5  ;;  %7741 = vmatpush3.bf16.msra.mxu1 %v8560_v12  ;;  %v8565_v5 = vld [vmem:[%s9810_s3 + $0x198] sm:$0xff]  }
 0x41d   : > { %7742 = vmatprep.subr.bf16.mxu1 %v8561_v40  ;;  %v5215_v12 = vld [vmem:[#allocation2 + $0x199] sm:$0xff] }
 0x420   : > { %7743 = vmatpush3.bf16.msra.mxu1 %v8561_v40  ;;  %v5491_v40 = vld [vmem:[#allocation2 + $0x32] sm:$0xff] }
 0x421   : > { %7776 = vmatprep.subr.bf16.mxu1 %v8562_v61 }
 0x423   : > { %7713 = vmatmul.mubr.bf16.gmra.mrb[16].mxu1 %v9318_v50  ;;  %v8564_v50 = vld [vmem:[%s9810_s3 + $0x190] sm:$0xff]  }
 0x424   : > { %7716 = vmatprep.mubr.bf16.mxu1 %v9331_v43  ;;  %v8567_v43 = vld [vmem:[%s9810_s3 + $0x1a8] sm:$0xff]  }
 0x42b   : > { %7717 = vmatmul.mubr.bf16.gmra.mrb[20].mxu1 %v9329_v37  ;;  %v8566_v37 = vld [vmem:[%s9810_s3 + $0x1a0] sm:$0xff]  }
 0x42c   : > { %7720 = vmatprep.mubr.bf16.mxu1 %v9341_v13  ;;  %v8569_v13 = vld [vmem:[%s9810_s3 + $0x1b8] sm:$0xff]  }
 0x433   : > { %7721 = vmatmul.mubr.bf16.gmra.mrb[24].mxu1 %v9339_v7  ;;  %v8568_v7 = vld [vmem:[%s9810_s3 + $0x1b0] sm:$0xff]  }
 0x434   : > { %7724 = vmatprep.mubr.bf16.mxu1 %v9351_v47  ;;  %v4602_v47 = vld [vmem:[#allocation2 + $0x182] sm:$0xff] }
 0x43b   : > { %7725 = vmatmul.mubr.bf16.gmra.mrb[28].mxu1 %v9349_v42  ;;  %v8570_v42 = vld [vmem:[%s9810_s3 + $0x1c0] sm:$0xff]  }
 0x43c   : > { %7744 = vmatprep.mubr.bf16.mxu1 %v9424_v10  ;;  %v4603_v10 = vld [vmem:[#allocation2 + $0x18a] sm:$0xff] }
 0x443   : > { %7745 = vmatmul.mubr.bf16.vlgmr.msra.gmra.mrb[0].mxu1 %v9429_v28  ;;  %v9627_v28 = vpack.c.bf16 %v4603_v10, %v4602_v47  ;;  %v5498_v47 = vld [vmem:[#allocation2 + $0x82] sm:$0xff]  ;;  %v5499_v10 = vld [vmem:[#allocation2 + $0x92] sm:$0xff] }
 0x444   : > { %7748 = vmatprep.mubr.bf16.mxu1 %v9436_v59  ;;  %7777 = vmatpush3.bf16.msra.mxu1 %v8562_v61  ;;  %v8571_v59 = vld [vmem:[%s9810_s3 + $0x1c8] sm:$0xff]   ;;  %v5492_v61 = vld [vmem:[#allocation2 + $0x3a] sm:$0xff] }
 0x445   : > { %7778 = vmatprep.subr.bf16.mxu1 %v8563_v49 }
 0x448   : > { %7779 = vmatpush3.bf16.msra.mxu1 %v8563_v49  ;;  %v5523_v49 = vpack.c.bf16 %v5492_v61, %v5491_v40 }
 0x449   : > { %7780 = vmatprep.subr.bf16.mxu1 %v8564_v50 }
 0x44b   : > { %7749 = vmatmul.mubr.bf16.gmra.mrb[4].mxu1 %v9441_v11  ;;  %v8572_v11 = vld [vmem:[%s9810_s3 + $0x1d0] sm:$0xff]  }
 0x44c   : > { %7752 = vmatprep.mubr.bf16.mxu1 %v9448_v46  ;;  %7781 = vmatpush3.bf16.msra.mxu1 %v8564_v50  ;;  %v5196_v46 = vld [vmem:[#allocation2 + $0xb1] sm:$0xff] }
 0x44d   : > { %7782 = vmatprep.subr.bf16.mxu1 %v8565_v5  ;;  %v5493_v50 = vld [vmem:[#allocation2 + $0x4a] sm:$0xff] }
 0x450   : > { %7783 = vmatpush3.bf16.msra.mxu1 %v8565_v5  ;;  %v5494_v5 = vld [vmem:[#allocation2 + $0x52] sm:$0xff] }
 0x451   : > { %7784 = vmatprep.subr.bf16.mxu1 %v8566_v37 }
 0x453   : > { %7753 = vmatmul.mubr.bf16.gmra.mrb[8].mxu1 %v9453_v56  ;;  %v5198_v56 = vld [vmem:[#allocation2 + $0xc9] sm:$0xff] }
 0x454   : > { %7756 = vmatprep.mubr.bf16.mxu1 %v9460_v23  ;;  %7785 = vmatpush3.bf16.msra.mxu1 %v8566_v37  ;;  %v5195_v23 = vld [vmem:[#allocation2 + $0xa9] sm:$0xff] }
 0x455   : > { %7786 = vmatprep.subr.bf16.mxu1 %v8567_v43  ;;  %v5495_v37 = vld [vmem:[#allocation2 + $0x62] sm:$0xff] }
 0x458   : > { %7787 = vmatpush3.bf16.msra.mxu1 %v8567_v43  ;;  %v5496_v43 = vld [vmem:[#allocation2 + $0x6a] sm:$0xff] }
 0x459   : > { %7788 = vmatprep.subr.bf16.mxu1 %v8568_v7 }
 0x45b   : > { %7757 = vmatmul.mubr.bf16.gmra.mrb[12].mxu1 %v9465_v16  ;;  %v5222_v16 = vpack.c.bf16 %v5196_v46, %v5195_v23  ;;  %v5510_v46 = vld [vmem:[#allocation2 + $0x112] sm:$0xff]  ;;  %v5512_v23 = vld [vmem:[#allocation2 + $0x12a] sm:$0xff] }
 0x45c   : > { %7760 = vmatprep.mubr.bf16.mxu1 %v9472_v55  ;;  %7789 = vmatpush3.bf16.msra.mxu1 %v8568_v7  ;;  %v8583_v55 = vld [vmem:[%s9810_s3 + $0x228] sm:$0xff]   ;;  %v5524_v7 = vpack.c.bf16 %v5494_v5, %v5493_v50 }
 0x45d   : > { %7790 = vmatprep.subr.bf16.mxu1 %v8569_v13 }
 0x460   : > { %7791 = vmatpush3.bf16.msra.mxu1 %v8569_v13  ;;  %v5525_v13 = vpack.c.bf16 %v5496_v43, %v5495_v37  ;;  %v6392_v37 = vld [vmem:[%s8650_s29 + $0x49] sm:$0xff] }
 0x461   : > { %7824 = vmatprep.subr.bf16.mxu1 %v8570_v42 }
 0x463   : > { %7761 = vmatmul.mubr.bf16.gmra.mrb[16].mxu1 %v9474_v60  ;;  %v5223_v60 = vpack.c.bf16 %v5198_v56, %v9570_v17  ;;  %v5216_v17 = vld [vmem:[#allocation2 + $0x1a1] sm:$0xff] }
 0x464   : > { %7764 = vmatprep.mubr.bf16.mxu1 %v9478_v18  ;;  %v8584_v18 = vld [vmem:[%s9810_s3 + $0x230] sm:$0xff]   ;;  %v5232_v25 = vpack.c.bf16 %v5216_v17, %v5215_v12  ;;  %v5511_v56 = vld [vmem:[#allocation2 + $0x122] sm:$0xff] }
 0x46b   : > { %7765 = vmatmul.mubr.bf16.gmra.mrb[20].mxu1 %v9480_v38  ;;  %v5200_v38 = vld [vmem:[#allocation2 + $0xe1] sm:$0xff] }
 0x46c   : > { %7768 = vmatprep.mubr.bf16.mxu1 %v9484_v3  ;;  %v5202_v3 = vld [vmem:[#allocation2 + $0xf9] sm:$0xff] }
 0x473   : > { %7769 = vmatmul.mubr.bf16.gmra.mrb[24].mxu1 %v9486_v19  ;;  %v5199_v19 = vld [vmem:[#allocation2 + $0xd9] sm:$0xff] }
 0x474   : > { %7772 = vmatprep.mubr.bf16.mxu1 %v9490_v39  ;;  %v5224_v39 = vpack.c.bf16 %v5200_v38, %v5199_v19  ;;  %v5515_v38 = vld [vmem:[#allocation2 + $0x152] sm:$0xff] }
 0x47b   : > { %7773 = vmatmul.mubr.bf16.gmra.mrb[28].mxu1 %v9627_v28 }
 0x47c   : > { %7792 = vmatprep.mubr.bf16.mxu1 %v9359_v36  ;;  %v8573_v36 = vld [vmem:[%s9810_s3 + $0x1d8] sm:$0xff]  }
 0x483   : > { %7793 = vmatmul.mubr.bf16.vlgmr.msra.gmra.mrb[0].mxu1 %v9367_v20  ;;  %v8574_v20 = vld [vmem:[%s9810_s3 + $0x1e0] sm:$0xff]  }
 0x484   : > { %7796 = vmatprep.mubr.bf16.mxu1 %v9372_v41  ;;  %7825 = vmatpush3.bf16.msra.mxu1 %v8570_v42  ;;  %v8575_v41 = vld [vmem:[%s9810_s3 + $0x1e8] sm:$0xff]   ;;  %v5497_v42 = vld [vmem:[#allocation2 + $0x7a] sm:$0xff] }
 0x485   : > { %7826 = vmatprep.subr.bf16.mxu1 %v8571_v59 }
 0x488   : > { %7827 = vmatpush3.bf16.msra.mxu1 %v8571_v59  ;;  %v5500_v59 = vld [vmem:[#allocation2 + $0x9a] sm:$0xff] }
 0x489   : > { %7828 = vmatprep.subr.bf16.mxu1 %v8572_v11 }
 0x48b   : > { %7797 = vmatmul.mubr.bf16.gmra.mrb[4].mxu1 %v9379_v58  ;;  %v8576_v58 = vld [vmem:[%s9810_s3 + $0x1f0] sm:$0xff]  }
 0x48c   : > { %7800 = vmatprep.mubr.bf16.mxu1 %v9384_v4  ;;  %7829 = vmatpush3.bf16.msra.mxu1 %v8572_v11  ;;  %v8577_v4 = vld [vmem:[%s9810_s3 + $0x1f8] sm:$0xff]   ;;  %v5526_v11 = vpack.c.bf16 %v5498_v47, %v5497_v42 }
 0x48d   : > { %7830 = vmatprep.subr.bf16.mxu1 %v8573_v36 }
 0x490   : > { %7831 = vmatpush3.bf16.msra.mxu1 %v8573_v36  ;;  %v5527_v36 = vpack.c.bf16 %v5500_v59, %v5499_v10  ;;  %v6393_v59 = vld [vmem:[%s8650_s29 + $0x51] sm:$0xff] }
 0x491   : > { %7832 = vmatprep.subr.bf16.mxu1 %v8574_v20 }
 0x493   : > { %7801 = vmatmul.mubr.bf16.gmra.mrb[8].mxu1 %v9391_v34  ;;  %v8578_v34 = vld [vmem:[%s9810_s3 + $0x200] sm:$0xff]  }
 0x494   : > { %7804 = vmatprep.mubr.bf16.mxu1 %v9396_v45  ;;  %7833 = vmatpush3.bf16.msra.mxu1 %v8574_v20  ;;  %v8586_v45 = vld [vmem:[#allocation2] sm:$0xff]  ;;  %v5501_v20 = vld [vmem:[#allocation2 + $0xaa] sm:$0xff] }
 0x495   : > { %7834 = vmatprep.subr.bf16.mxu1 %v8575_v41 }
 0x498   : > { %7835 = vmatpush3.bf16.msra.mxu1 %v8575_v41  ;;  %v5502_v41 = vld [vmem:[#allocation2 + $0xb2] sm:$0xff] }
 0x499   : > { %7836 = vmatprep.subr.bf16.mxu1 %v8576_v58 }
 0x49b   : > { %7805 = vmatmul.mubr.bf16.gmra.mrb[12].mxu1 %v9403_v62  ;;  %v4926_v62 = vpack.c.bf16 %v8586_v45, %v8586_v45 }
 0x49c   : > { %7808 = vmatprep.mubr.bf16.mxu1 %v9405_v8  ;;  %7837 = vmatpush3.bf16.msra.mxu1 %v8576_v58  ;;  %v8579_v8 = vld [vmem:[%s9810_s3 + $0x208] sm:$0xff]  }
 0x49d   : > { %7838 = vmatprep.subr.bf16.mxu1 %v8577_v4  ;;  %v5503_v58 = vld [vmem:[#allocation2 + $0xc2] sm:$0xff] }
 0x4a0   : > { %7839 = vmatpush3.bf16.msra.mxu1 %v8577_v4  ;;  %v5504_v4 = vld [vmem:[#allocation2 + $0xca] sm:$0xff] }
 0x4a1   : > { %7872 = vmatprep.subr.bf16.mxu1 %v8578_v34  ;;  %v5529_v45 = vpack.c.bf16 %v5504_v4, %v5503_v58 }
 0x4a3   : > { %7809 = vmatmul.mubr.bf16.gmra.mrb[16].mxu1 %v9409_v14  ;;  %v8580_v14 = vld [vmem:[%s9810_s3 + $0x210] sm:$0xff]  }
 0x4a4   : > { %7812 = vmatprep.mubr.bf16.mxu1 %v9411_v26  ;;  %v5192_v26 = vld [vmem:[#allocation2 + $0x81] sm:$0xff] }
 0x4ab   : > { %7813 = vmatmul.mubr.bf16.gmra.mrb[20].mxu1 %v9415_v24  ;;  %v5220_v24 = vpack.c.bf16 %v5192_v26, %v9547_v31  ;;  %v5207_v31 = vld [vmem:[#allocation2 + $0x139] sm:$0xff] }
 0x4ac   : > { %7816 = vmatprep.mubr.bf16.mxu1 %v9417_v32  ;;  %v8581_v32 = vld [vmem:[%s9810_s3 + $0x218] sm:$0xff]   ;;  %v5228_v44 = vpack.c.bf16 %v5208_v15, %v5207_v31 }
 0x4ad   : > { %v5508_v26 = vld [vmem:[#allocation2 + $0xfa] sm:$0xff] }
 0x4b3   : > { %7817 = vmatmul.mubr.bf16.gmra.mrb[24].mxu1 %v9421_v21  ;;  %v8582_v21 = vld [vmem:[%s9810_s3 + $0x220] sm:$0xff]  }
 0x4b4   : > { %7820 = vmatprep.mubr.bf16.mxu1 %v9532_v33  ;;  %v5201_v33 = vld [vmem:[#allocation2 + $0xf1] sm:$0xff] }
 0x4b5   : > { %v5225_v2 = vpack.c.bf16 %v5202_v3, %v5201_v33  ;;  %v5516_v3 = vld [vmem:[#allocation2 + $0x15a] sm:$0xff]  ;;  %v5517_v33 = vld [vmem:[#allocation2 + $0x16a] sm:$0xff] }
 0x4bb   : > { %7821 = vmatmul.mubr.bf16.gmra.mrb[28].mxu1 %v4926_v62  ;;  %v5505_v62 = vld [vmem:[#allocation2 + $0xda] sm:$0xff] }
 0x4bc   : > { %7840 = vmatprep.mubr.bf16.mxu1 %v9535_v1  ;;  %v5203_v1 = vld [vmem:[#allocation2 + $0x109] sm:$0xff] }
 0x4bd   : > { %v5226_v30 = vpack.c.bf16 %v5204_v35, %v5203_v1  ;;  %v5521_v35 = vld [vmem:[#allocation2 + $0x19a] sm:$0xff] }
 0x4c3   : > { %7841 = vmatmul.mubr.bf16.vlgmr.msra.gmra.mrb[0].mxu1 %v9540_v48  ;;  %v5227_v48 = vpack.c.bf16 %v5206_v52, %v5205_v51  ;;  %v5522_v52 = vld [vmem:[#allocation2 + $0x1a2] sm:$0xff]  ;;  %v6390_v51 = vld [vmem:[%s8650_s29 + $0x31] sm:$0xff] }
 0x4c4   : > { %7844 = vmatprep.mubr.bf16.mxu1 %v9549_v53  ;;  %7873 = vmatpush3.bf16.msra.mxu1 %v8578_v34  ;;  %v5209_v53 = vld [vmem:[#allocation2 + $0x151] sm:$0xff]  ;;  %v5528_v34 = vpack.c.bf16 %v5502_v41, %v5501_v20  ;;  %v5538_v1 = vpack.c.bf16 %v5522_v52, %v5521_v35  ;;  %v6402_v35 = vld [vmem:[%s8650_s29 + $0xc1] sm:$0xff] }
 0x4c5   : > { %7874 = vmatprep.subr.bf16.mxu1 %v8579_v8  ;;  %v5229_v22 = vpack.c.bf16 %v5210_v29, %v5209_v53  ;;  %v6388_v29 = vld [vmem:[%s8650_s29 + $0x19] sm:$0xff] }
 0x4c8   : > { %7875 = vmatpush3.bf16.msra.mxu1 %v8579_v8  ;;  %v5506_v8 = vld [vmem:[#allocation2 + $0xe2] sm:$0xff] }
 0x4c9   : > { %7876 = vmatprep.subr.bf16.mxu1 %v8580_v14 }
 0x4cb   : > { %7845 = vmatmul.mubr.bf16.gmra.mrb[4].mxu1 %v5220_v24  ;;  %v5530_v24 = vpack.c.bf16 %v5506_v8, %v5505_v62  ;;  %v6398_v8 = vld [vmem:[%s8650_s29 + $0x91] sm:$0xff] }
 0x4cc   : > { %7848 = vmatprep.mubr.bf16.mxu1 %v9560_v9  ;;  %7877 = vmatpush3.bf16.msra.mxu1 %v8580_v14  ;;  %v5213_v9 = vld [vmem:[#allocation2 + $0x181] sm:$0xff]  ;;  %v5507_v14 = vld [vmem:[#allocation2 + $0xf2] sm:$0xff] }
 0x4cd   : > { %7878 = vmatprep.subr.bf16.mxu1 %v8581_v32  ;;  %v5231_v27 = vpack.c.bf16 %v5214_v63, %v5213_v9  ;;  %v6389_v63 = vld [vmem:[%s8650_s29 + $0x21] sm:$0xff] }
 0x4d0   : > { %7879 = vmatpush3.bf16.msra.mxu1 %v8581_v32  ;;  %v5531_v32 = vpack.c.bf16 %v5508_v26, %v5507_v14 }
 0x4d1   : > { %7880 = vmatprep.subr.bf16.mxu1 %v8582_v21 }
 0x4d3   : > { %7849 = vmatmul.mubr.bf16.gmra.mrb[8].mxu1 %v5222_v16 }
 0x4d4   : > { %7852 = vmatprep.mubr.bf16.mxu1 %v5223_v60  ;;  %7881 = vmatpush3.bf16.msra.mxu1 %v8582_v21  ;;  %v5509_v21 = vld [vmem:[#allocation2 + $0x10a] sm:$0xff]  ;;  %v5513_v60 = vld [vmem:[#allocation2 + $0x13a] sm:$0xff] }
 0x4d5   : > { %7882 = vmatprep.subr.bf16.mxu1 %v8583_v55  ;;  %v5532_v16 = vpack.c.bf16 %v5510_v46, %v5509_v21  ;;  %v6399_v46 = vld [vmem:[%s8650_s29 + $0x99] sm:$0xff] }
 0x4d8   : > { %7883 = vmatpush3.bf16.msra.mxu1 %v8583_v55  ;;  %v5533_v55 = vpack.c.bf16 %v5512_v23, %v5511_v56 }
 0x4d9   : > { %7884 = vmatprep.subr.bf16.mxu1 %v8584_v18 }
 0x4db   : > { %7853 = vmatmul.mubr.bf16.gmra.mrb[12].mxu1 %v5224_v39  ;;  %v5535_v39 = vpack.c.bf16 %v5516_v3, %v5515_v38 }
 0x4dc   : > { %7856 = vmatprep.mubr.bf16.mxu1 %v5225_v2  ;;  %7885 = vmatpush3.bf16.msra.mxu1 %v8584_v18  ;;  %v5514_v18 = vld [vmem:[#allocation2 + $0x142] sm:$0xff] }
 0x4dd   : > { %7886 = vmatprep.subr.bf16.mxu1 %v8585_v54  ;;  %v5534_v19 = vpack.c.bf16 %v5514_v18, %v5513_v60 }
 0x4e0   : > { %7887 = vmatpush3.bf16.msra.mxu1 %v8585_v54  ;;  %v5518_v54 = vld [vmem:[#allocation2 + $0x172] sm:$0xff] }
 0x4e1   : > { %v5536_v2 = vpack.c.bf16 %v5518_v54, %v5517_v33 }
 0x4e3   : > { %7857 = vmatmul.mubr.bf16.gmra.mrb[16].mxu1 %v5226_v30  ;;  %v9700_v30 = vld [vmem:[%s9811_s4] ss:$0 sm:$0xff] }
 0x4e4   : > { %7860 = vmatprep.mubr.bf16.mxu1 %v5227_v48 }
 0x4eb   : > { %7861 = vmatmul.mubr.bf16.gmra.mrb[20].mxu1 %v5228_v44 }
 0x4ec   : > { %7864 = vmatprep.mubr.bf16.mxu1 %v5229_v22 }
 0x4f3   : > { %7865 = vmatmul.mubr.bf16.gmra.mrb[24].mxu1 %v5230_v6 }
 0x4f4   : > { %7868 = vmatprep.mubr.bf16.mxu1 %v5231_v27 }
 0x4fb   : > { %7869 = vmatmul.mubr.bf16.gmra.mrb[28].mxu1 %v5232_v25 }
 0x4fc   : > { %7888 = vmatprep.mubr.bf16.mxu1 %v5523_v49  ;;  %v6394_v49 = vld [vmem:[%s8650_s29 + $0x61] sm:$0xff] }
 0x503   : > { %7889 = vmatmul.mubr.bf16.vlgmr.msra.gmra.mrb[0].mxu1 %v5524_v7 }
 0x504   : > { %7892 = vmatprep.mubr.bf16.mxu1 %v5525_v13  ;;  %v6395_v13 = vld [vmem:[%s8650_s29 + $0x69] sm:$0xff] }
 0x50b   : > { %7893 = vmatmul.mubr.bf16.gmra.mrb[4].mxu1 %v5526_v11 }
 0x50c   : > { %7896 = vmatprep.mubr.bf16.mxu1 %v5527_v36 }
 0x513   : > { %7897 = vmatmul.mubr.bf16.gmra.mrb[8].mxu1 %v5528_v34 }
 0x514   : > { %7900 = vmatprep.mubr.bf16.mxu1 %v5529_v45 }
 0x51b   : > { %7901 = vmatmul.mubr.bf16.gmra.mrb[12].mxu1 %v5530_v24  ;;  %v6396_v24 = vld [vmem:[%s8650_s29 + $0x79] sm:$0xff] }
 0x51c   : > { %7904 = vmatprep.mubr.bf16.mxu1 %v5531_v32 }
 0x523   : > { %7905 = vmatmul.mubr.bf16.gmra.mrb[16].mxu1 %v5532_v16 }
 0x524   : > { %7908 = vmatprep.mubr.bf16.mxu1 %v5533_v55  ;;  %v6397_v55 = vld [vmem:[%s8650_s29 + $0x81] sm:$0xff] }
 0x52b   : > { %7909 = vmatmul.mubr.bf16.gmra.mrb[20].mxu1 %v5534_v19 }
 0x52c   : > { %7912 = vmatprep.mubr.bf16.mxu1 %v5535_v39 }
 0x533   : > { %7913 = vmatmul.mubr.bf16.gmra.mrb[24].mxu1 %v5536_v2 }
 0x534   : > { %7916 = vmatprep.mubr.bf16.mxu1 %v9627_v28  ;;  %v6391_v28 = vld [vmem:[%s8650_s29 + $0x39] sm:$0xff] }
 0x53b   : > { %7917 = vmatmul.mubr.bf16.gmra.mrb[28].mxu1 %v5538_v1 }
 0x5d6   : > { %v7890_v48 = vpop.f32.mrb[0].mxu1 }
 0x5d7   : > { %v5806_v15 = vadd.f32 %v7890_v48, %v9700_v30  ;;  %v5638_v31 = vpop.f32.mrb[1].mxu1 }
 0x5d8   : > { %v5804_v44 = vadd.f32 %v9700_v30, %v5638_v31  ;;  %v7891_v53 = vpop.f32.mrb[2].mxu1 }
 0x5d9   : > { %v5838_v22 = vadd.f32 %v6390_v51, %v5806_v15  ;;  %v5807_v57 = vadd.f32 %v7891_v53, %v9700_v30  ;;  %v5641_v0 = vpop.f32.mrb[3].mxu1  ;;  %v6400_v51 = vld [vmem:[%s8650_s29 + $0xa9] sm:$0xff]  ;;  %v6401_v53 = vld [vmem:[%s8650_s29 + $0xb1] sm:$0xff] }
 0x5da   : > { %v5836_v6 = vadd.f32 %v6388_v29, %v5804_v44  ;;  %v5805_v9 = vadd.f32 %v9700_v30, %v5641_v0  ;;  %v6403_v29 = vld [vmem:[%s8650_s29 + $0xc9] sm:$0xff] }
 0x5db   : > { %v5870_v27 = vmax.f32 %v5838_v22, 0.0  ;;  %v5839_v12 = vadd.f32 %v6391_v28, %v5807_v57 }
 0x5dc   : > { %v5868_v17 = vmax.f32 %v5836_v6, 0.0  ;;  %v5837_v25 = vadd.f32 %v6389_v63, %v5805_v9 }
 0x5dd   : > { %5902 = vst [vmem:[%s9713_s8 + $0x10] sm:$0xff] %v5870_v27  ;;  %v5871_v40 = vmax.f32 %v5839_v12, 0.0 }
 0x5de   : > { %5900 = vst [vmem:[%s9713_s8] sm:$0xff] %v5868_v17  ;;  %v5869_v61 = vmax.f32 %v5837_v25, 0.0  ;;  %v7894_v50 = vpop.f32.mrb[4].mxu1  ;;  %v6406_v25 = vld [vmem:[%s8650_s29 + $0xf1] sm:$0xff] }
 0x5df   : > { %5903 = vst [vmem:[%s9713_s8 + $0x18] sm:$0xff] %v5871_v40  ;;  %v5810_v5 = vadd.f32 %v7894_v50, %v9700_v30  ;;  %v5654_v43 = vpop.f32.mrb[5].mxu1 }
 0x5e0   : > { %5901 = vst [vmem:[%s9713_s8 + $0x8] sm:$0xff] %v5869_v61  ;;  %v5808_v7 = vadd.f32 %v9700_v30, %v5654_v43  ;;  %v7895_v42 = vpop.f32.mrb[6].mxu1 }
 0x5e1   : > { %v5842_v47 = vadd.f32 %v6394_v49, %v5810_v5  ;;  %v5811_v10 = vadd.f32 %v7895_v42, %v9700_v30  ;;  %v5657_v11 = vpop.f32.mrb[7].mxu1  ;;  %v6404_v49 = vld [vmem:[%s8650_s29 + $0xd9] sm:$0xff]  ;;  %v6405_v42 = vld [vmem:[%s8650_s29 + $0xe1] sm:$0xff] }
 0x5e2   : > { %v5840_v36 = vadd.f32 %v6392_v37, %v5808_v7  ;;  %v5809_v20 = vadd.f32 %v9700_v30, %v5657_v11  ;;  %v6407_v37 = vld [vmem:[%s8650_s29 + $0xf9] sm:$0xff] }
 0x5e3   : > { %v5874_v41 = vmax.f32 %v5842_v47, 0.0  ;;  %v5843_v58 = vadd.f32 %v6395_v13, %v5811_v10 }
 0x5e4   : > { %v5872_v4 = vmax.f32 %v5840_v36, 0.0  ;;  %v5841_v34 = vadd.f32 %v6393_v59, %v5809_v20 }
 0x5e5   : > { %5906 = vst [vmem:[%s9713_s8 + $0x30] sm:$0xff] %v5874_v41  ;;  %v5875_v45 = vmax.f32 %v5843_v58, 0.0 }
 0x5e6   : > { %5904 = vst [vmem:[%s9713_s8 + $0x20] sm:$0xff] %v5872_v4  ;;  %v5873_v62 = vmax.f32 %v5841_v34, 0.0  ;;  %v7898_v14 = vpop.f32.mrb[8].mxu1  ;;  %v6410_v34 = vld [vmem:[%s8650_s29 + $0x121] sm:$0xff] }
 0x5e7   : > { %5907 = vst [vmem:[%s9713_s8 + $0x38] sm:$0xff] %v5875_v45  ;;  %v5814_v26 = vadd.f32 %v7898_v14, %v9700_v30  ;;  %v5670_v32 = vpop.f32.mrb[9].mxu1 }
 0x5e8   : > { %5905 = vst [vmem:[%s9713_s8 + $0x28] sm:$0xff] %v5873_v62  ;;  %v5812_v21 = vadd.f32 %v9700_v30, %v5670_v32  ;;  %v7899_v56 = vpop.f32.mrb[10].mxu1 }
 0x5e9   : > { %v5846_v23 = vadd.f32 %v6398_v8, %v5814_v26  ;;  %v5815_v16 = vadd.f32 %v7899_v56, %v9700_v30  ;;  %v5673_v60 = vpop.f32.mrb[11].mxu1  ;;  %v6408_v8 = vld [vmem:[%s8650_s29 + $0x109] sm:$0xff]  ;;  %v6409_v56 = vld [vmem:[%s8650_s29 + $0x111] sm:$0xff] }
 0x5ea   : > { %v5844_v18 = vadd.f32 %v6396_v24, %v5812_v21  ;;  %v5813_v38 = vadd.f32 %v9700_v30, %v5673_v60  ;;  %v6411_v24 = vld [vmem:[%s8650_s29 + $0x129] sm:$0xff] }
 0x5eb   : > { %v5878_v3 = vmax.f32 %v5846_v23, 0.0  ;;  %v5847_v19 = vadd.f32 %v6399_v46, %v5815_v16 }
 0x5ec   : > { %v5876_v39 = vmax.f32 %v5844_v18, 0.0  ;;  %v5845_v33 = vadd.f32 %v6397_v55, %v5813_v38 }
 0x5ed   : > { %5910 = vst [vmem:[%s9713_s8 + $0x50] sm:$0xff] %v5878_v3  ;;  %v5879_v54 = vmax.f32 %v5847_v19, 0.0 }
 0x5ee   : > { %5908 = vst [vmem:[%s9713_s8 + $0x40] sm:$0xff] %v5876_v39  ;;  %v5877_v2 = vmax.f32 %v5845_v33, 0.0  ;;  %v7902_v52 = vpop.f32.mrb[12].mxu1  ;;  %v6414_v33 = vld [vmem:[%s8650_s29 + $0x151] sm:$0xff] }
 0x5ef   : > { %5911 = vst [vmem:[%s9713_s8 + $0x58] sm:$0xff] %v5879_v54  ;;  %v5818_v1 = vadd.f32 %v7902_v52, %v9700_v30  ;;  %v5686_v48 = vpop.f32.mrb[13].mxu1 }
 0x5f0   : > { %5909 = vst [vmem:[%s9713_s8 + $0x48] sm:$0xff] %v5877_v2  ;;  %v5816_v15 = vadd.f32 %v9700_v30, %v5686_v48  ;;  %v7903_v31 = vpop.f32.mrb[14].mxu1 }
 0x5f1   : > { %v5850_v44 = vadd.f32 %v6402_v35, %v5818_v1  ;;  %v5819_v28 = vadd.f32 %v7903_v31, %v9700_v30  ;;  %v5689_v22 = vpop.f32.mrb[15].mxu1  ;;  %v6412_v35 = vld [vmem:[%s8650_s29 + $0x139] sm:$0xff]  ;;  %v6413_v31 = vld [vmem:[%s8650_s29 + $0x141] sm:$0xff] }
 0x5f2   : > { %v5848_v57 = vadd.f32 %v6400_v51, %v5816_v15  ;;  %v5817_v63 = vadd.f32 %v9700_v30, %v5689_v22  ;;  %v6415_v51 = vld [vmem:[%s8650_s29 + $0x159] sm:$0xff] }
 0x5f3   : > { %v5882_v0 = vmax.f32 %v5850_v44, 0.0  ;;  %v5851_v6 = vadd.f32 %v6403_v29, %v5819_v28 }
 0x5f4   : > { %v5880_v9 = vmax.f32 %v5848_v57, 0.0  ;;  %v5849_v27 = vadd.f32 %v6401_v53, %v5817_v63 }
 0x5f5   : > { %5914 = vst [vmem:[%s9713_s8 + $0x70] sm:$0xff] %v5882_v0  ;;  %v5883_v12 = vmax.f32 %v5851_v6, 0.0 }
 0x5f6   : > { %5912 = vst [vmem:[%s9713_s8 + $0x60] sm:$0xff] %v5880_v9  ;;  %v5881_v17 = vmax.f32 %v5849_v27, 0.0  ;;  %v7906_v40 = vpop.f32.mrb[16].mxu1  ;;  %v6418_v27 = vld [vmem:[%s8650_s29 + $0x181] sm:$0xff] }
 0x5f7   : > { %5915 = vst [vmem:[%s9713_s8 + $0x78] sm:$0xff] %v5883_v12  ;;  %v5822_v61 = vadd.f32 %v7906_v40, %v9700_v30  ;;  %v5702_v50 = vpop.f32.mrb[17].mxu1 }
 0x5f8   : > { %5913 = vst [vmem:[%s9713_s8 + $0x68] sm:$0xff] %v5881_v17  ;;  %v5820_v5 = vadd.f32 %v9700_v30, %v5702_v50  ;;  %v7907_v43 = vpop.f32.mrb[18].mxu1 }
 0x5f9   : > { %v5854_v7 = vadd.f32 %v6406_v25, %v5822_v61  ;;  %v5823_v13 = vadd.f32 %v7907_v43, %v9700_v30  ;;  %v5705_v47 = vpop.f32.mrb[19].mxu1  ;;  %v6416_v25 = vld [vmem:[%s8650_s29 + $0x169] sm:$0xff]  ;;  %v6417_v43 = vld [vmem:[%s8650_s29 + $0x171] sm:$0xff] }
 0x5fa   : > { %v5852_v10 = vadd.f32 %v6404_v49, %v5820_v5  ;;  %v5821_v59 = vadd.f32 %v9700_v30, %v5705_v47  ;;  %v6419_v49 = vld [vmem:[%s8650_s29 + $0x189] sm:$0xff] }
 0x5fb   : > { %v5886_v11 = vmax.f32 %v5854_v7, 0.0  ;;  %v5855_v36 = vadd.f32 %v6407_v37, %v5823_v13 }
 0x5fc   : > { %v5884_v20 = vmax.f32 %v5852_v10, 0.0  ;;  %v5853_v41 = vadd.f32 %v6405_v42, %v5821_v59 }
 0x5fd   : > { %5918 = vst [vmem:[%s9713_s8 + $0x90] sm:$0xff] %v5886_v11  ;;  %v5887_v58 = vmax.f32 %v5855_v36, 0.0 }
 0x5fe   : > { %5916 = vst [vmem:[%s9713_s8 + $0x80] sm:$0xff] %v5884_v20  ;;  %v5885_v4 = vmax.f32 %v5853_v41, 0.0  ;;  %v7910_v45 = vpop.f32.mrb[20].mxu1 }
 0x5ff   : > { %5919 = vst [vmem:[%s9713_s8 + $0x98] sm:$0xff] %v5887_v58  ;;  %v5826_v62 = vadd.f32 %v7910_v45, %v9700_v30  ;;  %v5718_v14 = vpop.f32.mrb[21].mxu1 }
 0x600   : > { %5917 = vst [vmem:[%s9713_s8 + $0x88] sm:$0xff] %v5885_v4  ;;  %v5824_v26 = vadd.f32 %v9700_v30, %v5718_v14  ;;  %v7911_v32 = vpop.f32.mrb[22].mxu1 }
 0x601   : > { %v5858_v21 = vadd.f32 %v6410_v34, %v5826_v62  ;;  %v5827_v46 = vadd.f32 %v7911_v32, %v9700_v30  ;;  %v5721_v23 = vpop.f32.mrb[23].mxu1 }
 0x602   : > { %v5856_v16 = vadd.f32 %v6408_v8, %v5824_v26  ;;  %v5825_v55 = vadd.f32 %v9700_v30, %v5721_v23 }
 0x603   : > { %v5890_v60 = vmax.f32 %v5858_v21, 0.0  ;;  %v5859_v18 = vadd.f32 %v6411_v24, %v5827_v46 }
 0x604   : > { %v5888_v38 = vmax.f32 %v5856_v16, 0.0  ;;  %v5857_v3 = vadd.f32 %v6409_v56, %v5825_v55 }
 0x605   : > { %5922 = vst [vmem:[%s9713_s8 + $0xb0] sm:$0xff] %v5890_v60  ;;  %v5891_v19 = vmax.f32 %v5859_v18, 0.0 }
 0x606   : > { %5920 = vst [vmem:[%s9713_s8 + $0xa0] sm:$0xff] %v5888_v38  ;;  %v5889_v39 = vmax.f32 %v5857_v3, 0.0  ;;  %v7914_v54 = vpop.f32.mrb[24].mxu1 }
 0x607   : > { %5923 = vst [vmem:[%s9713_s8 + $0xb8] sm:$0xff] %v5891_v19  ;;  %v5830_v2 = vadd.f32 %v7914_v54, %v9700_v30  ;;  %v5734_v52 = vpop.f32.mrb[25].mxu1 }
 0x608   : > { %5921 = vst [vmem:[%s9713_s8 + $0xa8] sm:$0xff] %v5889_v39  ;;  %v5828_v1 = vadd.f32 %v9700_v30, %v5734_v52  ;;  %v7915_v48 = vpop.f32.mrb[26].mxu1 }
 0x609   : > { %v5862_v15 = vadd.f32 %v6414_v33, %v5830_v2  ;;  %v5831_v29 = vadd.f32 %v7915_v48, %v9700_v30  ;;  %v5737_v44 = vpop.f32.mrb[27].mxu1 }
 0x60a   : > { %v5860_v28 = vadd.f32 %v6412_v35, %v5828_v1  ;;  %v5829_v53 = vadd.f32 %v9700_v30, %v5737_v44 }
 0x60b   : > { %v5894_v22 = vmax.f32 %v5862_v15, 0.0  ;;  %v5863_v57 = vadd.f32 %v6415_v51, %v5831_v29 }
 0x60c   : > { %v5892_v63 = vmax.f32 %v5860_v28, 0.0  ;;  %v5861_v0 = vadd.f32 %v6413_v31, %v5829_v53 }
 0x60d   : > { %5926 = vst [vmem:[%s9713_s8 + $0xd0] sm:$0xff] %v5894_v22  ;;  %v5895_v6 = vmax.f32 %v5863_v57, 0.0 }
 0x60e   : > { %5924 = vst [vmem:[%s9713_s8 + $0xc0] sm:$0xff] %v5892_v63  ;;  %v5893_v9 = vmax.f32 %v5861_v0, 0.0  ;;  %v7918_v12 = vpop.f32.mrb[28].mxu1 }
 0x60f   : > { %5927 = vst [vmem:[%s9713_s8 + $0xd8] sm:$0xff] %v5895_v6  ;;  %v5834_v17 = vadd.f32 %v7918_v12, %v9700_v30  ;;  %v5750_v40 = vpop.f32.mrb[29].mxu1 }
 0x610   : > { %5925 = vst [vmem:[%s9713_s8 + $0xc8] sm:$0xff] %v5893_v9  ;;  %v5832_v61 = vadd.f32 %v9700_v30, %v5750_v40  ;;  %v7919_v50 = vpop.f32.mrb[30].mxu1 }
 0x611   : > { %v5866_v5 = vadd.f32 %v6418_v27, %v5834_v17  ;;  %v5835_v37 = vadd.f32 %v7919_v50, %v9700_v30  ;;  %v5753_v7 = vpop.f32.mrb[31].mxu1 }
 0x612   : > { %v5864_v13 = vadd.f32 %v6416_v25, %v5832_v61  ;;  %v5833_v42 = vadd.f32 %v9700_v30, %v5753_v7 }
 0x613   : > { %v5898_v47 = vmax.f32 %v5866_v5, 0.0  ;;  %v5867_v10 = vadd.f32 %v6419_v49, %v5835_v37 }
 0x614   : > { %v5896_v59 = vmax.f32 %v5864_v13, 0.0  ;;  %v5865_v11 = vadd.f32 %v6417_v43, %v5833_v42 }
 0x615   : > { %5930 = vst [vmem:[%s9713_s8 + $0xf0] sm:$0xff] %v5898_v47  ;;  %v5899_v36 = vmax.f32 %v5867_v10, 0.0 }
 0x616   : > { %5928 = vst [vmem:[%s9713_s8 + $0xe0] sm:$0xff] %v5896_v59  ;;  %v5897_v20 = vmax.f32 %v5865_v11, 0.0 }
 0x617   : > { %5931 = vst [vmem:[%s9713_s8 + $0xf8] sm:$0xff] %v5899_v36 }
 0x618   : > { %5929 = vst [vmem:[%s9713_s8 + $0xe8] sm:$0xff] %v5897_v20 }
 0x619 PF: > { %s15_s18 = sadd.s32 1, %s8593_s18  }
 0x61a   : > { %p12_p4 = scmp.ge.s32.totalorder %s15_s18, 4  }
 0x61c   :  { %14 = sbr.rel (!%p12_p4) target bundleno = 1 (0x1), region = 90 }

</bundles_post_ra>
